<compile_context>
chip_gen: v5e
topology: v5e:2x2
jax: 0.10.0
libtpu: 0.0.40
codegen_flags: <defaults>
</compile_context>

<pallas_src>
import jax
import jax.numpy as jnp
from jax.experimental import pallas as pl
from jax.experimental.pallas import tpu as pltpu


L_PAD = 64          # input length; kept as the (padded) row count through all blocks
C_PAD = 128         # padded channel count (full lane vreg); real channels <= 80
N_BLOCKS = 4
OUT_CLASSES = 3
BATCH_TILE = 2      # samples packed along the row axis per grid step
ROWS = BATCH_TILE * L_PAD


# -----------------------------------------------------------------------------
# Fused whole-network kernel (one grid step == BATCH_TILE batch samples)
# -----------------------------------------------------------------------------
def _net2_kernel(x_ref,
                 g1_ref, g2_ref,
                 w1_ref, b1_ref,
                 w2_ref, b2_ref,
                 wd_ref, bd_ref,
                 gap_ref, wf_ref, bf_ref, o_ref):
    f32 = jnp.float32
    bf16 = jnp.bfloat16

    a = x_ref[0]                                            # (ROWS, C_PAD) f32

    for i in range(N_BLOCKS):                               # static, unrolled
        a16 = a.astype(bf16)

        # --- conv1 (k3, stride 2, pad 1) + folded BN1 + ReLU (Dropout = id) ---
        # center tap rows are reused by the 1x1 stride-2 shortcut below
        rows_c = jnp.dot(g1_ref[i, 1], a16,
                         preferred_element_type=f32).astype(bf16)
        h = jnp.dot(rows_c, w1_ref[i, 1], preferred_element_type=f32)
        for j in (0, 2):
            r = jnp.dot(g1_ref[i, j], a16,
                        preferred_element_type=f32).astype(bf16)
            h = h + jnp.dot(r, w1_ref[i, j], preferred_element_type=f32)
        h = jnp.maximum(h + b1_ref[i], 0.0)

        # --- conv2 (k3, stride 1, pad 1) + folded BN2 ---
        h16 = h.astype(bf16)
        r = jnp.dot(g2_ref[i, 0], h16, preferred_element_type=f32).astype(bf16)
        g = jnp.dot(r, w2_ref[i, 0], preferred_element_type=f32)
        for j in (1, 2):
            r = jnp.dot(g2_ref[i, j], h16,
                        preferred_element_type=f32).astype(bf16)
            g = g + jnp.dot(r, w2_ref[i, j], preferred_element_type=f32)
        g = g + b2_ref[i]

        # --- shortcut: conv(k1, stride 2) + folded BN (reuses rows_c) ---
        sk = jnp.dot(rows_c, wd_ref[i], preferred_element_type=f32) + bd_ref[i]

        a = jnp.maximum(g + sk, 0.0)

    # head: AdaptiveAvgPool1d(1) over each sample's valid rows + Linear, fused.
    feat = jnp.dot(gap_ref[...], a, preferred_element_type=f32)     # (8, C_PAD)
    logits = jnp.dot(feat, wf_ref[...], preferred_element_type=f32) + bf_ref[...]
    o_ref[0] = logits                                               # lane-dense store


# -----------------------------------------------------------------------------
# Wrapper
# -----------------------------------------------------------------------------
def _full_spec(arr):
    nd = arr.ndim
    return pl.BlockSpec(arr.shape, lambda n, _nd=nd: (0,) * _nd)


@jax.jit
def net2_forward(params, x_ncl):
    """x_ncl: (N, C_in=2, L=64) float32, PyTorch Conv1d 'NCW' layout."""
    n, c_in, l = x_ncl.shape
    x = jnp.transpose(x_ncl, (0, 2, 1)).astype(jnp.float32)          # NCL -> NLC
    x = jnp.pad(x, ((0, 0), (0, L_PAD - l), (0, C_PAD - c_in)))      # pad L, lane-pad C

    # pack BATCH_TILE samples per grid step along the row axis
    g = -(-n // BATCH_TILE)
    x = jnp.pad(x, ((0, g * BATCH_TILE - n), (0, 0), (0, 0)))
    x = x.reshape(g, ROWS, C_PAD)

    weight_args = (params["g1"], params["g2"],
                   params["w1"], params["b1"],
                   params["w2"], params["b2"],
                   params["wd"], params["bd"],
                   params["gap"], params["wf"], params["bf"])

    out = pl.pallas_call(
        _net2_kernel,
        out_shape=jax.ShapeDtypeStruct((g, 8, C_PAD), jnp.float32),
        grid=(g,),
        in_specs=[pl.BlockSpec((1, ROWS, C_PAD), lambda i: (i, 0, 0))]
                 + [_full_spec(w) for w in weight_args],
        out_specs=pl.BlockSpec((1, 8, C_PAD), lambda i: (i, 0, 0)),
        compiler_params=pltpu.CompilerParams(
            dimension_semantics=("parallel",)),
    )(x, *weight_args)

    logits = out[:, :BATCH_TILE, :OUT_CLASSES].reshape(g * BATCH_TILE, OUT_CLASSES)
    return logits[:n]                                                # (N, 3)


# -----------------------------------------------------------------------------
# Deterministic synthetic parameters (eval-mode BN folded, channel-padded)
# -----------------------------------------------------------------------------
def build_params(seed=0):
    key = jax.random.PRNGKey(seed)

    def nxt():
        nonlocal key
        key, k = jax.random.split(key)
        return k

    c_in, growth, base = 2, 16, 32
    block_cout = [base + i * growth for i in range(N_BLOCKS)]         # [32,48,64,80]
    block_cin = [c_in] + block_cout[:-1]                              # [2,32,48,64]
    lin = [L_PAD // (2 ** i) for i in range(N_BLOCKS)]                # [64,32,16,8]
    lout = [v // 2 for v in lin]                                      # [32,16,8,4]

    def conv_taps(cin, cout, k):
        # PyTorch Conv1d weight (cout, cin, k) -> per-tap (C_PAD, C_PAD) matmul (f32).
        w = 0.1 * jax.random.normal(nxt(), (cout, cin, k), jnp.float32)
        taps = jnp.zeros((k, C_PAD, C_PAD), jnp.float32)
        taps = taps.at[:, :cin, :cout].set(jnp.transpose(w, (2, 1, 0)))
        return taps

    def bn_fold(c, eps=1e-5):
        gamma = 1.0 + 0.1 * jax.random.normal(nxt(), (c,), jnp.float32)
        beta = 0.1 * jax.random.normal(nxt(), (c,), jnp.float32)
        mean = 0.1 * jax.random.normal(nxt(), (c,), jnp.float32)
        var = 0.5 + jax.random.uniform(nxt(), (c,), jnp.float32)
        scale = gamma / jnp.sqrt(var + eps)
        bias = beta - mean * scale
        s = jnp.zeros((C_PAD,), jnp.float32).at[:c].set(scale)
        b = jnp.zeros((1, C_PAD), jnp.float32).at[0, :c].set(bias)
        return s, b

    def gather_taps(l_in, l_out, stride):
        # G_tap[t, u] = 1 iff u == stride*t + tap - 1 (padding=1), valid t/u only;
        # replicated block-diagonally over the BATCH_TILE packed samples, bf16.
        t = jnp.arange(L_PAD)[:, None]
        u = jnp.arange(L_PAD)[None, :]
        mats = []
        for tap in range(3):
            src = stride * t + (tap - 1)
            m = (t < l_out) & (u == src) & (src >= 0) & (src < l_in)
            mats.append(m.astype(jnp.float32))
        gm = jnp.stack(mats)                                          # (3, L, L)
        eye = jnp.eye(BATCH_TILE, dtype=jnp.float32)
        gm = jnp.einsum('ab,tuv->taubv', eye, gm).reshape(3, ROWS, ROWS)
        return gm.astype(jnp.bfloat16)

    w1, b1, w2, b2, wd, bd, g1, g2 = ([] for _ in range(8))
    for i in range(N_BLOCKS):
        cin, cout = block_cin[i], block_cout[i]
        s, b = bn_fold(cout)
        w1.append((conv_taps(cin, cout, 3) * s[None, None, :]).astype(jnp.bfloat16))
        b1.append(b)
        s, b = bn_fold(cout)
        w2.append((conv_taps(cout, cout, 3) * s[None, None, :]).astype(jnp.bfloat16))
        b2.append(b)
        s, b = bn_fold(cout)
        wd.append((conv_taps(cin, cout, 1)[0] * s[None, :]).astype(jnp.bfloat16))
        bd.append(b)
        g1.append(gather_taps(lin[i], lout[i], 2))                    # conv1, stride 2
        g2.append(gather_taps(lout[i], lout[i], 1))                   # conv2, stride 1

    # head: per-sample GAP selector over the 4 valid rows of each packed sample
    gap = jnp.zeros((8, ROWS), jnp.float32)
    for bidx in range(BATCH_TILE):
        gap = gap.at[bidx, bidx * L_PAD: bidx * L_PAD + lout[-1]].set(1.0 / lout[-1])

    fcw = 0.05 * jax.random.normal(nxt(), (OUT_CLASSES, block_cout[-1]), jnp.float32)
    fcb = 0.05 * jax.random.normal(nxt(), (OUT_CLASSES,), jnp.float32)
    wf = jnp.zeros((C_PAD, C_PAD), jnp.float32).at[:block_cout[-1], :OUT_CLASSES].set(fcw.T)
    bf = jnp.zeros((1, C_PAD), jnp.float32).at[0, :OUT_CLASSES].set(fcb)

    return {
        "w1": jnp.stack(w1), "b1": jnp.stack(b1),
        "w2": jnp.stack(w2), "b2": jnp.stack(b2),
        "wd": jnp.stack(wd), "bd": jnp.stack(bd),
        "g1": jnp.stack(g1), "g2": jnp.stack(g2),
        "gap": gap, "wf": wf, "bf": bf,
    }


if __name__ == "__main__":
    params = build_params(seed=0)
    # PyTorch-style input: (batch=2, in_channels=2, length=64)
    x = jax.random.normal(jax.random.PRNGKey(0), (2, 2, 64), dtype=jnp.float32)

    out = net2_forward(params, x)
    jax.block_until_ready(out)

    assert out.shape == (2, OUT_CLASSES), out.shape
    assert bool(jnp.all(jnp.isfinite(out)))
    print("KERNEL_OK")
</pallas_src>

<mosaic_0001>
module attributes {stable_mosaic.version = 11 : i64} {
  func.func @_net2_kernel(%arg0: i32, %arg1: memref<1x128x128xf32, #tpu.memory_space<vmem>>, %arg2: memref<4x3x128x128xbf16, #tpu.memory_space<vmem>>, %arg3: memref<4x3x128x128xbf16, #tpu.memory_space<vmem>>, %arg4: memref<4x3x128x128xbf16, #tpu.memory_space<vmem>>, %arg5: memref<4x1x128xf32, #tpu.memory_space<vmem>>, %arg6: memref<4x3x128x128xbf16, #tpu.memory_space<vmem>>, %arg7: memref<4x1x128xf32, #tpu.memory_space<vmem>>, %arg8: memref<4x128x128xbf16, #tpu.memory_space<vmem>>, %arg9: memref<4x1x128xf32, #tpu.memory_space<vmem>>, %arg10: memref<8x128xf32, #tpu.memory_space<vmem>>, %arg11: memref<128x128xf32, #tpu.memory_space<vmem>>, %arg12: memref<1x128xf32, #tpu.memory_space<vmem>>, %arg13: memref<1x8x128xf32, #tpu.memory_space<vmem>>) attributes {dimension_semantics = [#tpu.dimension_semantics<parallel>], iteration_bounds = array<i64: 1>, scalar_prefetch = 0 : i64, scratch_operands = 0 : i64, tpu.core_type = #tpu.core_type<tc>, window_params = [{transform_indices = @transform_0, window_bounds = array<i64: 1, 128, 128>}, {pipeline_mode = #tpu.pipeline_mode<synchronous>, transform_indices = @transform_1, window_bounds = array<i64: 4, 3, 128, 128>}, {pipeline_mode = #tpu.pipeline_mode<synchronous>, transform_indices = @transform_2, window_bounds = array<i64: 4, 3, 128, 128>}, {pipeline_mode = #tpu.pipeline_mode<synchronous>, transform_indices = @transform_3, window_bounds = array<i64: 4, 3, 128, 128>}, {pipeline_mode = #tpu.pipeline_mode<synchronous>, transform_indices = @transform_4, window_bounds = array<i64: 4, 1, 128>}, {pipeline_mode = #tpu.pipeline_mode<synchronous>, transform_indices = @transform_5, window_bounds = array<i64: 4, 3, 128, 128>}, {pipeline_mode = #tpu.pipeline_mode<synchronous>, transform_indices = @transform_6, window_bounds = array<i64: 4, 1, 128>}, {pipeline_mode = #tpu.pipeline_mode<synchronous>, transform_indices = @transform_7, window_bounds = array<i64: 4, 128, 128>}, {pipeline_mode = #tpu.pipeline_mode<synchronous>, transform_indices = @transform_8, window_bounds = array<i64: 4, 1, 128>}, {pipeline_mode = #tpu.pipeline_mode<synchronous>, transform_indices = @transform_9, window_bounds = array<i64: 8, 128>}, {pipeline_mode = #tpu.pipeline_mode<synchronous>, transform_indices = @transform_10, window_bounds = array<i64: 128, 128>}, {pipeline_mode = #tpu.pipeline_mode<synchronous>, transform_indices = @transform_11, window_bounds = array<i64: 1, 128>}, {transform_indices = @transform_12, window_bounds = array<i64: 1, 8, 128>}]} {
    %c0 = arith.constant 0 : index
    %c0_0 = arith.constant 0 : index
    %c0_1 = arith.constant 0 : index
    %0 = vector.load %arg1[%c0, %c0_0, %c0_1] : memref<1x128x128xf32, #tpu.memory_space<vmem>>, vector<1x128x128xf32>
    %1 = vector.shape_cast %0 : vector<1x128x128xf32> to vector<128x128xf32>
    %2 = arith.truncf %1 : vector<128x128xf32> to vector<128x128xbf16>
    %c0_2 = arith.constant 0 : index
    %c1 = arith.constant 1 : index
    %c0_3 = arith.constant 0 : index
    %c0_4 = arith.constant 0 : index
    %3 = vector.load %arg2[%c0_2, %c1, %c0_3, %c0_4] : memref<4x3x128x128xbf16, #tpu.memory_space<vmem>>, vector<1x1x128x128xbf16>
    %4 = vector.shape_cast %3 : vector<1x1x128x128xbf16> to vector<128x128xbf16>
    %cst = arith.constant dense<0.000000e+00> : vector<128x128xf32>
    %5 = tpu.matmul %4, %2, %cst {dimension_numbers = #tpu.dot_dimension_numbers<[1], [0], [0], [1], [0, 0, 1, 1], [], []>} : vector<128x128xbf16>, vector<128x128xbf16>, vector<128x128xf32> -> vector<128x128xf32>
    %6 = arith.truncf %5 : vector<128x128xf32> to vector<128x128xbf16>
    %c0_5 = arith.constant 0 : index
    %c1_6 = arith.constant 1 : index
    %c0_7 = arith.constant 0 : index
    %c0_8 = arith.constant 0 : index
    %7 = vector.load %arg4[%c0_5, %c1_6, %c0_7, %c0_8] : memref<4x3x128x128xbf16, #tpu.memory_space<vmem>>, vector<1x1x128x128xbf16>
    %8 = vector.shape_cast %7 : vector<1x1x128x128xbf16> to vector<128x128xbf16>
    %cst_9 = arith.constant dense<0.000000e+00> : vector<128x128xf32>
    %9 = tpu.matmul %6, %8, %cst_9 {dimension_numbers = #tpu.dot_dimension_numbers<[1], [0], [0], [1], [0, 0, 1, 1], [], []>} : vector<128x128xbf16>, vector<128x128xbf16>, vector<128x128xf32> -> vector<128x128xf32>
    %c0_10 = arith.constant 0 : index
    %c0_11 = arith.constant 0 : index
    %c0_12 = arith.constant 0 : index
    %c0_13 = arith.constant 0 : index
    %10 = vector.load %arg2[%c0_10, %c0_11, %c0_12, %c0_13] : memref<4x3x128x128xbf16, #tpu.memory_space<vmem>>, vector<1x1x128x128xbf16>
    %11 = vector.shape_cast %10 : vector<1x1x128x128xbf16> to vector<128x128xbf16>
    %cst_14 = arith.constant dense<0.000000e+00> : vector<128x128xf32>
    %12 = tpu.matmul %11, %2, %cst_14 {dimension_numbers = #tpu.dot_dimension_numbers<[1], [0], [0], [1], [0, 0, 1, 1], [], []>} : vector<128x128xbf16>, vector<128x128xbf16>, vector<128x128xf32> -> vector<128x128xf32>
    %13 = arith.truncf %12 : vector<128x128xf32> to vector<128x128xbf16>
    %c0_15 = arith.constant 0 : index
    %c0_16 = arith.constant 0 : index
    %c0_17 = arith.constant 0 : index
    %c0_18 = arith.constant 0 : index
    %14 = vector.load %arg4[%c0_15, %c0_16, %c0_17, %c0_18] : memref<4x3x128x128xbf16, #tpu.memory_space<vmem>>, vector<1x1x128x128xbf16>
    %15 = vector.shape_cast %14 : vector<1x1x128x128xbf16> to vector<128x128xbf16>
    %cst_19 = arith.constant dense<0.000000e+00> : vector<128x128xf32>
    %16 = tpu.matmul %13, %15, %cst_19 {dimension_numbers = #tpu.dot_dimension_numbers<[1], [0], [0], [1], [0, 0, 1, 1], [], []>} : vector<128x128xbf16>, vector<128x128xbf16>, vector<128x128xf32> -> vector<128x128xf32>
    %17 = arith.addf %9, %16 : vector<128x128xf32>
    %c0_20 = arith.constant 0 : index
    %c2 = arith.constant 2 : index
    %c0_21 = arith.constant 0 : index
    %c0_22 = arith.constant 0 : index
    %18 = vector.load %arg2[%c0_20, %c2, %c0_21, %c0_22] : memref<4x3x128x128xbf16, #tpu.memory_space<vmem>>, vector<1x1x128x128xbf16>
    %19 = vector.shape_cast %18 : vector<1x1x128x128xbf16> to vector<128x128xbf16>
    %cst_23 = arith.constant dense<0.000000e+00> : vector<128x128xf32>
    %20 = tpu.matmul %19, %2, %cst_23 {dimension_numbers = #tpu.dot_dimension_numbers<[1], [0], [0], [1], [0, 0, 1, 1], [], []>} : vector<128x128xbf16>, vector<128x128xbf16>, vector<128x128xf32> -> vector<128x128xf32>
    %21 = arith.truncf %20 : vector<128x128xf32> to vector<128x128xbf16>
    %c0_24 = arith.constant 0 : index
    %c2_25 = arith.constant 2 : index
    %c0_26 = arith.constant 0 : index
    %c0_27 = arith.constant 0 : index
    %22 = vector.load %arg4[%c0_24, %c2_25, %c0_26, %c0_27] : memref<4x3x128x128xbf16, #tpu.memory_space<vmem>>, vector<1x1x128x128xbf16>
    %23 = vector.shape_cast %22 : vector<1x1x128x128xbf16> to vector<128x128xbf16>
    %cst_28 = arith.constant dense<0.000000e+00> : vector<128x128xf32>
    %24 = tpu.matmul %21, %23, %cst_28 {dimension_numbers = #tpu.dot_dimension_numbers<[1], [0], [0], [1], [0, 0, 1, 1], [], []>} : vector<128x128xbf16>, vector<128x128xbf16>, vector<128x128xf32> -> vector<128x128xf32>
    %25 = arith.addf %17, %24 : vector<128x128xf32>
    %c0_29 = arith.constant 0 : index
    %c0_30 = arith.constant 0 : index
    %c0_31 = arith.constant 0 : index
    %26 = vector.load %arg5[%c0_29, %c0_30, %c0_31] : memref<4x1x128xf32, #tpu.memory_space<vmem>>, vector<1x1x128xf32>
    %27 = vector.shape_cast %26 : vector<1x1x128xf32> to vector<1x128xf32>
    %28 = vector.broadcast %27 : vector<1x128xf32> to vector<128x128xf32>
    %29 = arith.addf %25, %28 : vector<128x128xf32>
    %cst_32 = arith.constant 0.000000e+00 : f32
    %30 = vector.broadcast %cst_32 : f32 to vector<128x128xf32>
    %31 = arith.maximumf %29, %30 : vector<128x128xf32>
    %32 = arith.truncf %31 : vector<128x128xf32> to vector<128x128xbf16>
    %c0_33 = arith.constant 0 : index
    %c0_34 = arith.constant 0 : index
    %c0_35 = arith.constant 0 : index
    %c0_36 = arith.constant 0 : index
    %33 = vector.load %arg3[%c0_33, %c0_34, %c0_35, %c0_36] : memref<4x3x128x128xbf16, #tpu.memory_space<vmem>>, vector<1x1x128x128xbf16>
    %34 = vector.shape_cast %33 : vector<1x1x128x128xbf16> to vector<128x128xbf16>
    %cst_37 = arith.constant dense<0.000000e+00> : vector<128x128xf32>
    %35 = tpu.matmul %34, %32, %cst_37 {dimension_numbers = #tpu.dot_dimension_numbers<[1], [0], [0], [1], [0, 0, 1, 1], [], []>} : vector<128x128xbf16>, vector<128x128xbf16>, vector<128x128xf32> -> vector<128x128xf32>
    %36 = arith.truncf %35 : vector<128x128xf32> to vector<128x128xbf16>
    %c0_38 = arith.constant 0 : index
    %c0_39 = arith.constant 0 : index
    %c0_40 = arith.constant 0 : index
    %c0_41 = arith.constant 0 : index
    %37 = vector.load %arg6[%c0_38, %c0_39, %c0_40, %c0_41] : memref<4x3x128x128xbf16, #tpu.memory_space<vmem>>, vector<1x1x128x128xbf16>
    %38 = vector.shape_cast %37 : vector<1x1x128x128xbf16> to vector<128x128xbf16>
    %cst_42 = arith.constant dense<0.000000e+00> : vector<128x128xf32>
    %39 = tpu.matmul %36, %38, %cst_42 {dimension_numbers = #tpu.dot_dimension_numbers<[1], [0], [0], [1], [0, 0, 1, 1], [], []>} : vector<128x128xbf16>, vector<128x128xbf16>, vector<128x128xf32> -> vector<128x128xf32>
    %c0_43 = arith.constant 0 : index
    %c1_44 = arith.constant 1 : index
    %c0_45 = arith.constant 0 : index
    %c0_46 = arith.constant 0 : index
    %40 = vector.load %arg3[%c0_43, %c1_44, %c0_45, %c0_46] : memref<4x3x128x128xbf16, #tpu.memory_space<vmem>>, vector<1x1x128x128xbf16>
    %41 = vector.shape_cast %40 : vector<1x1x128x128xbf16> to vector<128x128xbf16>
    %cst_47 = arith.constant dense<0.000000e+00> : vector<128x128xf32>
    %42 = tpu.matmul %41, %32, %cst_47 {dimension_numbers = #tpu.dot_dimension_numbers<[1], [0], [0], [1], [0, 0, 1, 1], [], []>} : vector<128x128xbf16>, vector<128x128xbf16>, vector<128x128xf32> -> vector<128x128xf32>
    %43 = arith.truncf %42 : vector<128x128xf32> to vector<128x128xbf16>
    %c0_48 = arith.constant 0 : index
    %c1_49 = arith.constant 1 : index
    %c0_50 = arith.constant 0 : index
    %c0_51 = arith.constant 0 : index
    %44 = vector.load %arg6[%c0_48, %c1_49, %c0_50, %c0_51] : memref<4x3x128x128xbf16, #tpu.memory_space<vmem>>, vector<1x1x128x128xbf16>
    %45 = vector.shape_cast %44 : vector<1x1x128x128xbf16> to vector<128x128xbf16>
    %cst_52 = arith.constant dense<0.000000e+00> : vector<128x128xf32>
    %46 = tpu.matmul %43, %45, %cst_52 {dimension_numbers = #tpu.dot_dimension_numbers<[1], [0], [0], [1], [0, 0, 1, 1], [], []>} : vector<128x128xbf16>, vector<128x128xbf16>, vector<128x128xf32> -> vector<128x128xf32>
    %47 = arith.addf %39, %46 : vector<128x128xf32>
    %c0_53 = arith.constant 0 : index
    %c2_54 = arith.constant 2 : index
    %c0_55 = arith.constant 0 : index
    %c0_56 = arith.constant 0 : index
    %48 = vector.load %arg3[%c0_53, %c2_54, %c0_55, %c0_56] : memref<4x3x128x128xbf16, #tpu.memory_space<vmem>>, vector<1x1x128x128xbf16>
    %49 = vector.shape_cast %48 : vector<1x1x128x128xbf16> to vector<128x128xbf16>
    %cst_57 = arith.constant dense<0.000000e+00> : vector<128x128xf32>
    %50 = tpu.matmul %49, %32, %cst_57 {dimension_numbers = #tpu.dot_dimension_numbers<[1], [0], [0], [1], [0, 0, 1, 1], [], []>} : vector<128x128xbf16>, vector<128x128xbf16>, vector<128x128xf32> -> vector<128x128xf32>
    %51 = arith.truncf %50 : vector<128x128xf32> to vector<128x128xbf16>
    %c0_58 = arith.constant 0 : index
    %c2_59 = arith.constant 2 : index
    %c0_60 = arith.constant 0 : index
    %c0_61 = arith.constant 0 : index
    %52 = vector.load %arg6[%c0_58, %c2_59, %c0_60, %c0_61] : memref<4x3x128x128xbf16, #tpu.memory_space<vmem>>, vector<1x1x128x128xbf16>
    %53 = vector.shape_cast %52 : vector<1x1x128x128xbf16> to vector<128x128xbf16>
    %cst_62 = arith.constant dense<0.000000e+00> : vector<128x128xf32>
    %54 = tpu.matmul %51, %53, %cst_62 {dimension_numbers = #tpu.dot_dimension_numbers<[1], [0], [0], [1], [0, 0, 1, 1], [], []>} : vector<128x128xbf16>, vector<128x128xbf16>, vector<128x128xf32> -> vector<128x128xf32>
    %55 = arith.addf %47, %54 : vector<128x128xf32>
    %c0_63 = arith.constant 0 : index
    %c0_64 = arith.constant 0 : index
    %c0_65 = arith.constant 0 : index
    %56 = vector.load %arg7[%c0_63, %c0_64, %c0_65] : memref<4x1x128xf32, #tpu.memory_space<vmem>>, vector<1x1x128xf32>
    %57 = vector.shape_cast %56 : vector<1x1x128xf32> to vector<1x128xf32>
    %58 = vector.broadcast %57 : vector<1x128xf32> to vector<128x128xf32>
    %59 = arith.addf %55, %58 : vector<128x128xf32>
    %c0_66 = arith.constant 0 : index
    %c0_67 = arith.constant 0 : index
    %c0_68 = arith.constant 0 : index
    %60 = vector.load %arg8[%c0_66, %c0_67, %c0_68] : memref<4x128x128xbf16, #tpu.memory_space<vmem>>, vector<1x128x128xbf16>
    %61 = vector.shape_cast %60 : vector<1x128x128xbf16> to vector<128x128xbf16>
    %cst_69 = arith.constant dense<0.000000e+00> : vector<128x128xf32>
    %62 = tpu.matmul %6, %61, %cst_69 {dimension_numbers = #tpu.dot_dimension_numbers<[1], [0], [0], [1], [0, 0, 1, 1], [], []>} : vector<128x128xbf16>, vector<128x128xbf16>, vector<128x128xf32> -> vector<128x128xf32>
    %c0_70 = arith.constant 0 : index
    %c0_71 = arith.constant 0 : index
    %c0_72 = arith.constant 0 : index
    %63 = vector.load %arg9[%c0_70, %c0_71, %c0_72] : memref<4x1x128xf32, #tpu.memory_space<vmem>>, vector<1x1x128xf32>
    %64 = vector.shape_cast %63 : vector<1x1x128xf32> to vector<1x128xf32>
    %65 = vector.broadcast %64 : vector<1x128xf32> to vector<128x128xf32>
    %66 = arith.addf %62, %65 : vector<128x128xf32>
    %67 = arith.addf %59, %66 : vector<128x128xf32>
    %cst_73 = arith.constant 0.000000e+00 : f32
    %68 = vector.broadcast %cst_73 : f32 to vector<128x128xf32>
    %69 = arith.maximumf %67, %68 : vector<128x128xf32>
    %70 = arith.truncf %69 : vector<128x128xf32> to vector<128x128xbf16>
    %c1_74 = arith.constant 1 : index
    %c1_75 = arith.constant 1 : index
    %c0_76 = arith.constant 0 : index
    %c0_77 = arith.constant 0 : index
    %71 = vector.load %arg2[%c1_74, %c1_75, %c0_76, %c0_77] : memref<4x3x128x128xbf16, #tpu.memory_space<vmem>>, vector<1x1x128x128xbf16>
    %72 = vector.shape_cast %71 : vector<1x1x128x128xbf16> to vector<128x128xbf16>
    %cst_78 = arith.constant dense<0.000000e+00> : vector<128x128xf32>
    %73 = tpu.matmul %72, %70, %cst_78 {dimension_numbers = #tpu.dot_dimension_numbers<[1], [0], [0], [1], [0, 0, 1, 1], [], []>} : vector<128x128xbf16>, vector<128x128xbf16>, vector<128x128xf32> -> vector<128x128xf32>
    %74 = arith.truncf %73 : vector<128x128xf32> to vector<128x128xbf16>
    %c1_79 = arith.constant 1 : index
    %c1_80 = arith.constant 1 : index
    %c0_81 = arith.constant 0 : index
    %c0_82 = arith.constant 0 : index
    %75 = vector.load %arg4[%c1_79, %c1_80, %c0_81, %c0_82] : memref<4x3x128x128xbf16, #tpu.memory_space<vmem>>, vector<1x1x128x128xbf16>
    %76 = vector.shape_cast %75 : vector<1x1x128x128xbf16> to vector<128x128xbf16>
    %cst_83 = arith.constant dense<0.000000e+00> : vector<128x128xf32>
    %77 = tpu.matmul %74, %76, %cst_83 {dimension_numbers = #tpu.dot_dimension_numbers<[1], [0], [0], [1], [0, 0, 1, 1], [], []>} : vector<128x128xbf16>, vector<128x128xbf16>, vector<128x128xf32> -> vector<128x128xf32>
    %c1_84 = arith.constant 1 : index
    %c0_85 = arith.constant 0 : index
    %c0_86 = arith.constant 0 : index
    %c0_87 = arith.constant 0 : index
    %78 = vector.load %arg2[%c1_84, %c0_85, %c0_86, %c0_87] : memref<4x3x128x128xbf16, #tpu.memory_space<vmem>>, vector<1x1x128x128xbf16>
    %79 = vector.shape_cast %78 : vector<1x1x128x128xbf16> to vector<128x128xbf16>
    %cst_88 = arith.constant dense<0.000000e+00> : vector<128x128xf32>
    %80 = tpu.matmul %79, %70, %cst_88 {dimension_numbers = #tpu.dot_dimension_numbers<[1], [0], [0], [1], [0, 0, 1, 1], [], []>} : vector<128x128xbf16>, vector<128x128xbf16>, vector<128x128xf32> -> vector<128x128xf32>
    %81 = arith.truncf %80 : vector<128x128xf32> to vector<128x128xbf16>
    %c1_89 = arith.constant 1 : index
    %c0_90 = arith.constant 0 : index
    %c0_91 = arith.constant 0 : index
    %c0_92 = arith.constant 0 : index
    %82 = vector.load %arg4[%c1_89, %c0_90, %c0_91, %c0_92] : memref<4x3x128x128xbf16, #tpu.memory_space<vmem>>, vector<1x1x128x128xbf16>
    %83 = vector.shape_cast %82 : vector<1x1x128x128xbf16> to vector<128x128xbf16>
    %cst_93 = arith.constant dense<0.000000e+00> : vector<128x128xf32>
    %84 = tpu.matmul %81, %83, %cst_93 {dimension_numbers = #tpu.dot_dimension_numbers<[1], [0], [0], [1], [0, 0, 1, 1], [], []>} : vector<128x128xbf16>, vector<128x128xbf16>, vector<128x128xf32> -> vector<128x128xf32>
    %85 = arith.addf %77, %84 : vector<128x128xf32>
    %c1_94 = arith.constant 1 : index
    %c2_95 = arith.constant 2 : index
    %c0_96 = arith.constant 0 : index
    %c0_97 = arith.constant 0 : index
    %86 = vector.load %arg2[%c1_94, %c2_95, %c0_96, %c0_97] : memref<4x3x128x128xbf16, #tpu.memory_space<vmem>>, vector<1x1x128x128xbf16>
    %87 = vector.shape_cast %86 : vector<1x1x128x128xbf16> to vector<128x128xbf16>
    %cst_98 = arith.constant dense<0.000000e+00> : vector<128x128xf32>
    %88 = tpu.matmul %87, %70, %cst_98 {dimension_numbers = #tpu.dot_dimension_numbers<[1], [0], [0], [1], [0, 0, 1, 1], [], []>} : vector<128x128xbf16>, vector<128x128xbf16>, vector<128x128xf32> -> vector<128x128xf32>
    %89 = arith.truncf %88 : vector<128x128xf32> to vector<128x128xbf16>
    %c1_99 = arith.constant 1 : index
    %c2_100 = arith.constant 2 : index
    %c0_101 = arith.constant 0 : index
    %c0_102 = arith.constant 0 : index
    %90 = vector.load %arg4[%c1_99, %c2_100, %c0_101, %c0_102] : memref<4x3x128x128xbf16, #tpu.memory_space<vmem>>, vector<1x1x128x128xbf16>
    %91 = vector.shape_cast %90 : vector<1x1x128x128xbf16> to vector<128x128xbf16>
    %cst_103 = arith.constant dense<0.000000e+00> : vector<128x128xf32>
    %92 = tpu.matmul %89, %91, %cst_103 {dimension_numbers = #tpu.dot_dimension_numbers<[1], [0], [0], [1], [0, 0, 1, 1], [], []>} : vector<128x128xbf16>, vector<128x128xbf16>, vector<128x128xf32> -> vector<128x128xf32>
    %93 = arith.addf %85, %92 : vector<128x128xf32>
    %c1_104 = arith.constant 1 : index
    %c0_105 = arith.constant 0 : index
    %c0_106 = arith.constant 0 : index
    %94 = vector.load %arg5[%c1_104, %c0_105, %c0_106] : memref<4x1x128xf32, #tpu.memory_space<vmem>>, vector<1x1x128xf32>
    %95 = vector.shape_cast %94 : vector<1x1x128xf32> to vector<1x128xf32>
    %96 = vector.broadcast %95 : vector<1x128xf32> to vector<128x128xf32>
    %97 = arith.addf %93, %96 : vector<128x128xf32>
    %cst_107 = arith.constant 0.000000e+00 : f32
    %98 = vector.broadcast %cst_107 : f32 to vector<128x128xf32>
    %99 = arith.maximumf %97, %98 : vector<128x128xf32>
    %100 = arith.truncf %99 : vector<128x128xf32> to vector<128x128xbf16>
    %c1_108 = arith.constant 1 : index
    %c0_109 = arith.constant 0 : index
    %c0_110 = arith.constant 0 : index
    %c0_111 = arith.constant 0 : index
    %101 = vector.load %arg3[%c1_108, %c0_109, %c0_110, %c0_111] : memref<4x3x128x128xbf16, #tpu.memory_space<vmem>>, vector<1x1x128x128xbf16>
    %102 = vector.shape_cast %101 : vector<1x1x128x128xbf16> to vector<128x128xbf16>
    %cst_112 = arith.constant dense<0.000000e+00> : vector<128x128xf32>
    %103 = tpu.matmul %102, %100, %cst_112 {dimension_numbers = #tpu.dot_dimension_numbers<[1], [0], [0], [1], [0, 0, 1, 1], [], []>} : vector<128x128xbf16>, vector<128x128xbf16>, vector<128x128xf32> -> vector<128x128xf32>
    %104 = arith.truncf %103 : vector<128x128xf32> to vector<128x128xbf16>
    %c1_113 = arith.constant 1 : index
    %c0_114 = arith.constant 0 : index
    %c0_115 = arith.constant 0 : index
    %c0_116 = arith.constant 0 : index
    %105 = vector.load %arg6[%c1_113, %c0_114, %c0_115, %c0_116] : memref<4x3x128x128xbf16, #tpu.memory_space<vmem>>, vector<1x1x128x128xbf16>
    %106 = vector.shape_cast %105 : vector<1x1x128x128xbf16> to vector<128x128xbf16>
    %cst_117 = arith.constant dense<0.000000e+00> : vector<128x128xf32>
    %107 = tpu.matmul %104, %106, %cst_117 {dimension_numbers = #tpu.dot_dimension_numbers<[1], [0], [0], [1], [0, 0, 1, 1], [], []>} : vector<128x128xbf16>, vector<128x128xbf16>, vector<128x128xf32> -> vector<128x128xf32>
    %c1_118 = arith.constant 1 : index
    %c1_119 = arith.constant 1 : index
    %c0_120 = arith.constant 0 : index
    %c0_121 = arith.constant 0 : index
    %108 = vector.load %arg3[%c1_118, %c1_119, %c0_120, %c0_121] : memref<4x3x128x128xbf16, #tpu.memory_space<vmem>>, vector<1x1x128x128xbf16>
    %109 = vector.shape_cast %108 : vector<1x1x128x128xbf16> to vector<128x128xbf16>
    %cst_122 = arith.constant dense<0.000000e+00> : vector<128x128xf32>
    %110 = tpu.matmul %109, %100, %cst_122 {dimension_numbers = #tpu.dot_dimension_numbers<[1], [0], [0], [1], [0, 0, 1, 1], [], []>} : vector<128x128xbf16>, vector<128x128xbf16>, vector<128x128xf32> -> vector<128x128xf32>
    %111 = arith.truncf %110 : vector<128x128xf32> to vector<128x128xbf16>
    %c1_123 = arith.constant 1 : index
    %c1_124 = arith.constant 1 : index
    %c0_125 = arith.constant 0 : index
    %c0_126 = arith.constant 0 : index
    %112 = vector.load %arg6[%c1_123, %c1_124, %c0_125, %c0_126] : memref<4x3x128x128xbf16, #tpu.memory_space<vmem>>, vector<1x1x128x128xbf16>
    %113 = vector.shape_cast %112 : vector<1x1x128x128xbf16> to vector<128x128xbf16>
    %cst_127 = arith.constant dense<0.000000e+00> : vector<128x128xf32>
    %114 = tpu.matmul %111, %113, %cst_127 {dimension_numbers = #tpu.dot_dimension_numbers<[1], [0], [0], [1], [0, 0, 1, 1], [], []>} : vector<128x128xbf16>, vector<128x128xbf16>, vector<128x128xf32> -> vector<128x128xf32>
    %115 = arith.addf %107, %114 : vector<128x128xf32>
    %c1_128 = arith.constant 1 : index
    %c2_129 = arith.constant 2 : index
    %c0_130 = arith.constant 0 : index
    %c0_131 = arith.constant 0 : index
    %116 = vector.load %arg3[%c1_128, %c2_129, %c0_130, %c0_131] : memref<4x3x128x128xbf16, #tpu.memory_space<vmem>>, vector<1x1x128x128xbf16>
    %117 = vector.shape_cast %116 : vector<1x1x128x128xbf16> to vector<128x128xbf16>
    %cst_132 = arith.constant dense<0.000000e+00> : vector<128x128xf32>
    %118 = tpu.matmul %117, %100, %cst_132 {dimension_numbers = #tpu.dot_dimension_numbers<[1], [0], [0], [1], [0, 0, 1, 1], [], []>} : vector<128x128xbf16>, vector<128x128xbf16>, vector<128x128xf32> -> vector<128x128xf32>
    %119 = arith.truncf %118 : vector<128x128xf32> to vector<128x128xbf16>
    %c1_133 = arith.constant 1 : index
    %c2_134 = arith.constant 2 : index
    %c0_135 = arith.constant 0 : index
    %c0_136 = arith.constant 0 : index
    %120 = vector.load %arg6[%c1_133, %c2_134, %c0_135, %c0_136] : memref<4x3x128x128xbf16, #tpu.memory_space<vmem>>, vector<1x1x128x128xbf16>
    %121 = vector.shape_cast %120 : vector<1x1x128x128xbf16> to vector<128x128xbf16>
    %cst_137 = arith.constant dense<0.000000e+00> : vector<128x128xf32>
    %122 = tpu.matmul %119, %121, %cst_137 {dimension_numbers = #tpu.dot_dimension_numbers<[1], [0], [0], [1], [0, 0, 1, 1], [], []>} : vector<128x128xbf16>, vector<128x128xbf16>, vector<128x128xf32> -> vector<128x128xf32>
    %123 = arith.addf %115, %122 : vector<128x128xf32>
    %c1_138 = arith.constant 1 : index
    %c0_139 = arith.constant 0 : index
    %c0_140 = arith.constant 0 : index
    %124 = vector.load %arg7[%c1_138, %c0_139, %c0_140] : memref<4x1x128xf32, #tpu.memory_space<vmem>>, vector<1x1x128xf32>
    %125 = vector.shape_cast %124 : vector<1x1x128xf32> to vector<1x128xf32>
    %126 = vector.broadcast %125 : vector<1x128xf32> to vector<128x128xf32>
    %127 = arith.addf %123, %126 : vector<128x128xf32>
    %c1_141 = arith.constant 1 : index
    %c0_142 = arith.constant 0 : index
    %c0_143 = arith.constant 0 : index
    %128 = vector.load %arg8[%c1_141, %c0_142, %c0_143] : memref<4x128x128xbf16, #tpu.memory_space<vmem>>, vector<1x128x128xbf16>
    %129 = vector.shape_cast %128 : vector<1x128x128xbf16> to vector<128x128xbf16>
    %cst_144 = arith.constant dense<0.000000e+00> : vector<128x128xf32>
    %130 = tpu.matmul %74, %129, %cst_144 {dimension_numbers = #tpu.dot_dimension_numbers<[1], [0], [0], [1], [0, 0, 1, 1], [], []>} : vector<128x128xbf16>, vector<128x128xbf16>, vector<128x128xf32> -> vector<128x128xf32>
    %c1_145 = arith.constant 1 : index
    %c0_146 = arith.constant 0 : index
    %c0_147 = arith.constant 0 : index
    %131 = vector.load %arg9[%c1_145, %c0_146, %c0_147] : memref<4x1x128xf32, #tpu.memory_space<vmem>>, vector<1x1x128xf32>
    %132 = vector.shape_cast %131 : vector<1x1x128xf32> to vector<1x128xf32>
    %133 = vector.broadcast %132 : vector<1x128xf32> to vector<128x128xf32>
    %134 = arith.addf %130, %133 : vector<128x128xf32>
    %135 = arith.addf %127, %134 : vector<128x128xf32>
    %cst_148 = arith.constant 0.000000e+00 : f32
    %136 = vector.broadcast %cst_148 : f32 to vector<128x128xf32>
    %137 = arith.maximumf %135, %136 : vector<128x128xf32>
    %138 = arith.truncf %137 : vector<128x128xf32> to vector<128x128xbf16>
    %c2_149 = arith.constant 2 : index
    %c1_150 = arith.constant 1 : index
    %c0_151 = arith.constant 0 : index
    %c0_152 = arith.constant 0 : index
    %139 = vector.load %arg2[%c2_149, %c1_150, %c0_151, %c0_152] : memref<4x3x128x128xbf16, #tpu.memory_space<vmem>>, vector<1x1x128x128xbf16>
    %140 = vector.shape_cast %139 : vector<1x1x128x128xbf16> to vector<128x128xbf16>
    %cst_153 = arith.constant dense<0.000000e+00> : vector<128x128xf32>
    %141 = tpu.matmul %140, %138, %cst_153 {dimension_numbers = #tpu.dot_dimension_numbers<[1], [0], [0], [1], [0, 0, 1, 1], [], []>} : vector<128x128xbf16>, vector<128x128xbf16>, vector<128x128xf32> -> vector<128x128xf32>
    %142 = arith.truncf %141 : vector<128x128xf32> to vector<128x128xbf16>
    %c2_154 = arith.constant 2 : index
    %c1_155 = arith.constant 1 : index
    %c0_156 = arith.constant 0 : index
    %c0_157 = arith.constant 0 : index
    %143 = vector.load %arg4[%c2_154, %c1_155, %c0_156, %c0_157] : memref<4x3x128x128xbf16, #tpu.memory_space<vmem>>, vector<1x1x128x128xbf16>
    %144 = vector.shape_cast %143 : vector<1x1x128x128xbf16> to vector<128x128xbf16>
    %cst_158 = arith.constant dense<0.000000e+00> : vector<128x128xf32>
    %145 = tpu.matmul %142, %144, %cst_158 {dimension_numbers = #tpu.dot_dimension_numbers<[1], [0], [0], [1], [0, 0, 1, 1], [], []>} : vector<128x128xbf16>, vector<128x128xbf16>, vector<128x128xf32> -> vector<128x128xf32>
    %c2_159 = arith.constant 2 : index
    %c0_160 = arith.constant 0 : index
    %c0_161 = arith.constant 0 : index
    %c0_162 = arith.constant 0 : index
    %146 = vector.load %arg2[%c2_159, %c0_160, %c0_161, %c0_162] : memref<4x3x128x128xbf16, #tpu.memory_space<vmem>>, vector<1x1x128x128xbf16>
    %147 = vector.shape_cast %146 : vector<1x1x128x128xbf16> to vector<128x128xbf16>
    %cst_163 = arith.constant dense<0.000000e+00> : vector<128x128xf32>
    %148 = tpu.matmul %147, %138, %cst_163 {dimension_numbers = #tpu.dot_dimension_numbers<[1], [0], [0], [1], [0, 0, 1, 1], [], []>} : vector<128x128xbf16>, vector<128x128xbf16>, vector<128x128xf32> -> vector<128x128xf32>
    %149 = arith.truncf %148 : vector<128x128xf32> to vector<128x128xbf16>
    %c2_164 = arith.constant 2 : index
    %c0_165 = arith.constant 0 : index
    %c0_166 = arith.constant 0 : index
    %c0_167 = arith.constant 0 : index
    %150 = vector.load %arg4[%c2_164, %c0_165, %c0_166, %c0_167] : memref<4x3x128x128xbf16, #tpu.memory_space<vmem>>, vector<1x1x128x128xbf16>
    %151 = vector.shape_cast %150 : vector<1x1x128x128xbf16> to vector<128x128xbf16>
    %cst_168 = arith.constant dense<0.000000e+00> : vector<128x128xf32>
    %152 = tpu.matmul %149, %151, %cst_168 {dimension_numbers = #tpu.dot_dimension_numbers<[1], [0], [0], [1], [0, 0, 1, 1], [], []>} : vector<128x128xbf16>, vector<128x128xbf16>, vector<128x128xf32> -> vector<128x128xf32>
    %153 = arith.addf %145, %152 : vector<128x128xf32>
    %c2_169 = arith.constant 2 : index
    %c2_170 = arith.constant 2 : index
    %c0_171 = arith.constant 0 : index
    %c0_172 = arith.constant 0 : index
    %154 = vector.load %arg2[%c2_169, %c2_170, %c0_171, %c0_172] : memref<4x3x128x128xbf16, #tpu.memory_space<vmem>>, vector<1x1x128x128xbf16>
    %155 = vector.shape_cast %154 : vector<1x1x128x128xbf16> to vector<128x128xbf16>
    %cst_173 = arith.constant dense<0.000000e+00> : vector<128x128xf32>
    %156 = tpu.matmul %155, %138, %cst_173 {dimension_numbers = #tpu.dot_dimension_numbers<[1], [0], [0], [1], [0, 0, 1, 1], [], []>} : vector<128x128xbf16>, vector<128x128xbf16>, vector<128x128xf32> -> vector<128x128xf32>
    %157 = arith.truncf %156 : vector<128x128xf32> to vector<128x128xbf16>
    %c2_174 = arith.constant 2 : index
    %c2_175 = arith.constant 2 : index
    %c0_176 = arith.constant 0 : index
    %c0_177 = arith.constant 0 : index
    %158 = vector.load %arg4[%c2_174, %c2_175, %c0_176, %c0_177] : memref<4x3x128x128xbf16, #tpu.memory_space<vmem>>, vector<1x1x128x128xbf16>
    %159 = vector.shape_cast %158 : vector<1x1x128x128xbf16> to vector<128x128xbf16>
    %cst_178 = arith.constant dense<0.000000e+00> : vector<128x128xf32>
    %160 = tpu.matmul %157, %159, %cst_178 {dimension_numbers = #tpu.dot_dimension_numbers<[1], [0], [0], [1], [0, 0, 1, 1], [], []>} : vector<128x128xbf16>, vector<128x128xbf16>, vector<128x128xf32> -> vector<128x128xf32>
    %161 = arith.addf %153, %160 : vector<128x128xf32>
    %c2_179 = arith.constant 2 : index
    %c0_180 = arith.constant 0 : index
    %c0_181 = arith.constant 0 : index
    %162 = vector.load %arg5[%c2_179, %c0_180, %c0_181] : memref<4x1x128xf32, #tpu.memory_space<vmem>>, vector<1x1x128xf32>
    %163 = vector.shape_cast %162 : vector<1x1x128xf32> to vector<1x128xf32>
    %164 = vector.broadcast %163 : vector<1x128xf32> to vector<128x128xf32>
    %165 = arith.addf %161, %164 : vector<128x128xf32>
    %cst_182 = arith.constant 0.000000e+00 : f32
    %166 = vector.broadcast %cst_182 : f32 to vector<128x128xf32>
    %167 = arith.maximumf %165, %166 : vector<128x128xf32>
    %168 = arith.truncf %167 : vector<128x128xf32> to vector<128x128xbf16>
    %c2_183 = arith.constant 2 : index
    %c0_184 = arith.constant 0 : index
    %c0_185 = arith.constant 0 : index
    %c0_186 = arith.constant 0 : index
    %169 = vector.load %arg3[%c2_183, %c0_184, %c0_185, %c0_186] : memref<4x3x128x128xbf16, #tpu.memory_space<vmem>>, vector<1x1x128x128xbf16>
    %170 = vector.shape_cast %169 : vector<1x1x128x128xbf16> to vector<128x128xbf16>
    %cst_187 = arith.constant dense<0.000000e+00> : vector<128x128xf32>
    %171 = tpu.matmul %170, %168, %cst_187 {dimension_numbers = #tpu.dot_dimension_numbers<[1], [0], [0], [1], [0, 0, 1, 1], [], []>} : vector<128x128xbf16>, vector<128x128xbf16>, vector<128x128xf32> -> vector<128x128xf32>
    %172 = arith.truncf %171 : vector<128x128xf32> to vector<128x128xbf16>
    %c2_188 = arith.constant 2 : index
    %c0_189 = arith.constant 0 : index
    %c0_190 = arith.constant 0 : index
    %c0_191 = arith.constant 0 : index
    %173 = vector.load %arg6[%c2_188, %c0_189, %c0_190, %c0_191] : memref<4x3x128x128xbf16, #tpu.memory_space<vmem>>, vector<1x1x128x128xbf16>
    %174 = vector.shape_cast %173 : vector<1x1x128x128xbf16> to vector<128x128xbf16>
    %cst_192 = arith.constant dense<0.000000e+00> : vector<128x128xf32>
    %175 = tpu.matmul %172, %174, %cst_192 {dimension_numbers = #tpu.dot_dimension_numbers<[1], [0], [0], [1], [0, 0, 1, 1], [], []>} : vector<128x128xbf16>, vector<128x128xbf16>, vector<128x128xf32> -> vector<128x128xf32>
    %c2_193 = arith.constant 2 : index
    %c1_194 = arith.constant 1 : index
    %c0_195 = arith.constant 0 : index
    %c0_196 = arith.constant 0 : index
    %176 = vector.load %arg3[%c2_193, %c1_194, %c0_195, %c0_196] : memref<4x3x128x128xbf16, #tpu.memory_space<vmem>>, vector<1x1x128x128xbf16>
    %177 = vector.shape_cast %176 : vector<1x1x128x128xbf16> to vector<128x128xbf16>
    %cst_197 = arith.constant dense<0.000000e+00> : vector<128x128xf32>
    %178 = tpu.matmul %177, %168, %cst_197 {dimension_numbers = #tpu.dot_dimension_numbers<[1], [0], [0], [1], [0, 0, 1, 1], [], []>} : vector<128x128xbf16>, vector<128x128xbf16>, vector<128x128xf32> -> vector<128x128xf32>
    %179 = arith.truncf %178 : vector<128x128xf32> to vector<128x128xbf16>
    %c2_198 = arith.constant 2 : index
    %c1_199 = arith.constant 1 : index
    %c0_200 = arith.constant 0 : index
    %c0_201 = arith.constant 0 : index
    %180 = vector.load %arg6[%c2_198, %c1_199, %c0_200, %c0_201] : memref<4x3x128x128xbf16, #tpu.memory_space<vmem>>, vector<1x1x128x128xbf16>
    %181 = vector.shape_cast %180 : vector<1x1x128x128xbf16> to vector<128x128xbf16>
    %cst_202 = arith.constant dense<0.000000e+00> : vector<128x128xf32>
    %182 = tpu.matmul %179, %181, %cst_202 {dimension_numbers = #tpu.dot_dimension_numbers<[1], [0], [0], [1], [0, 0, 1, 1], [], []>} : vector<128x128xbf16>, vector<128x128xbf16>, vector<128x128xf32> -> vector<128x128xf32>
    %183 = arith.addf %175, %182 : vector<128x128xf32>
    %c2_203 = arith.constant 2 : index
    %c2_204 = arith.constant 2 : index
    %c0_205 = arith.constant 0 : index
    %c0_206 = arith.constant 0 : index
    %184 = vector.load %arg3[%c2_203, %c2_204, %c0_205, %c0_206] : memref<4x3x128x128xbf16, #tpu.memory_space<vmem>>, vector<1x1x128x128xbf16>
    %185 = vector.shape_cast %184 : vector<1x1x128x128xbf16> to vector<128x128xbf16>
    %cst_207 = arith.constant dense<0.000000e+00> : vector<128x128xf32>
    %186 = tpu.matmul %185, %168, %cst_207 {dimension_numbers = #tpu.dot_dimension_numbers<[1], [0], [0], [1], [0, 0, 1, 1], [], []>} : vector<128x128xbf16>, vector<128x128xbf16>, vector<128x128xf32> -> vector<128x128xf32>
    %187 = arith.truncf %186 : vector<128x128xf32> to vector<128x128xbf16>
    %c2_208 = arith.constant 2 : index
    %c2_209 = arith.constant 2 : index
    %c0_210 = arith.constant 0 : index
    %c0_211 = arith.constant 0 : index
    %188 = vector.load %arg6[%c2_208, %c2_209, %c0_210, %c0_211] : memref<4x3x128x128xbf16, #tpu.memory_space<vmem>>, vector<1x1x128x128xbf16>
    %189 = vector.shape_cast %188 : vector<1x1x128x128xbf16> to vector<128x128xbf16>
    %cst_212 = arith.constant dense<0.000000e+00> : vector<128x128xf32>
    %190 = tpu.matmul %187, %189, %cst_212 {dimension_numbers = #tpu.dot_dimension_numbers<[1], [0], [0], [1], [0, 0, 1, 1], [], []>} : vector<128x128xbf16>, vector<128x128xbf16>, vector<128x128xf32> -> vector<128x128xf32>
    %191 = arith.addf %183, %190 : vector<128x128xf32>
    %c2_213 = arith.constant 2 : index
    %c0_214 = arith.constant 0 : index
    %c0_215 = arith.constant 0 : index
    %192 = vector.load %arg7[%c2_213, %c0_214, %c0_215] : memref<4x1x128xf32, #tpu.memory_space<vmem>>, vector<1x1x128xf32>
    %193 = vector.shape_cast %192 : vector<1x1x128xf32> to vector<1x128xf32>
    %194 = vector.broadcast %193 : vector<1x128xf32> to vector<128x128xf32>
    %195 = arith.addf %191, %194 : vector<128x128xf32>
    %c2_216 = arith.constant 2 : index
    %c0_217 = arith.constant 0 : index
    %c0_218 = arith.constant 0 : index
    %196 = vector.load %arg8[%c2_216, %c0_217, %c0_218] : memref<4x128x128xbf16, #tpu.memory_space<vmem>>, vector<1x128x128xbf16>
    %197 = vector.shape_cast %196 : vector<1x128x128xbf16> to vector<128x128xbf16>
    %cst_219 = arith.constant dense<0.000000e+00> : vector<128x128xf32>
    %198 = tpu.matmul %142, %197, %cst_219 {dimension_numbers = #tpu.dot_dimension_numbers<[1], [0], [0], [1], [0, 0, 1, 1], [], []>} : vector<128x128xbf16>, vector<128x128xbf16>, vector<128x128xf32> -> vector<128x128xf32>
    %c2_220 = arith.constant 2 : index
    %c0_221 = arith.constant 0 : index
    %c0_222 = arith.constant 0 : index
    %199 = vector.load %arg9[%c2_220, %c0_221, %c0_222] : memref<4x1x128xf32, #tpu.memory_space<vmem>>, vector<1x1x128xf32>
    %200 = vector.shape_cast %199 : vector<1x1x128xf32> to vector<1x128xf32>
    %201 = vector.broadcast %200 : vector<1x128xf32> to vector<128x128xf32>
    %202 = arith.addf %198, %201 : vector<128x128xf32>
    %203 = arith.addf %195, %202 : vector<128x128xf32>
    %cst_223 = arith.constant 0.000000e+00 : f32
    %204 = vector.broadcast %cst_223 : f32 to vector<128x128xf32>
    %205 = arith.maximumf %203, %204 : vector<128x128xf32>
    %206 = arith.truncf %205 : vector<128x128xf32> to vector<128x128xbf16>
    %c3 = arith.constant 3 : index
    %c1_224 = arith.constant 1 : index
    %c0_225 = arith.constant 0 : index
    %c0_226 = arith.constant 0 : index
    %207 = vector.load %arg2[%c3, %c1_224, %c0_225, %c0_226] : memref<4x3x128x128xbf16, #tpu.memory_space<vmem>>, vector<1x1x128x128xbf16>
    %208 = vector.shape_cast %207 : vector<1x1x128x128xbf16> to vector<128x128xbf16>
    %cst_227 = arith.constant dense<0.000000e+00> : vector<128x128xf32>
    %209 = tpu.matmul %208, %206, %cst_227 {dimension_numbers = #tpu.dot_dimension_numbers<[1], [0], [0], [1], [0, 0, 1, 1], [], []>} : vector<128x128xbf16>, vector<128x128xbf16>, vector<128x128xf32> -> vector<128x128xf32>
    %210 = arith.truncf %209 : vector<128x128xf32> to vector<128x128xbf16>
    %c3_228 = arith.constant 3 : index
    %c1_229 = arith.constant 1 : index
    %c0_230 = arith.constant 0 : index
    %c0_231 = arith.constant 0 : index
    %211 = vector.load %arg4[%c3_228, %c1_229, %c0_230, %c0_231] : memref<4x3x128x128xbf16, #tpu.memory_space<vmem>>, vector<1x1x128x128xbf16>
    %212 = vector.shape_cast %211 : vector<1x1x128x128xbf16> to vector<128x128xbf16>
    %cst_232 = arith.constant dense<0.000000e+00> : vector<128x128xf32>
    %213 = tpu.matmul %210, %212, %cst_232 {dimension_numbers = #tpu.dot_dimension_numbers<[1], [0], [0], [1], [0, 0, 1, 1], [], []>} : vector<128x128xbf16>, vector<128x128xbf16>, vector<128x128xf32> -> vector<128x128xf32>
    %c3_233 = arith.constant 3 : index
    %c0_234 = arith.constant 0 : index
    %c0_235 = arith.constant 0 : index
    %c0_236 = arith.constant 0 : index
    %214 = vector.load %arg2[%c3_233, %c0_234, %c0_235, %c0_236] : memref<4x3x128x128xbf16, #tpu.memory_space<vmem>>, vector<1x1x128x128xbf16>
    %215 = vector.shape_cast %214 : vector<1x1x128x128xbf16> to vector<128x128xbf16>
    %cst_237 = arith.constant dense<0.000000e+00> : vector<128x128xf32>
    %216 = tpu.matmul %215, %206, %cst_237 {dimension_numbers = #tpu.dot_dimension_numbers<[1], [0], [0], [1], [0, 0, 1, 1], [], []>} : vector<128x128xbf16>, vector<128x128xbf16>, vector<128x128xf32> -> vector<128x128xf32>
    %217 = arith.truncf %216 : vector<128x128xf32> to vector<128x128xbf16>
    %c3_238 = arith.constant 3 : index
    %c0_239 = arith.constant 0 : index
    %c0_240 = arith.constant 0 : index
    %c0_241 = arith.constant 0 : index
    %218 = vector.load %arg4[%c3_238, %c0_239, %c0_240, %c0_241] : memref<4x3x128x128xbf16, #tpu.memory_space<vmem>>, vector<1x1x128x128xbf16>
    %219 = vector.shape_cast %218 : vector<1x1x128x128xbf16> to vector<128x128xbf16>
    %cst_242 = arith.constant dense<0.000000e+00> : vector<128x128xf32>
    %220 = tpu.matmul %217, %219, %cst_242 {dimension_numbers = #tpu.dot_dimension_numbers<[1], [0], [0], [1], [0, 0, 1, 1], [], []>} : vector<128x128xbf16>, vector<128x128xbf16>, vector<128x128xf32> -> vector<128x128xf32>
    %221 = arith.addf %213, %220 : vector<128x128xf32>
    %c3_243 = arith.constant 3 : index
    %c2_244 = arith.constant 2 : index
    %c0_245 = arith.constant 0 : index
    %c0_246 = arith.constant 0 : index
    %222 = vector.load %arg2[%c3_243, %c2_244, %c0_245, %c0_246] : memref<4x3x128x128xbf16, #tpu.memory_space<vmem>>, vector<1x1x128x128xbf16>
    %223 = vector.shape_cast %222 : vector<1x1x128x128xbf16> to vector<128x128xbf16>
    %cst_247 = arith.constant dense<0.000000e+00> : vector<128x128xf32>
    %224 = tpu.matmul %223, %206, %cst_247 {dimension_numbers = #tpu.dot_dimension_numbers<[1], [0], [0], [1], [0, 0, 1, 1], [], []>} : vector<128x128xbf16>, vector<128x128xbf16>, vector<128x128xf32> -> vector<128x128xf32>
    %225 = arith.truncf %224 : vector<128x128xf32> to vector<128x128xbf16>
    %c3_248 = arith.constant 3 : index
    %c2_249 = arith.constant 2 : index
    %c0_250 = arith.constant 0 : index
    %c0_251 = arith.constant 0 : index
    %226 = vector.load %arg4[%c3_248, %c2_249, %c0_250, %c0_251] : memref<4x3x128x128xbf16, #tpu.memory_space<vmem>>, vector<1x1x128x128xbf16>
    %227 = vector.shape_cast %226 : vector<1x1x128x128xbf16> to vector<128x128xbf16>
    %cst_252 = arith.constant dense<0.000000e+00> : vector<128x128xf32>
    %228 = tpu.matmul %225, %227, %cst_252 {dimension_numbers = #tpu.dot_dimension_numbers<[1], [0], [0], [1], [0, 0, 1, 1], [], []>} : vector<128x128xbf16>, vector<128x128xbf16>, vector<128x128xf32> -> vector<128x128xf32>
    %229 = arith.addf %221, %228 : vector<128x128xf32>
    %c3_253 = arith.constant 3 : index
    %c0_254 = arith.constant 0 : index
    %c0_255 = arith.constant 0 : index
    %230 = vector.load %arg5[%c3_253, %c0_254, %c0_255] : memref<4x1x128xf32, #tpu.memory_space<vmem>>, vector<1x1x128xf32>
    %231 = vector.shape_cast %230 : vector<1x1x128xf32> to vector<1x128xf32>
    %232 = vector.broadcast %231 : vector<1x128xf32> to vector<128x128xf32>
    %233 = arith.addf %229, %232 : vector<128x128xf32>
    %cst_256 = arith.constant 0.000000e+00 : f32
    %234 = vector.broadcast %cst_256 : f32 to vector<128x128xf32>
    %235 = arith.maximumf %233, %234 : vector<128x128xf32>
    %236 = arith.truncf %235 : vector<128x128xf32> to vector<128x128xbf16>
    %c3_257 = arith.constant 3 : index
    %c0_258 = arith.constant 0 : index
    %c0_259 = arith.constant 0 : index
    %c0_260 = arith.constant 0 : index
    %237 = vector.load %arg3[%c3_257, %c0_258, %c0_259, %c0_260] : memref<4x3x128x128xbf16, #tpu.memory_space<vmem>>, vector<1x1x128x128xbf16>
    %238 = vector.shape_cast %237 : vector<1x1x128x128xbf16> to vector<128x128xbf16>
    %cst_261 = arith.constant dense<0.000000e+00> : vector<128x128xf32>
    %239 = tpu.matmul %238, %236, %cst_261 {dimension_numbers = #tpu.dot_dimension_numbers<[1], [0], [0], [1], [0, 0, 1, 1], [], []>} : vector<128x128xbf16>, vector<128x128xbf16>, vector<128x128xf32> -> vector<128x128xf32>
    %240 = arith.truncf %239 : vector<128x128xf32> to vector<128x128xbf16>
    %c3_262 = arith.constant 3 : index
    %c0_263 = arith.constant 0 : index
    %c0_264 = arith.constant 0 : index
    %c0_265 = arith.constant 0 : index
    %241 = vector.load %arg6[%c3_262, %c0_263, %c0_264, %c0_265] : memref<4x3x128x128xbf16, #tpu.memory_space<vmem>>, vector<1x1x128x128xbf16>
    %242 = vector.shape_cast %241 : vector<1x1x128x128xbf16> to vector<128x128xbf16>
    %cst_266 = arith.constant dense<0.000000e+00> : vector<128x128xf32>
    %243 = tpu.matmul %240, %242, %cst_266 {dimension_numbers = #tpu.dot_dimension_numbers<[1], [0], [0], [1], [0, 0, 1, 1], [], []>} : vector<128x128xbf16>, vector<128x128xbf16>, vector<128x128xf32> -> vector<128x128xf32>
    %c3_267 = arith.constant 3 : index
    %c1_268 = arith.constant 1 : index
    %c0_269 = arith.constant 0 : index
    %c0_270 = arith.constant 0 : index
    %244 = vector.load %arg3[%c3_267, %c1_268, %c0_269, %c0_270] : memref<4x3x128x128xbf16, #tpu.memory_space<vmem>>, vector<1x1x128x128xbf16>
    %245 = vector.shape_cast %244 : vector<1x1x128x128xbf16> to vector<128x128xbf16>
    %cst_271 = arith.constant dense<0.000000e+00> : vector<128x128xf32>
    %246 = tpu.matmul %245, %236, %cst_271 {dimension_numbers = #tpu.dot_dimension_numbers<[1], [0], [0], [1], [0, 0, 1, 1], [], []>} : vector<128x128xbf16>, vector<128x128xbf16>, vector<128x128xf32> -> vector<128x128xf32>
    %247 = arith.truncf %246 : vector<128x128xf32> to vector<128x128xbf16>
    %c3_272 = arith.constant 3 : index
    %c1_273 = arith.constant 1 : index
    %c0_274 = arith.constant 0 : index
    %c0_275 = arith.constant 0 : index
    %248 = vector.load %arg6[%c3_272, %c1_273, %c0_274, %c0_275] : memref<4x3x128x128xbf16, #tpu.memory_space<vmem>>, vector<1x1x128x128xbf16>
    %249 = vector.shape_cast %248 : vector<1x1x128x128xbf16> to vector<128x128xbf16>
    %cst_276 = arith.constant dense<0.000000e+00> : vector<128x128xf32>
    %250 = tpu.matmul %247, %249, %cst_276 {dimension_numbers = #tpu.dot_dimension_numbers<[1], [0], [0], [1], [0, 0, 1, 1], [], []>} : vector<128x128xbf16>, vector<128x128xbf16>, vector<128x128xf32> -> vector<128x128xf32>
    %251 = arith.addf %243, %250 : vector<128x128xf32>
    %c3_277 = arith.constant 3 : index
    %c2_278 = arith.constant 2 : index
    %c0_279 = arith.constant 0 : index
    %c0_280 = arith.constant 0 : index
    %252 = vector.load %arg3[%c3_277, %c2_278, %c0_279, %c0_280] : memref<4x3x128x128xbf16, #tpu.memory_space<vmem>>, vector<1x1x128x128xbf16>
    %253 = vector.shape_cast %252 : vector<1x1x128x128xbf16> to vector<128x128xbf16>
    %cst_281 = arith.constant dense<0.000000e+00> : vector<128x128xf32>
    %254 = tpu.matmul %253, %236, %cst_281 {dimension_numbers = #tpu.dot_dimension_numbers<[1], [0], [0], [1], [0, 0, 1, 1], [], []>} : vector<128x128xbf16>, vector<128x128xbf16>, vector<128x128xf32> -> vector<128x128xf32>
    %255 = arith.truncf %254 : vector<128x128xf32> to vector<128x128xbf16>
    %c3_282 = arith.constant 3 : index
    %c2_283 = arith.constant 2 : index
    %c0_284 = arith.constant 0 : index
    %c0_285 = arith.constant 0 : index
    %256 = vector.load %arg6[%c3_282, %c2_283, %c0_284, %c0_285] : memref<4x3x128x128xbf16, #tpu.memory_space<vmem>>, vector<1x1x128x128xbf16>
    %257 = vector.shape_cast %256 : vector<1x1x128x128xbf16> to vector<128x128xbf16>
    %cst_286 = arith.constant dense<0.000000e+00> : vector<128x128xf32>
    %258 = tpu.matmul %255, %257, %cst_286 {dimension_numbers = #tpu.dot_dimension_numbers<[1], [0], [0], [1], [0, 0, 1, 1], [], []>} : vector<128x128xbf16>, vector<128x128xbf16>, vector<128x128xf32> -> vector<128x128xf32>
    %259 = arith.addf %251, %258 : vector<128x128xf32>
    %c3_287 = arith.constant 3 : index
    %c0_288 = arith.constant 0 : index
    %c0_289 = arith.constant 0 : index
    %260 = vector.load %arg7[%c3_287, %c0_288, %c0_289] : memref<4x1x128xf32, #tpu.memory_space<vmem>>, vector<1x1x128xf32>
    %261 = vector.shape_cast %260 : vector<1x1x128xf32> to vector<1x128xf32>
    %262 = vector.broadcast %261 : vector<1x128xf32> to vector<128x128xf32>
    %263 = arith.addf %259, %262 : vector<128x128xf32>
    %c3_290 = arith.constant 3 : index
    %c0_291 = arith.constant 0 : index
    %c0_292 = arith.constant 0 : index
    %264 = vector.load %arg8[%c3_290, %c0_291, %c0_292] : memref<4x128x128xbf16, #tpu.memory_space<vmem>>, vector<1x128x128xbf16>
    %265 = vector.shape_cast %264 : vector<1x128x128xbf16> to vector<128x128xbf16>
    %cst_293 = arith.constant dense<0.000000e+00> : vector<128x128xf32>
    %266 = tpu.matmul %210, %265, %cst_293 {dimension_numbers = #tpu.dot_dimension_numbers<[1], [0], [0], [1], [0, 0, 1, 1], [], []>} : vector<128x128xbf16>, vector<128x128xbf16>, vector<128x128xf32> -> vector<128x128xf32>
    %c3_294 = arith.constant 3 : index
    %c0_295 = arith.constant 0 : index
    %c0_296 = arith.constant 0 : index
    %267 = vector.load %arg9[%c3_294, %c0_295, %c0_296] : memref<4x1x128xf32, #tpu.memory_space<vmem>>, vector<1x1x128xf32>
    %268 = vector.shape_cast %267 : vector<1x1x128xf32> to vector<1x128xf32>
    %269 = vector.broadcast %268 : vector<1x128xf32> to vector<128x128xf32>
    %270 = arith.addf %266, %269 : vector<128x128xf32>
    %271 = arith.addf %263, %270 : vector<128x128xf32>
    %cst_297 = arith.constant 0.000000e+00 : f32
    %272 = vector.broadcast %cst_297 : f32 to vector<128x128xf32>
    %273 = arith.maximumf %271, %272 : vector<128x128xf32>
    %c0_298 = arith.constant 0 : index
    %c0_299 = arith.constant 0 : index
    %274 = vector.load %arg10[%c0_298, %c0_299] : memref<8x128xf32, #tpu.memory_space<vmem>>, vector<8x128xf32>
    %cst_300 = arith.constant dense<0.000000e+00> : vector<8x128xf32>
    %275 = tpu.matmul %274, %273, %cst_300 {dimension_numbers = #tpu.dot_dimension_numbers<[1], [0], [0], [1], [0, 0, 1, 1], [], []>} : vector<8x128xf32>, vector<128x128xf32>, vector<8x128xf32> -> vector<8x128xf32>
    %c0_301 = arith.constant 0 : index
    %c0_302 = arith.constant 0 : index
    %276 = vector.load %arg11[%c0_301, %c0_302] : memref<128x128xf32, #tpu.memory_space<vmem>>, vector<128x128xf32>
    %cst_303 = arith.constant dense<0.000000e+00> : vector<8x128xf32>
    %277 = tpu.matmul %275, %276, %cst_303 {dimension_numbers = #tpu.dot_dimension_numbers<[1], [0], [0], [1], [0, 0, 1, 1], [], []>} : vector<8x128xf32>, vector<128x128xf32>, vector<8x128xf32> -> vector<8x128xf32>
    %c0_304 = arith.constant 0 : index
    %c0_305 = arith.constant 0 : index
    %278 = vector.load %arg12[%c0_304, %c0_305] : memref<1x128xf32, #tpu.memory_space<vmem>>, vector<1x128xf32>
    %279 = vector.broadcast %278 : vector<1x128xf32> to vector<8x128xf32>
    %280 = arith.addf %277, %279 : vector<8x128xf32>
    %c0_306 = arith.constant 0 : index
    %c0_307 = arith.constant 0 : index
    %c0_308 = arith.constant 0 : index
    %281 = vector.load %arg13[%c0_306, %c0_307, %c0_308] : memref<1x8x128xf32, #tpu.memory_space<vmem>>, vector<1x8x128xf32>
    %282 = vector.shape_cast %281 : vector<1x8x128xf32> to vector<8x128xf32>
    %283 = vector.shape_cast %280 : vector<8x128xf32> to vector<1x8x128xf32>
    tpu.vector_store %arg13[%c0_306, %c0_307, %c0_308], %283 {strides = array<i32>} : memref<1x8x128xf32, #tpu.memory_space<vmem>>, vector<1x8x128xf32>,
    return
  }
  func.func @transform_0(%arg0: i32) -> (i32, i32, i32) {
    %c0_i32 = arith.constant 0 : i32
    %c0_i32_0 = arith.constant 0 : i32
    %c0_i32_1 = arith.constant 0 : i32
    return %arg0, %c0_i32, %c0_i32_0 : i32, i32, i32
  }
  func.func @transform_1(%arg0: i32) -> (i32, i32, i32, i32) {
    %c0_i32 = arith.constant 0 : i32
    %c0_i32_0 = arith.constant 0 : i32
    %c0_i32_1 = arith.constant 0 : i32
    %c0_i32_2 = arith.constant 0 : i32
    %c0_i32_3 = arith.constant 0 : i32
    return %c0_i32, %c0_i32_0, %c0_i32_1, %c0_i32_2 : i32, i32, i32, i32
  }
  func.func @transform_2(%arg0: i32) -> (i32, i32, i32, i32) {
    %c0_i32 = arith.constant 0 : i32
    %c0_i32_0 = arith.constant 0 : i32
    %c0_i32_1 = arith.constant 0 : i32
    %c0_i32_2 = arith.constant 0 : i32
    %c0_i32_3 = arith.constant 0 : i32
    return %c0_i32, %c0_i32_0, %c0_i32_1, %c0_i32_2 : i32, i32, i32, i32
  }
  func.func @transform_3(%arg0: i32) -> (i32, i32, i32, i32) {
    %c0_i32 = arith.constant 0 : i32
    %c0_i32_0 = arith.constant 0 : i32
    %c0_i32_1 = arith.constant 0 : i32
    %c0_i32_2 = arith.constant 0 : i32
    %c0_i32_3 = arith.constant 0 : i32
    return %c0_i32, %c0_i32_0, %c0_i32_1, %c0_i32_2 : i32, i32, i32, i32
  }
  func.func @transform_4(%arg0: i32) -> (i32, i32, i32) {
    %c0_i32 = arith.constant 0 : i32
    %c0_i32_0 = arith.constant 0 : i32
    %c0_i32_1 = arith.constant 0 : i32
    %c0_i32_2 = arith.constant 0 : i32
    return %c0_i32, %c0_i32_0, %c0_i32_1 : i32, i32, i32
  }
  func.func @transform_5(%arg0: i32) -> (i32, i32, i32, i32) {
    %c0_i32 = arith.constant 0 : i32
    %c0_i32_0 = arith.constant 0 : i32
    %c0_i32_1 = arith.constant 0 : i32
    %c0_i32_2 = arith.constant 0 : i32
    %c0_i32_3 = arith.constant 0 : i32
    return %c0_i32, %c0_i32_0, %c0_i32_1, %c0_i32_2 : i32, i32, i32, i32
  }
  func.func @transform_6(%arg0: i32) -> (i32, i32, i32) {
    %c0_i32 = arith.constant 0 : i32
    %c0_i32_0 = arith.constant 0 : i32
    %c0_i32_1 = arith.constant 0 : i32
    %c0_i32_2 = arith.constant 0 : i32
    return %c0_i32, %c0_i32_0, %c0_i32_1 : i32, i32, i32
  }
  func.func @transform_7(%arg0: i32) -> (i32, i32, i32) {
    %c0_i32 = arith.constant 0 : i32
    %c0_i32_0 = arith.constant 0 : i32
    %c0_i32_1 = arith.constant 0 : i32
    %c0_i32_2 = arith.constant 0 : i32
    return %c0_i32, %c0_i32_0, %c0_i32_1 : i32, i32, i32
  }
  func.func @transform_8(%arg0: i32) -> (i32, i32, i32) {
    %c0_i32 = arith.constant 0 : i32
    %c0_i32_0 = arith.constant 0 : i32
    %c0_i32_1 = arith.constant 0 : i32
    %c0_i32_2 = arith.constant 0 : i32
    return %c0_i32, %c0_i32_0, %c0_i32_1 : i32, i32, i32
  }
  func.func @transform_9(%arg0: i32) -> (i32, i32) {
    %c0_i32 = arith.constant 0 : i32
    %c0_i32_0 = arith.constant 0 : i32
    %c0_i32_1 = arith.constant 0 : i32
    return %c0_i32, %c0_i32_0 : i32, i32
  }
  func.func @transform_10(%arg0: i32) -> (i32, i32) {
    %c0_i32 = arith.constant 0 : i32
    %c0_i32_0 = arith.constant 0 : i32
    %c0_i32_1 = arith.constant 0 : i32
    return %c0_i32, %c0_i32_0 : i32, i32
  }
  func.func @transform_11(%arg0: i32) -> (i32, i32) {
    %c0_i32 = arith.constant 0 : i32
    %c0_i32_0 = arith.constant 0 : i32
    %c0_i32_1 = arith.constant 0 : i32
    return %c0_i32, %c0_i32_0 : i32, i32
  }
  func.func @transform_12(%arg0: i32) -> (i32, i32, i32) {
    %c0_i32 = arith.constant 0 : i32
    %c0_i32_0 = arith.constant 0 : i32
    %c0_i32_1 = arith.constant 0 : i32
    return %arg0, %c0_i32, %c0_i32_0 : i32, i32, i32
  }
}

</mosaic_0001>

<bundles_post_ra>
// kernel: net2_forward.1
= control target key start
LH: loop header
LB: loop body
LE: loop exit
PB: predicated region body
PF: predicated region fallthrough
CT: control target
= control target key end

     0   :  { %17 = vsyncpa [#allocation3], 0  ;;  %s10418_s0 = inlined_call_operand.vmem [shape: f32[1,128,128], index: 0, kind: input, shape index: {}]   ;;  %s10419_s1 = inlined_call_operand.hbm [shape: bf16[4,3,128,128], index: 1, kind: input, shape index: {}]   ;;  %s10420_s2 = inlined_call_operand.hbm [shape: bf16[4,3,128,128], index: 2, kind: input, shape index: {}]   ;;  %s10421_s3 = inlined_call_operand.hbm [shape: bf16[4,3,128,128], index: 3, kind: input, shape index: {}]   ;;  %s10422_s4 = inlined_call_operand.hbm [shape: f32[4,1,128], index: 4, kind: input, shape index: {}]   ;;  %s10423_s5 = inlined_call_operand.hbm [shape: bf16[4,3,128,128], index: 5, kind: input, shape index: {}]   ;;  %s10424_s6 = inlined_call_operand.hbm [shape: f32[4,1,128], index: 6, kind: input, shape index: {}]   ;;  %s10425_s7 = inlined_call_operand.vmem [shape: bf16[4,128,128], index: 7, kind: input, shape index: {}]   ;;  %s10426_s8 = inlined_call_operand.hbm [shape: f32[4,1,128], index: 8, kind: input, shape index: {}]   ;;  %s10427_s9 = inlined_call_operand.vmem [shape: f32[8,128], index: 9, kind: input, shape index: {}]   ;;  %s10428_s10 = inlined_call_operand.vmem [shape: f32[128,128], index: 10, kind: input, shape index: {}]   ;;  %s10429_s11 = inlined_call_operand.vmem [shape: f32[1,128], index: 11, kind: input, shape index: {}]   ;;  %s10430_s12 = inlined_call_operand.vmem [shape: f32[1,8,128], index: 12, kind: output, shape index: {}]  }
   0x1   :  { %18 = vsyncpa [#allocation5], 0 }
   0x2   :  { %19 = vsyncpa [#allocation8], 0 }
   0x3   :  { %20 = vsyncpa [#allocation11], 0  ;;  %s40_s23 = sshll.u32 %s10420_s2, 4  ;;  %s9248_s24 = smov [#allocation4]   ;;  %s41_s23 = int_to_ptr.hbm [resolvable:$true] %s40_s23 }
   0x4   :  { %s42_s25 = sshll.u32 %s9248_s24, 4  ;;  %s66_s28 = sshll.u32 %s10422_s4, 4  ;;  %s43_s25 = int_to_ptr.vmem [resolvable:$true] %s42_s25  ;;  %s67_s28 = int_to_ptr.hbm [resolvable:$true] %s66_s28 }
   0x5   :  { %s9249_s29 = smov 64   ;;  %s9250_s30 = smov 4  }
   0x6   :  { %48 = dma.hbm_to_vmem [thread:$0]  %s41_s23, 12288, %s43_s25, [#allocation5], %s9249_s29, %s9249_s29, %s9250_s30  }
   0x7   :  { %s9251_s13 = smov [#allocation7]   ;;  %s9252_s15 = smov 16  }
   0x8   :  { %s68_s14 = sshll.u32 %s9251_s13, 4  ;;  %s9253_s2 = smov 1   ;;  %s69_s14 = int_to_ptr.vmem [resolvable:$true] %s68_s14 }
   0x9   :  { %74 = dma.hbm_to_vmem [thread:$0]  %s67_s28, 64, %s69_s14, [#allocation8], %s9252_s15, %s9252_s15, %s9253_s2  }
   0xa   :  { %s92_s4 = sshll.u32 %s10424_s6, 4  ;;  %s9254_s18 = smov [#allocation10]   ;;  %s93_s4 = int_to_ptr.hbm [resolvable:$true] %s92_s4 }
   0xb   :  { %s94_s19 = sshll.u32 %s9254_s18, 4  ;;  %s27_s22 = sshll.u32 %s10419_s1, 4  ;;  %s95_s19 = int_to_ptr.vmem [resolvable:$true] %s94_s19  ;;  %s28_s22 = int_to_ptr.hbm [resolvable:$true] %s27_s22 }
   0xc   :  { %100 = dma.hbm_to_vmem [thread:$0]  %s93_s4, 64, %s95_s19, [#allocation11], %s9252_s15, %s9252_s15, %s9253_s2  }
   0xd   :  { %s9255_s23 = smov [#allocation2]   ;;  %s53_s27 = sshll.u32 %s10421_s3, 4  ;;  %s54_s27 = int_to_ptr.hbm [resolvable:$true] %s53_s27 }
   0xe   :  { %s29_s24 = sshll.u32 %s9255_s23, 4  ;;  %s79_s1 = sshll.u32 %s10423_s5, 4  ;;  %s30_s24 = int_to_ptr.vmem [resolvable:$true] %s29_s24  ;;  %s80_s1 = int_to_ptr.hbm [resolvable:$true] %s79_s1 }
   0xf   :  { %35 = dma.hbm_to_vmem [thread:$0]  %s28_s22, 12288, %s30_s24, [#allocation3], %s9249_s29, %s9249_s29, %s9250_s30  }
  0x10   :  { %s9256_s13 = smov [#allocation6]   ;;  %s9257_s16 = smov [#allocation9]  }
  0x11   :  { %s55_s14 = sshll.u32 %s9256_s13, 4  ;;  %s81_s3 = sshll.u32 %s9257_s16, 4  ;;  %s56_s14 = int_to_ptr.vmem [resolvable:$true] %s55_s14  ;;  %s82_s3 = int_to_ptr.vmem [resolvable:$true] %s81_s3 }
  0x12   :  { %61 = dma.hbm_to_vmem [thread:$0]  %s54_s27, 12288, %s56_s14, [#allocation5], %s9249_s29, %s9249_s29, %s9250_s30  }
  0x13   :  { %s107_s18 = sshll.u32 %s10426_s8, 4  ;;  %s9258_s5 = smov [#allocation12]   ;;  %s108_s18 = int_to_ptr.hbm [resolvable:$true] %s107_s18 }
  0x14   :  { %87 = dma.hbm_to_vmem [thread:$0]  %s80_s1, 12288, %s82_s3, [#allocation8], %s9249_s29, %s9249_s29, %s9250_s30  }
  0x15   :  { %s109_s19 = sshll.u32 %s9258_s5, 4  ;;  %s110_s19 = int_to_ptr.vmem [resolvable:$true] %s109_s19 }
  0x16   :  { %115 = dma.hbm_to_vmem [thread:$0]  %s108_s18, 64, %s110_s19, [#allocation11], %s9252_s15, %s9252_s15, %s9253_s2  }
  0x17   :  { %9240 = dma.done.wait [#allocation3], 12288  }
  0x18   :  { %9241 = vsyncadd [#allocation3], 4294955008 }
  0x19   :  { %9242 = dma.done.wait [#allocation5], 24576  }
  0x1a   :  { %9243 = vsyncadd [#allocation5], 4294942720 }
  0x1b   :  { %9244 = dma.done.wait [#allocation8], 12352  }
  0x1c   :  { %9245 = vsyncadd [#allocation8], 4294954944 }
  0x1d   :  { %9246 = dma.done.wait [#allocation11], 128  }
  0x1e   :  { %9247 = vsyncadd [#allocation11], 4294967168  ;;  %v164_v0 = vld [vmem:[%s10418_s0 + $0x70] sm:$0xff]  ;;  %v165_v1 = vld [vmem:[%s10418_s0 + $0x78] sm:$0xff] }
  0x1f   :  { %v162_v2 = vld [vmem:[%s10418_s0 + $0x60] sm:$0xff]  ;;  %v173_v3 = vpack.c.bf16 %v165_v1, %v164_v0  ;;  %v163_v4 = vld [vmem:[%s10418_s0 + $0x68] sm:$0xff]  ;;  %v160_v6 = vld [vmem:[%s10418_s0 + $0x50] sm:$0xff] }
  0x20   :  { %v172_v5 = vpack.c.bf16 %v163_v4, %v162_v2  ;;  %v161_v7 = vld [vmem:[%s10418_s0 + $0x58] sm:$0xff]  ;;  %v158_v8 = vld [vmem:[%s10418_s0 + $0x40] sm:$0xff]  ;;  %v159_v9 = vld [vmem:[%s10418_s0 + $0x48] sm:$0xff] }
  0x21   :  { %239 = vmatpush.bf16.msra.mxu0 %v173_v3  ;;  %377 = vmatpush.bf16.msra.mxu1 %v173_v3  ;;  %v171_v10 = vpack.c.bf16 %v161_v7, %v160_v6  ;;  %v170_v11 = vpack.c.bf16 %v159_v9, %v158_v8  ;;  %v156_v12 = vld [vmem:[%s10418_s0 + $0x30] sm:$0xff]  ;;  %v157_v13 = vld [vmem:[%s10418_s0 + $0x38] sm:$0xff]  ;;  %v154_v15 = vld [vmem:[%s10418_s0 + $0x20] sm:$0xff] }
  0x22   :  { %v169_v14 = vpack.c.bf16 %v157_v13, %v156_v12  ;;  %v155_v16 = vld [vmem:[%s10418_s0 + $0x28] sm:$0xff]  ;;  %v152_v18 = vld [vmem:[%s10418_s0 + $0x10] sm:$0xff]  ;;  %v153_v19 = vld [vmem:[%s10418_s0 + $0x18] sm:$0xff] }
  0x23   :  { %v168_v17 = vpack.c.bf16 %v155_v16, %v154_v15  ;;  %v167_v20 = vpack.c.bf16 %v153_v19, %v152_v18  ;;  %v150_v21 = vld [vmem:[%s10418_s0] sm:$0xff]  ;;  %v151_v22 = vld [vmem:[%s10418_s0 + $0x8] sm:$0xff]  ;;  %v8634_v28 = vld [vmem:[#allocation2 + $0x50] sm:$0xff] }
  0x24   :  { %v166_v23 = vpack.c.bf16 %v151_v22, %v150_v21  ;;  %v8632_v24 = vld [vmem:[#allocation2 + $0x40] sm:$0xff]  ;;  %v8633_v26 = vld [vmem:[#allocation2 + $0x48] sm:$0xff]  ;;  %v8650_v29 = vld [vmem:[#allocation2 + $0x10] sm:$0xff] }
  0x25   :  { %240 = vmatpush.bf16.msra.mxu0 %v172_v5  ;;  %378 = vmatpush.bf16.msra.mxu1 %v172_v5  ;;  %v8648_v25 = vld [vmem:[#allocation2] sm:$0xff]  ;;  %v8649_v27 = vld [vmem:[#allocation2 + $0x8] sm:$0xff]  ;;  %v8635_v30 = vld [vmem:[#allocation2 + $0x58] sm:$0xff] }
  0x26   :  { %v8651_v31 = vld [vmem:[#allocation2 + $0x18] sm:$0xff]  ;;  %v8636_v32 = vld [vmem:[#allocation2 + $0x60] sm:$0xff]  ;;  %v8662_v36 = vld [vmem:[#allocation6 + $0x30] sm:$0xff] }
  0x27   :  { %v8652_v33 = vld [vmem:[#allocation2 + $0x20] sm:$0xff]  ;;  %v8663_v34 = vld [vmem:[#allocation6 + $0x38] sm:$0xff]  ;;  %v8646_v37 = vld [vmem:[#allocation6 + $0x70] sm:$0xff] }
  0x28   :  { %v8647_v35 = vld [vmem:[#allocation6 + $0x78] sm:$0xff]  ;;  %498 = vmatpush.bf16.msra.mxu2 %v8663_v34  ;;  %v8637_v38 = vld [vmem:[#allocation2 + $0x68] sm:$0xff]  ;;  %v8660_v42 = vld [vmem:[#allocation6 + $0x20] sm:$0xff] }
  0x29   :  { %241 = vmatpush.bf16.msra.mxu0 %v171_v10  ;;  %379 = vmatpush.bf16.msra.mxu1 %v171_v10  ;;  %v8653_v39 = vld [vmem:[#allocation2 + $0x28] sm:$0xff]  ;;  %v8644_v43 = vld [vmem:[#allocation6 + $0x60] sm:$0xff]  ;;  %v8659_v44 = vld [vmem:[#allocation6 + $0x18] sm:$0xff] }
  0x2a   :  { %595 = vmatpush.bf16.msra.mxu3 %v8647_v35  ;;  %v8661_v40 = vld [vmem:[#allocation6 + $0x28] sm:$0xff]  ;;  %v8643_v45 = vld [vmem:[#allocation6 + $0x58] sm:$0xff]  ;;  %v8658_v46 = vld [vmem:[#allocation6 + $0x10] sm:$0xff] }
  0x2b   :  { %v8645_v41 = vld [vmem:[#allocation6 + $0x68] sm:$0xff]  ;;  %v8642_v47 = vld [vmem:[#allocation6 + $0x50] sm:$0xff]  ;;  %v8656_v52 = vld [vmem:[#allocation6] sm:$0xff] }
  0x2c   :  { %499 = vmatpush.bf16.msra.mxu2 %v8662_v36  ;;  %v8638_v48 = vld [vmem:[#allocation2 + $0x70] sm:$0xff]  ;;  %v8657_v50 = vld [vmem:[#allocation6 + $0x8] sm:$0xff]  ;;  %v8640_v53 = vld [vmem:[#allocation6 + $0x40] sm:$0xff] }
  0x2d   :  { %242 = vmatpush.bf16.msra.mxu0 %v170_v11  ;;  %380 = vmatpush.bf16.msra.mxu1 %v170_v11  ;;  %v8654_v49 = vld [vmem:[#allocation2 + $0x30] sm:$0xff]  ;;  %v8641_v51 = vld [vmem:[#allocation6 + $0x48] sm:$0xff]  ;;  %v8639_v54 = vld [vmem:[#allocation2 + $0x78] sm:$0xff] }
  0x2e   :  { %596 = vmatpush.bf16.msra.mxu3 %v8646_v37  ;;  %v8655_v55 = vld [vmem:[#allocation2 + $0x38] sm:$0xff]  ;;  %v8664_v56 = vld [vmem:[#allocation2 + $0x80] sm:$0xff]  ;;  %v8665_v63 = vld [vmem:[#allocation2 + $0x88] sm:$0xff] }
  0x2f   :  { %v8666_v6 = vld [vmem:[#allocation2 + $0x90] sm:$0xff]  ;;  %v8667_v13 = vld [vmem:[#allocation2 + $0x98] sm:$0xff] }
  0x30   :  { %500 = vmatpush.bf16.msra.mxu2 %v8661_v40  ;;  %v8670_v40 = vld [vmem:[#allocation2 + $0xb0] sm:$0xff] }
  0x31   :  { %243 = vmatpush.bf16.msra.mxu0 %v169_v14  ;;  %381 = vmatpush.bf16.msra.mxu1 %v169_v14 }
  0x32   :  { %597 = vmatpush.bf16.msra.mxu3 %v8645_v41 }
  0x34   :  { %501 = vmatpush.bf16.msra.mxu2 %v8660_v42 }
  0x35   :  { %244 = vmatpush.bf16.msra.mxu0 %v168_v17  ;;  %382 = vmatpush.bf16.msra.mxu1 %v168_v17 }
  0x36   :  { %598 = vmatpush.bf16.msra.mxu3 %v8644_v43  ;;  %v8673_v43 = vld [vmem:[#allocation6 + $0x88] sm:$0xff] }
  0x38   :  { %502 = vmatpush.bf16.msra.mxu2 %v8659_v44  ;;  %v8672_v44 = vld [vmem:[#allocation6 + $0x80] sm:$0xff] }
  0x39   :  { %245 = vmatpush.bf16.msra.mxu0 %v167_v20  ;;  %383 = vmatpush.bf16.msra.mxu1 %v167_v20 }
  0x3a   :  { %599 = vmatpush.bf16.msra.mxu3 %v8643_v45 }
  0x3c   :  { %503 = vmatpush.bf16.msra.mxu2 %v8658_v46 }
  0x3d   :  { %246 = vmatpush.bf16.msra.mxu0 %v166_v23  ;;  %384 = vmatpush.bf16.msra.mxu1 %v166_v23 }
  0x3e   :  { %600 = vmatpush.bf16.msra.mxu3 %v8642_v47 }
  0x40   :  { %247 = vmatmul.bf16.vlgmr.msra.gmra.mxu0 %v8632_v24  ;;  %385 = vmatmul.bf16.vlgmr.msra.gmra.mxu1 %v8648_v25 }
  0x41   :  { %709 = vmatpush.bf16.msrb.mxu0 %v173_v3  ;;  %504 = vmatpush.bf16.msra.mxu2 %v8657_v50 }
  0x42   :  { %601 = vmatpush.bf16.msra.mxu3 %v8641_v51 }
  0x45   :  { %710 = vmatpush.bf16.msrb.mxu0 %v172_v5  ;;  %505 = vmatpush.bf16.msra.mxu2 %v8656_v52 }
  0x46   :  { %602 = vmatpush.bf16.msra.mxu3 %v8640_v53 }
  0x49   :  { %711 = vmatpush.bf16.msrb.mxu0 %v171_v10 }
  0x4d   :  { %712 = vmatpush.bf16.msrb.mxu0 %v170_v11 }
  0x50   :  { %252 = vmatmul.bf16.gmra.mxu0 %v8633_v26  ;;  %390 = vmatmul.bf16.gmra.mxu1 %v8649_v27  ;;  %v8679_v27 = vld [vmem:[#allocation6 + $0xb8] sm:$0xff] }
  0x51   :  { %713 = vmatpush.bf16.msrb.mxu0 %v169_v14  ;;  %831 = vmatpush.bf16.msrb.mxu1 %v8679_v27 }
  0x55   :  { %714 = vmatpush.bf16.msrb.mxu0 %v168_v17 }
  0x59   :  { %715 = vmatpush.bf16.msrb.mxu0 %v167_v20  ;;  %v8668_v20 = vld [vmem:[#allocation2 + $0xa0] sm:$0xff] }
  0x5d   :  { %716 = vmatpush.bf16.msrb.mxu0 %v166_v23 }
  0x60   :  { %257 = vmatmul.bf16.gmra.mxu0 %v8634_v28  ;;  %395 = vmatmul.bf16.gmra.mxu1 %v8650_v29  ;;  %v8678_v28 = vld [vmem:[#allocation6 + $0xb0] sm:$0xff]  ;;  %v8669_v29 = vld [vmem:[#allocation2 + $0xa8] sm:$0xff] }
  0x61   :  { %832 = vmatpush.bf16.msrb.mxu1 %v8678_v28 }
  0x70   :  { %262 = vmatmul.bf16.gmra.mxu0 %v8635_v30  ;;  %400 = vmatmul.bf16.gmra.mxu1 %v8651_v31 }
  0x80   :  { %267 = vmatmul.bf16.gmra.mxu0 %v8636_v32  ;;  %405 = vmatmul.bf16.gmra.mxu1 %v8652_v33  ;;  %v8677_v32 = vld [vmem:[#allocation6 + $0xa8] sm:$0xff]  ;;  %v8676_v33 = vld [vmem:[#allocation6 + $0xa0] sm:$0xff] }
  0x81   :  { %833 = vmatpush.bf16.msrb.mxu1 %v8677_v32 }
  0x85   :  { %834 = vmatpush.bf16.msrb.mxu1 %v8676_v33 }
  0x90   :  { %272 = vmatmul.bf16.gmra.mxu0 %v8637_v38  ;;  %410 = vmatmul.bf16.gmra.mxu1 %v8653_v39  ;;  %v8675_v38 = vld [vmem:[#allocation6 + $0x98] sm:$0xff]  ;;  %v8674_v39 = vld [vmem:[#allocation6 + $0x90] sm:$0xff] }
  0x91   :  { %835 = vmatpush.bf16.msrb.mxu1 %v8675_v38 }
  0x95   :  { %836 = vmatpush.bf16.msrb.mxu1 %v8674_v39 }
  0x99   :  { %837 = vmatpush.bf16.msrb.mxu1 %v8673_v43 }
  0x9d   :  { %838 = vmatpush.bf16.msrb.mxu1 %v8672_v44 }
  0xa0   :  { %277 = vmatmul.bf16.gmra.mxu0 %v8638_v48  ;;  %415 = vmatmul.bf16.gmra.mxu1 %v8654_v49  ;;  %v8671_v49 = vld [vmem:[#allocation2 + $0xb8] sm:$0xff] }
  0xb0   :  { %282 = vmatmul.bf16.gmra.mxu0 %v8639_v54  ;;  %420 = vmatmul.bf16.gmra.mxu1 %v8655_v55 }
  0xbd   :  { %v248_v57 = vpop.f32.mrf.mxu0  ;;  %v386_v58 = vpop.f32.mrf.mxu1 }
  0xc0   :  { %717 = vmatmul.bf16.vlgmr.msrb.gmra.mxu0 %v8664_v56 }
  0xc5   :  { %v250_v59 = vpop.f32.mrf.mxu0  ;;  %v388_v60 = vpop.f32.mrf.mxu1 }
  0xc6   :  { %v426_v61 = vpack.c.bf16 %v388_v60, %v386_v58  ;;  %v9414_v62 = vpack.c.bf16 %v250_v59, %v248_v57 }
  0xc8   :  { %506 = vmatmul.bf16.vlgmr.msra.gmra.mxu2 %v426_v61  ;;  %603 = vmatmul.bf16.vlgmr.msra.gmra.mxu3 %v9414_v62 }
  0xcd   :  { %v253_v0 = vpop.f32.mrf.mxu0  ;;  %v391_v1 = vpop.f32.mrf.mxu1 }
  0xd0   :  { %722 = vmatmul.bf16.gmra.mxu0 %v8665_v63 }
  0xd5   :  { %v255_v2 = vpop.f32.mrf.mxu0  ;;  %v393_v3 = vpop.f32.mrf.mxu1 }
  0xd6   :  { %v427_v4 = vpack.c.bf16 %v393_v3, %v391_v1  ;;  %v9417_v5 = vpack.c.bf16 %v255_v2, %v253_v0 }
  0xd8   :  { %511 = vmatmul.bf16.gmra.mxu2 %v427_v4  ;;  %608 = vmatmul.bf16.gmra.mxu3 %v9417_v5 }
  0xdd   :  { %v258_v7 = vpop.f32.mrf.mxu0  ;;  %v396_v8 = vpop.f32.mrf.mxu1 }
  0xe0   :  { %727 = vmatmul.bf16.gmra.mxu0 %v8666_v6 }
  0xe5   :  { %v260_v9 = vpop.f32.mrf.mxu0  ;;  %v398_v10 = vpop.f32.mrf.mxu1 }
  0xe6   :  { %v428_v11 = vpack.c.bf16 %v398_v10, %v396_v8  ;;  %v9420_v12 = vpack.c.bf16 %v260_v9, %v258_v7 }
  0xe8   :  { %516 = vmatmul.bf16.gmra.mxu2 %v428_v11  ;;  %613 = vmatmul.bf16.gmra.mxu3 %v9420_v12 }
  0xed   :  { %v263_v14 = vpop.f32.mrf.mxu0  ;;  %v401_v15 = vpop.f32.mrf.mxu1 }
  0xf0   :  { %732 = vmatmul.bf16.gmra.mxu0 %v8667_v13 }
  0xf5   :  { %v265_v16 = vpop.f32.mrf.mxu0  ;;  %v403_v17 = vpop.f32.mrf.mxu1 }
  0xf6   :  { %v429_v18 = vpack.c.bf16 %v403_v17, %v401_v15  ;;  %v9423_v19 = vpack.c.bf16 %v265_v16, %v263_v14 }
  0xf8   :  { %521 = vmatmul.bf16.gmra.mxu2 %v429_v18  ;;  %618 = vmatmul.bf16.gmra.mxu3 %v9423_v19 }
  0xfd   :  { %v268_v21 = vpop.f32.mrf.mxu0  ;;  %v406_v22 = vpop.f32.mrf.mxu1 }
 0x100   :  { %737 = vmatmul.bf16.gmra.mxu0 %v8668_v20 }
 0x105   :  { %v270_v23 = vpop.f32.mrf.mxu0  ;;  %v408_v24 = vpop.f32.mrf.mxu1 }
 0x106   :  { %v430_v25 = vpack.c.bf16 %v408_v24, %v406_v22  ;;  %v9426_v26 = vpack.c.bf16 %v270_v23, %v268_v21 }
 0x108   :  { %526 = vmatmul.bf16.gmra.mxu2 %v430_v25  ;;  %623 = vmatmul.bf16.gmra.mxu3 %v9426_v26 }
 0x10d   :  { %v273_v30 = vpop.f32.mrf.mxu0  ;;  %v411_v31 = vpop.f32.mrf.mxu1 }
 0x110   :  { %742 = vmatmul.bf16.gmra.mxu0 %v8669_v29 }
 0x115   :  { %v275_v34 = vpop.f32.mrf.mxu0  ;;  %v413_v35 = vpop.f32.mrf.mxu1 }
 0x116   :  { %v431_v36 = vpack.c.bf16 %v413_v35, %v411_v31  ;;  %v9429_v37 = vpack.c.bf16 %v275_v34, %v273_v30 }
 0x118   :  { %531 = vmatmul.bf16.gmra.mxu2 %v431_v36  ;;  %628 = vmatmul.bf16.gmra.mxu3 %v9429_v37 }
 0x11d   :  { %v278_v41 = vpop.f32.mrf.mxu0  ;;  %v416_v42 = vpop.f32.mrf.mxu1 }
 0x120   :  { %747 = vmatmul.bf16.gmra.mxu0 %v8670_v40 }
 0x125   :  { %v280_v45 = vpop.f32.mrf.mxu0  ;;  %v418_v46 = vpop.f32.mrf.mxu1 }
 0x126   :  { %v432_v47 = vpack.c.bf16 %v418_v46, %v416_v42  ;;  %v9432_v48 = vpack.c.bf16 %v280_v45, %v278_v41 }
 0x128   :  { %536 = vmatmul.bf16.gmra.mxu2 %v432_v47  ;;  %633 = vmatmul.bf16.gmra.mxu3 %v9432_v48 }
 0x12d   :  { %v283_v50 = vpop.f32.mrf.mxu0  ;;  %v421_v51 = vpop.f32.mrf.mxu1 }
 0x130   :  { %752 = vmatmul.bf16.gmra.mxu0 %v8671_v49 }
 0x135   :  { %v285_v52 = vpop.f32.mrf.mxu0  ;;  %v423_v53 = vpop.f32.mrf.mxu1 }
 0x136   :  { %v433_v54 = vpack.c.bf16 %v423_v53, %v421_v51  ;;  %v9435_v55 = vpack.c.bf16 %v285_v52, %v283_v50 }
 0x138   :  { %541 = vmatmul.bf16.gmra.mxu2 %v433_v54  ;;  %638 = vmatmul.bf16.gmra.mxu3 %v9435_v55 }
 0x13d   :  { %v718_v56 = vpop.f32.mrf.mxu0 }
 0x145   :  { %v720_v57 = vpop.f32.mrf.mxu0 }
 0x146   :  { %v758_v58 = vpack.c.bf16 %v720_v57, %v718_v56 }
 0x148   :  { %839 = vmatmul.bf16.vlgmr.msrb.gmra.mxu1 %v758_v58 }
 0x14b   :  { %v507_v59 = vpop.f32.mrf.mxu2  ;;  %v604_v60 = vpop.f32.mrf.mxu3 }
 0x14c   :  { %v605_v61 = vadd.f32 %v604_v60, %v507_v59 }
 0x14d   :  { %v723_v63 = vpop.f32.mrf.mxu0 }
 0x153   :  { %v9438_v0 = vpop.f32.mrf.mxu2  ;;  %v9440_v1 = vpop.f32.mrf.mxu3 }
 0x155   :  { %v725_v2 = vpop.f32.mrf.mxu0 }
 0x156   :  { %v759_v3 = vpack.c.bf16 %v725_v2, %v723_v63 }
 0x158   :  { %844 = vmatmul.bf16.gmra.mxu1 %v759_v3 }
 0x15b   :  { %v512_v4 = vpop.f32.mrf.mxu2  ;;  %v609_v6 = vpop.f32.mrf.mxu3 }
 0x15c   :  { %v610_v7 = vadd.f32 %v609_v6, %v512_v4 }
 0x15d   :  { %v728_v8 = vpop.f32.mrf.mxu0 }
 0x163   :  { %v9442_v9 = vpop.f32.mrf.mxu2  ;;  %v9444_v10 = vpop.f32.mrf.mxu3 }
 0x165   :  { %v730_v11 = vpop.f32.mrf.mxu0 }
 0x166   :  { %v760_v13 = vpack.c.bf16 %v730_v11, %v728_v8 }
 0x168   :  { %849 = vmatmul.bf16.gmra.mxu1 %v760_v13 }
 0x16b   :  { %v517_v14 = vpop.f32.mrf.mxu2  ;;  %v614_v15 = vpop.f32.mrf.mxu3 }
 0x16c   :  { %v615_v16 = vadd.f32 %v614_v15, %v517_v14 }
 0x16d   :  { %v733_v17 = vpop.f32.mrf.mxu0 }
 0x173   :  { %v9446_v18 = vpop.f32.mrf.mxu2  ;;  %v9448_v20 = vpop.f32.mrf.mxu3 }
 0x175   :  { %v735_v21 = vpop.f32.mrf.mxu0 }
 0x176   :  { %v761_v22 = vpack.c.bf16 %v735_v21, %v733_v17 }
 0x178   :  { %854 = vmatmul.bf16.gmra.mxu1 %v761_v22 }
 0x17b   :  { %v522_v23 = vpop.f32.mrf.mxu2  ;;  %v619_v24 = vpop.f32.mrf.mxu3 }
 0x17c   :  { %v620_v25 = vadd.f32 %v619_v24, %v522_v23 }
 0x17d   :  { %v738_v27 = vpop.f32.mrf.mxu0 }
 0x183   :  { %v9450_v28 = vpop.f32.mrf.mxu2  ;;  %v9452_v29 = vpop.f32.mrf.mxu3 }
 0x185   :  { %v740_v30 = vpop.f32.mrf.mxu0 }
 0x186   :  { %v762_v31 = vpack.c.bf16 %v740_v30, %v738_v27 }
 0x188   :  { %859 = vmatmul.bf16.gmra.mxu1 %v762_v31 }
 0x18b   :  { %v527_v32 = vpop.f32.mrf.mxu2  ;;  %v624_v33 = vpop.f32.mrf.mxu3 }
 0x18c   :  { %v625_v34 = vadd.f32 %v624_v33, %v527_v32 }
 0x18d   :  { %v743_v35 = vpop.f32.mrf.mxu0 }
 0x193   :  { %v529_v58 = vpop.f32.mrf.mxu2  ;;  %v626_v59 = vpop.f32.mrf.mxu3 }
 0x195   :  { %v745_v36 = vpop.f32.mrf.mxu0 }
 0x196   :  { %v763_v38 = vpack.c.bf16 %v745_v36, %v743_v35  ;;  %v9468_v35 = vld [vmem:[#allocation7] ss:$0 sm:$0xff] }
 0x198   :  { %864 = vmatmul.bf16.gmra.mxu1 %v763_v38 }
 0x19b   :  { %v532_v63 = vpop.f32.mrf.mxu2  ;;  %v629_v3 = vpop.f32.mrf.mxu3 }
 0x19d   :  { %v748_v39 = vpop.f32.mrf.mxu0 }
 0x1a3   :  { %v534_v6 = vpop.f32.mrf.mxu2 }
 0x1a5   :  { %v750_v40 = vpop.f32.mrf.mxu0 }
 0x1a6   :  { %v764_v41 = vpack.c.bf16 %v750_v40, %v748_v39 }
 0x1a8   :  { %869 = vmatmul.bf16.gmra.mxu1 %v764_v41 }
 0x1ab   :  { %v537_v11 = vpop.f32.mrf.mxu2 }
 0x1ad   :  { %v753_v42 = vpop.f32.mrf.mxu0 }
 0x1b3   :  { %v539_v15 = vpop.f32.mrf.mxu2 }
 0x1b5   :  { %v755_v43 = vpop.f32.mrf.mxu0 }
 0x1b6   :  { %v765_v44 = vpack.c.bf16 %v755_v43, %v753_v42  ;;  %v630_v43 = vadd.f32 %v629_v3, %v532_v63 }
 0x1b8   :  { %874 = vmatmul.bf16.gmra.mxu1 %v765_v44 }
 0x1bb   :  { %v542_v22 = vpop.f32.mrf.mxu2 }
 0x1c3   :  { %v544_v27 = vpop.f32.mrf.mxu2 }
 0x1c5   :  { %v840_v45 = vpop.f32.mrf.mxu1 }
 0x1c6   :  { %v9454_v46 = vadd.f32 %v840_v45, %v605_v61 }
 0x1cd   :  { %v9456_v47 = vpop.f32.mrf.mxu1 }
 0x1d5   :  { %v845_v49 = vpop.f32.mrf.mxu1 }
 0x1d6   :  { %v9458_v50 = vadd.f32 %v845_v49, %v610_v7  ;;  %v631_v7 = vpop.f32.mrf.mxu3 }
 0x1d7   :  { %v632_v39 = vadd.f32 %v631_v7, %v534_v6 }
 0x1dd   :  { %v9460_v51 = vpop.f32.mrf.mxu1 }
 0x1de   :  { %v634_v13 = vpop.f32.mrf.mxu3 }
 0x1df   :  { %v635_v33 = vadd.f32 %v634_v13, %v537_v11 }
 0x1e5   :  { %v850_v52 = vpop.f32.mrf.mxu1 }
 0x1e6   :  { %v9462_v53 = vadd.f32 %v850_v52, %v615_v16  ;;  %v636_v16 = vpop.f32.mrf.mxu3  ;;  %v627_v52 = vadd.f32 %v626_v59, %v529_v58 }
 0x1e7   :  { %v637_v31 = vadd.f32 %v636_v16, %v539_v15 }
 0x1ed   :  { %v9464_v54 = vpop.f32.mrf.mxu1 }
 0x1ee   :  { %v639_v23 = vpop.f32.mrf.mxu3 }
 0x1f5   :  { %v855_v56 = vpop.f32.mrf.mxu1 }
 0x1f6   :  { %v9466_v57 = vadd.f32 %v855_v56, %v620_v25  ;;  %v640_v25 = vadd.f32 %v639_v23, %v542_v22  ;;  %v641_v30 = vpop.f32.mrf.mxu3 }
 0x1fd   :  { %v857_v60 = vpop.f32.mrf.mxu1 }
 0x205   :  { %v860_v61 = vpop.f32.mrf.mxu1 }
 0x206   :  { %v888_v2 = vadd.f32 %v860_v61, %v625_v34  ;;  %v642_v34 = vadd.f32 %v641_v30, %v544_v27 }
 0x20d   :  { %v862_v4 = vpop.f32.mrf.mxu1 }
 0x20e   :  { %v889_v15 = vadd.f32 %v862_v4, %v627_v52  ;;  %v617_v4 = vadd.f32 %v9448_v20, %v9446_v18  ;;  %v8684_v52 = vld [vmem:[#allocation4 + $0x20] sm:$0xff] }
 0x210   :  { %v909_v58 = vadd.f32 %v9468_v35, %v889_v15  ;;  %v8701_v15 = vld [vmem:[#allocation4 + $0x68] sm:$0xff] }
 0x212   :  { %v925_v23 = vmax.f32 %v909_v58, 0.0  ;;  %v8691_v58 = vld [vmem:[#allocation9 + $0x18] sm:$0xff] }
 0x215   :  { %v865_v8 = vpop.f32.mrf.mxu1 }
 0x216   :  { %v890_v56 = vadd.f32 %v865_v8, %v630_v43  ;;  %v8682_v43 = vld [vmem:[#allocation4 + $0x10] sm:$0xff] }
 0x218   :  { %v910_v63 = vadd.f32 %v9468_v35, %v890_v56  ;;  %v8700_v56 = vld [vmem:[#allocation4 + $0x60] sm:$0xff] }
 0x21a   :  { %v926_v22 = vmax.f32 %v910_v63, 0.0  ;;  %v8708_v63 = vld [vmem:[#allocation9 + $0x60] sm:$0xff] }
 0x21d   :  { %v867_v14 = vpop.f32.mrf.mxu1 }
 0x21e   :  { %v891_v44 = vadd.f32 %v867_v14, %v632_v39 }
 0x220   :  { %v911_v16 = vadd.f32 %v9468_v35, %v891_v44  ;;  %v8698_v44 = vld [vmem:[#allocation4 + $0x50] sm:$0xff] }
 0x222   :  { %v927_v59 = vmax.f32 %v911_v16, 0.0  ;;  %v8710_v16 = vld [vmem:[#allocation9 + $0x70] sm:$0xff] }
 0x225   :  { %v870_v17 = vpop.f32.mrf.mxu1 }
 0x226   :  { %v892_v40 = vadd.f32 %v870_v17, %v635_v33  ;;  %v622_v17 = vadd.f32 %v9452_v29, %v9450_v28  ;;  %v885_v28 = vadd.f32 %v9464_v54, %v617_v4  ;;  %v607_v54 = vadd.f32 %v9440_v1, %v9438_v0  ;;  %v8706_v4 = vld [vmem:[#allocation9 + $0x50] sm:$0xff] }
 0x228   :  { %v912_v61 = vadd.f32 %v9468_v35, %v892_v40  ;;  %v887_v14 = vadd.f32 %v857_v60, %v622_v17  ;;  %v612_v60 = vadd.f32 %v9444_v10, %v9442_v9  ;;  %v905_v20 = vadd.f32 %v9468_v35, %v885_v28  ;;  %v8693_v17 = vld [vmem:[#allocation9 + $0x28] sm:$0xff] }
 0x229   :  { %v881_v9 = vadd.f32 %v9456_v47, %v607_v54  ;;  %v8689_v28 = vld [vmem:[#allocation9 + $0x8] sm:$0xff] }
 0x22a   :  { %v928_v3 = vmax.f32 %v912_v61, 0.0  ;;  %v907_v29 = vadd.f32 %v9468_v35, %v887_v14  ;;  %v883_v18 = vadd.f32 %v9460_v51, %v612_v60  ;;  %v902_v51 = vadd.f32 %v9468_v35, %v9458_v50  ;;  %v8680_v50 = vld [vmem:[#allocation4] sm:$0xff]  ;;  %v8703_v60 = vld [vmem:[#allocation4 + $0x78] sm:$0xff] }
 0x22b   :  { %v901_v0 = vadd.f32 %v9468_v35, %v881_v9  ;;  %v8711_v61 = vld [vmem:[#allocation9 + $0x78] sm:$0xff] }
 0x22c   :  { %v903_v10 = vadd.f32 %v9468_v35, %v883_v18  ;;  %1264 = vmatpush.bf16.msra.mxu0 %v8711_v61  ;;  %v8707_v14 = vld [vmem:[#allocation9 + $0x58] sm:$0xff] }
 0x22d   :  { %v872_v21 = vpop.f32.mrf.mxu1  ;;  %v917_v47 = vmax.f32 %v901_v0, 0.0 }
 0x22e   :  { %v893_v36 = vadd.f32 %v872_v21, %v637_v31  ;;  %v908_v21 = vadd.f32 %v9468_v35, %v888_v2  ;;  %v923_v2 = vmax.f32 %v907_v29, 0.0  ;;  %v904_v31 = vadd.f32 %v9468_v35, %v9462_v53  ;;  %v8704_v29 = vld [vmem:[#allocation9 + $0x40] sm:$0xff] }
 0x22f   :  { %v919_v1 = vmax.f32 %v903_v10, 0.0  ;;  %v900_v53 = vadd.f32 %v9468_v35, %v9454_v46  ;;  %v8681_v46 = vld [vmem:[#allocation4 + $0x8] sm:$0xff] }
 0x230   :  { %v913_v45 = vadd.f32 %v9468_v35, %v893_v36  ;;  %v924_v27 = vmax.f32 %v908_v21, 0.0  ;;  %1265 = vmatpush.bf16.msra.mxu0 %v8710_v16  ;;  %v8690_v21 = vld [vmem:[#allocation9 + $0x10] sm:$0xff] }
 0x231   :  { %v916_v40 = vmax.f32 %v900_v53, 0.0  ;;  %v8726_v16 = vld [vmem:[#allocation9 + $0xb0] sm:$0xff] }
 0x232   :  { %v929_v6 = vmax.f32 %v913_v45, 0.0  ;;  %v936_v30 = vpack.c.bf16 %v925_v23, %v924_v27  ;;  %v8683_v45 = vld [vmem:[#allocation4 + $0x18] sm:$0xff]  ;;  %v8688_v23 = vld [vmem:[#allocation9] sm:$0xff] }
 0x234   :  { %v938_v8 = vpack.c.bf16 %v929_v6, %v928_v3  ;;  %v8694_v6 = vld [vmem:[#allocation9 + $0x30] sm:$0xff]  ;;  %v8692_v3 = vld [vmem:[#allocation9 + $0x20] sm:$0xff] }
 0x235   :  { %v875_v24 = vpop.f32.mrf.mxu1 }
 0x236   :  { %v894_v32 = vadd.f32 %v875_v24, %v640_v25  ;;  %v937_v24 = vpack.c.bf16 %v927_v59, %v926_v22  ;;  %v906_v25 = vadd.f32 %v9468_v35, %v9466_v57  ;;  %v921_v57 = vmax.f32 %v905_v20, 0.0  ;;  %v8686_v59 = vld [vmem:[#allocation4 + $0x30] sm:$0xff] }
 0x237   :  { %v8705_v22 = vld [vmem:[#allocation9 + $0x48] sm:$0xff] }
 0x238   :  { %v914_v41 = vadd.f32 %v9468_v35, %v894_v32  ;;  %v922_v32 = vmax.f32 %v906_v25, 0.0  ;;  %v8712_v25 = vld [vmem:[#allocation4 + $0x80] sm:$0xff] }
 0x23a   :  { %v930_v11 = vmax.f32 %v914_v41, 0.0  ;;  %v935_v33 = vpack.c.bf16 %v923_v2, %v922_v32  ;;  %v932_v41 = vpack.c.bf16 %v917_v47, %v916_v40 }
 0x23d   :  { %v877_v38 = vpop.f32.mrf.mxu1 }
 0x23e   :  { %v895_v42 = vadd.f32 %v877_v38, %v642_v34  ;;  %v920_v34 = vmax.f32 %v904_v31, 0.0  ;;  %v918_v38 = vmax.f32 %v902_v51, 0.0  ;;  %v8713_v31 = vld [vmem:[#allocation4 + $0x88] sm:$0xff] }
 0x240   :  { %v915_v49 = vadd.f32 %v9468_v35, %v895_v42  ;;  %v934_v36 = vpack.c.bf16 %v921_v57, %v920_v34  ;;  %v933_v39 = vpack.c.bf16 %v919_v1, %v918_v38  ;;  %v8696_v42 = vld [vmem:[#allocation4 + $0x40] sm:$0xff]  ;;  %v8697_v35 = vld [vmem:[#allocation4 + $0x48] sm:$0xff]  ;;  %v8714_v34 = vld [vmem:[#allocation4 + $0x90] sm:$0xff] }
 0x242   :  { %v931_v13 = vmax.f32 %v915_v49, 0.0  ;;  %v8699_v49 = vld [vmem:[#allocation4 + $0x58] sm:$0xff] }
 0x244   :  { %v939_v7 = vpack.c.bf16 %v931_v13, %v930_v11  ;;  %v8695_v11 = vld [vmem:[#allocation9 + $0x38] sm:$0xff]  ;;  %v8685_v13 = vld [vmem:[#allocation4 + $0x28] sm:$0xff] }
 0x245   :  { %1361 = vmatpush.bf16.msra.mxu1 %v8695_v11  ;;  %v8717_v11 = vld [vmem:[#allocation4 + $0xa8] sm:$0xff] }
 0x246   :  { %1004 = vmatpush.bf16.msrb.mxu2 %v939_v7  ;;  %1142 = vmatpush.bf16.msrb.mxu3 %v939_v7 }
 0x249   :  { %1362 = vmatpush.bf16.msra.mxu1 %v8694_v6  ;;  %v8734_v6 = vld [vmem:[%s10425_s7 + $0x30] sm:$0xff] }
 0x24a   :  { %1005 = vmatpush.bf16.msrb.mxu2 %v938_v8  ;;  %1143 = vmatpush.bf16.msrb.mxu3 %v938_v8 }
 0x24d   :  { %1363 = vmatpush.bf16.msra.mxu1 %v8693_v17 }
 0x24e   :  { %1006 = vmatpush.bf16.msrb.mxu2 %v937_v24  ;;  %1144 = vmatpush.bf16.msrb.mxu3 %v937_v24 }
 0x251   :  { %1364 = vmatpush.bf16.msra.mxu1 %v8692_v3  ;;  %v8733_v3 = vld [vmem:[%s10425_s7 + $0x28] sm:$0xff] }
 0x252   :  { %1007 = vmatpush.bf16.msrb.mxu2 %v936_v30  ;;  %1145 = vmatpush.bf16.msrb.mxu3 %v936_v30 }
 0x255   :  { %1365 = vmatpush.bf16.msra.mxu1 %v8691_v58  ;;  %v8732_v58 = vld [vmem:[%s10425_s7 + $0x20] sm:$0xff] }
 0x256   :  { %1008 = vmatpush.bf16.msrb.mxu2 %v935_v33  ;;  %1146 = vmatpush.bf16.msrb.mxu3 %v935_v33 }
 0x259   :  { %1366 = vmatpush.bf16.msra.mxu1 %v8690_v21 }
 0x25a   :  { %1009 = vmatpush.bf16.msrb.mxu2 %v934_v36  ;;  %1147 = vmatpush.bf16.msrb.mxu3 %v934_v36 }
 0x25d   :  { %1367 = vmatpush.bf16.msra.mxu1 %v8689_v28  ;;  %v8723_v28 = vld [vmem:[#allocation9 + $0x98] sm:$0xff] }
 0x25e   :  { %1010 = vmatpush.bf16.msrb.mxu2 %v933_v39  ;;  %1148 = vmatpush.bf16.msrb.mxu3 %v933_v39 }
 0x261   :  { %1368 = vmatpush.bf16.msra.mxu1 %v8688_v23  ;;  %v8722_v23 = vld [vmem:[#allocation9 + $0x90] sm:$0xff] }
 0x262   :  { %1011 = vmatpush.bf16.msrb.mxu2 %v932_v41  ;;  %1149 = vmatpush.bf16.msrb.mxu3 %v932_v41 }
 0x265   :  { %1012 = vmatmul.bf16.vlgmr.msrb.gmra.mxu2 %v8680_v50  ;;  %1150 = vmatmul.bf16.vlgmr.msrb.gmra.mxu3 %v8696_v42 }
 0x266   :  { %1475 = vmatpush.bf16.msra.mxu2 %v939_v7  ;;  %v8709_v7 = vld [vmem:[#allocation9 + $0x68] sm:$0xff] }
 0x267   :  { %1266 = vmatpush.bf16.msra.mxu0 %v8709_v7 }
 0x26a   :  { %1476 = vmatpush.bf16.msra.mxu2 %v938_v8  ;;  %v8702_v8 = vld [vmem:[#allocation4 + $0x70] sm:$0xff] }
 0x26b   :  { %1267 = vmatpush.bf16.msra.mxu0 %v8708_v63  ;;  %v8725_v63 = vld [vmem:[#allocation9 + $0xa8] sm:$0xff] }
 0x26e   :  { %1477 = vmatpush.bf16.msra.mxu2 %v937_v24  ;;  %v8687_v24 = vld [vmem:[#allocation4 + $0x38] sm:$0xff] }
 0x26f   :  { %1268 = vmatpush.bf16.msra.mxu0 %v8707_v14  ;;  %v8724_v14 = vld [vmem:[#allocation9 + $0xa0] sm:$0xff] }
 0x272   :  { %1478 = vmatpush.bf16.msra.mxu2 %v936_v30 }
 0x273   :  { %1269 = vmatpush.bf16.msra.mxu0 %v8706_v4 }
 0x275   :  { %1017 = vmatmul.bf16.gmra.mxu2 %v8681_v46  ;;  %1155 = vmatmul.bf16.gmra.mxu3 %v8697_v35 }
 0x276   :  { %1479 = vmatpush.bf16.msra.mxu2 %v935_v33 }
 0x277   :  { %1270 = vmatpush.bf16.msra.mxu0 %v8705_v22  ;;  %v8718_v22 = vld [vmem:[#allocation4 + $0xb0] sm:$0xff] }
 0x27a   :  { %1480 = vmatpush.bf16.msra.mxu2 %v934_v36 }
 0x27b   :  { %1271 = vmatpush.bf16.msra.mxu0 %v8704_v29  ;;  %v8731_v29 = vld [vmem:[%s10425_s7 + $0x18] sm:$0xff] }
 0x27e   :  { %1481 = vmatpush.bf16.msra.mxu2 %v933_v39  ;;  %v8715_v39 = vld [vmem:[#allocation4 + $0x98] sm:$0xff] }
 0x282   :  { %1482 = vmatpush.bf16.msra.mxu2 %v932_v41 }
 0x285   :  { %1022 = vmatmul.bf16.gmra.mxu2 %v8682_v43  ;;  %1160 = vmatmul.bf16.gmra.mxu3 %v8698_v44  ;;  %v8716_v43 = vld [vmem:[#allocation4 + $0xa0] sm:$0xff] }
 0x295   :  { %1027 = vmatmul.bf16.gmra.mxu2 %v8683_v45  ;;  %1165 = vmatmul.bf16.gmra.mxu3 %v8699_v49 }
 0x2a5   :  { %1032 = vmatmul.bf16.gmra.mxu2 %v8684_v52  ;;  %1170 = vmatmul.bf16.gmra.mxu3 %v8700_v56 }
 0x2b5   :  { %1037 = vmatmul.bf16.gmra.mxu2 %v8685_v13  ;;  %1175 = vmatmul.bf16.gmra.mxu3 %v8701_v15  ;;  %v8727_v13 = vld [vmem:[#allocation9 + $0xb8] sm:$0xff] }
 0x2b6   :  { %v8735_v15 = vld [vmem:[%s10425_s7 + $0x38] sm:$0xff]  ;;  %1597 = vmatpush.bf16.msra.mxu3 %v8727_v13 }
 0x2b7   :  { %1750 = vmatpush.bf16.msrb.mxu0 %v8735_v15 }
 0x2ba   :  { %1598 = vmatpush.bf16.msra.mxu3 %v8726_v16 }
 0x2bb   :  { %1751 = vmatpush.bf16.msrb.mxu0 %v8734_v6 }
 0x2be   :  { %1599 = vmatpush.bf16.msra.mxu3 %v8725_v63 }
 0x2bf   :  { %1752 = vmatpush.bf16.msrb.mxu0 %v8733_v3 }
 0x2c2   :  { %1600 = vmatpush.bf16.msra.mxu3 %v8724_v14 }
 0x2c3   :  { %1753 = vmatpush.bf16.msrb.mxu0 %v8732_v58 }
 0x2c5   :  { %1042 = vmatmul.bf16.gmra.mxu2 %v8686_v59  ;;  %1180 = vmatmul.bf16.gmra.mxu3 %v8702_v8 }
 0x2c6   :  { %1601 = vmatpush.bf16.msra.mxu3 %v8723_v28 }
 0x2c7   :  { %1754 = vmatpush.bf16.msrb.mxu0 %v8731_v29 }
 0x2ca   :  { %1602 = vmatpush.bf16.msra.mxu3 %v8722_v23 }
 0x2d5   :  { %1047 = vmatmul.bf16.gmra.mxu2 %v8687_v24  ;;  %1185 = vmatmul.bf16.gmra.mxu3 %v8703_v60  ;;  %v8730_v24 = vld [vmem:[%s10425_s7 + $0x10] sm:$0xff] }
 0x2d6   :  { %1755 = vmatpush.bf16.msrb.mxu0 %v8730_v24 }
 0x2e5   :  { %1483 = vmatmul.bf16.vlgmr.msra.gmra.mxu2 %v8712_v25 }
 0x2e8   :  { %v1013_v27 = vpop.f32.mrf.mxu2  ;;  %v1151_v18 = vpop.f32.mrf.mxu3 }
 0x2f0   :  { %v1015_v20 = vpop.f32.mrf.mxu2  ;;  %v1153_v2 = vpop.f32.mrf.mxu3 }
 0x2f1   :  { %v1053_v30 = vpack.c.bf16 %v1015_v20, %v1013_v27  ;;  %v1191_v54 = vpack.c.bf16 %v1153_v2, %v1151_v18  ;;  %v8721_v27 = vld [vmem:[#allocation9 + $0x88] sm:$0xff]  ;;  %v8720_v20 = vld [vmem:[#allocation9 + $0x80] sm:$0xff] }
 0x2f2   :  { %v8729_v18 = vld [vmem:[%s10425_s7 + $0x8] sm:$0xff]  ;;  %1603 = vmatpush.bf16.msra.mxu3 %v8721_v27  ;;  %v8728_v2 = vld [vmem:[%s10425_s7] sm:$0xff] }
 0x2f3   :  { %1272 = vmatmul.bf16.vlgmr.msra.gmra.mxu0 %v1191_v54  ;;  %1369 = vmatmul.bf16.vlgmr.msra.gmra.mxu1 %v1053_v30 }
 0x2f4   :  { %1756 = vmatpush.bf16.msrb.mxu0 %v8729_v18 }
 0x2f5   :  { %1488 = vmatmul.bf16.gmra.mxu2 %v8713_v31 }
 0x2f6   :  { %1604 = vmatpush.bf16.msra.mxu3 %v8720_v20 }
 0x2f8   :  { %v1018_v32 = vpop.f32.mrf.mxu2  ;;  %v1156_v9 = vpop.f32.mrf.mxu3  ;;  %1757 = vmatpush.bf16.msrb.mxu0 %v8728_v2 }
 0x300   :  { %v1020_v10 = vpop.f32.mrf.mxu2  ;;  %v1158_v57 = vpop.f32.mrf.mxu3 }
 0x301   :  { %v1054_v33 = vpack.c.bf16 %v1020_v10, %v1018_v32  ;;  %v1192_v51 = vpack.c.bf16 %v1158_v57, %v1156_v9  ;;  %v8719_v9 = vld [vmem:[#allocation4 + $0xb8] sm:$0xff] }
 0x303   :  { %1277 = vmatmul.bf16.gmra.mxu0 %v1192_v51  ;;  %1374 = vmatmul.bf16.gmra.mxu1 %v1054_v33 }
 0x305   :  { %1493 = vmatmul.bf16.gmra.mxu2 %v8714_v34 }
 0x308   :  { %v1023_v0 = vpop.f32.mrf.mxu2  ;;  %v1161_v1 = vpop.f32.mrf.mxu3 }
 0x310   :  { %v1025_v36 = vpop.f32.mrf.mxu2  ;;  %v1163_v53 = vpop.f32.mrf.mxu3 }
 0x311   :  { %v1055_v38 = vpack.c.bf16 %v1025_v36, %v1023_v0  ;;  %v1193_v47 = vpack.c.bf16 %v1163_v53, %v1161_v1 }
 0x313   :  { %1282 = vmatmul.bf16.gmra.mxu0 %v1193_v47  ;;  %1379 = vmatmul.bf16.gmra.mxu1 %v1055_v38 }
 0x315   :  { %1498 = vmatmul.bf16.gmra.mxu2 %v8715_v39 }
 0x318   :  { %v1028_v40 = vpop.f32.mrf.mxu2  ;;  %v1166_v41 = vpop.f32.mrf.mxu3 }
 0x320   :  { %v1030_v50 = vpop.f32.mrf.mxu2  ;;  %v1168_v42 = vpop.f32.mrf.mxu3 }
 0x321   :  { %v1056_v46 = vpack.c.bf16 %v1030_v50, %v1028_v40  ;;  %v1194_v35 = vpack.c.bf16 %v1168_v42, %v1166_v41 }
 0x323   :  { %1287 = vmatmul.bf16.gmra.mxu0 %v1194_v35  ;;  %1384 = vmatmul.bf16.gmra.mxu1 %v1056_v46 }
 0x325   :  { %1503 = vmatmul.bf16.gmra.mxu2 %v8716_v43 }
 0x328   :  { %v1033_v44 = vpop.f32.mrf.mxu2  ;;  %v1171_v45 = vpop.f32.mrf.mxu3 }
 0x330   :  { %v1035_v49 = vpop.f32.mrf.mxu2  ;;  %v1173_v52 = vpop.f32.mrf.mxu3 }
 0x331   :  { %v1057_v56 = vpack.c.bf16 %v1035_v49, %v1033_v44  ;;  %v1195_v61 = vpack.c.bf16 %v1173_v52, %v1171_v45 }
 0x333   :  { %1292 = vmatmul.bf16.gmra.mxu0 %v1195_v61  ;;  %1389 = vmatmul.bf16.gmra.mxu1 %v1057_v56 }
 0x335   :  { %1508 = vmatmul.bf16.gmra.mxu2 %v8717_v11 }
 0x338   :  { %v1038_v7 = vpop.f32.mrf.mxu2  ;;  %v1176_v17 = vpop.f32.mrf.mxu3 }
 0x340   :  { %v1040_v59 = vpop.f32.mrf.mxu2  ;;  %v1178_v8 = vpop.f32.mrf.mxu3 }
 0x341   :  { %v1058_v4 = vpack.c.bf16 %v1040_v59, %v1038_v7  ;;  %v1196_v21 = vpack.c.bf16 %v1178_v8, %v1176_v17 }
 0x343   :  { %1297 = vmatmul.bf16.gmra.mxu0 %v1196_v21  ;;  %1394 = vmatmul.bf16.gmra.mxu1 %v1058_v4 }
 0x345   :  { %1513 = vmatmul.bf16.gmra.mxu2 %v8718_v22 }
 0x348   :  { %v1043_v60 = vpop.f32.mrf.mxu2  ;;  %v1181_v25 = vpop.f32.mrf.mxu3 }
 0x350   :  { %v1045_v30 = vpop.f32.mrf.mxu2  ;;  %v1183_v54 = vpop.f32.mrf.mxu3 }
 0x351   :  { %v1059_v31 = vpack.c.bf16 %v1045_v30, %v1043_v60  ;;  %v1197_v32 = vpack.c.bf16 %v1183_v54, %v1181_v25 }
 0x353   :  { %1302 = vmatmul.bf16.gmra.mxu0 %v1197_v32  ;;  %1399 = vmatmul.bf16.gmra.mxu1 %v1059_v31 }
 0x355   :  { %1518 = vmatmul.bf16.gmra.mxu2 %v8719_v9  ;;  %v9573_v9 = vld [vmem:[#allocation12] ss:$0 sm:$0xff] }
 0x358   :  { %v1048_v10 = vpop.f32.mrf.mxu2  ;;  %v1186_v57 = vpop.f32.mrf.mxu3 }
 0x360   :  { %v1050_v33 = vpop.f32.mrf.mxu2  ;;  %v1188_v51 = vpop.f32.mrf.mxu3 }
 0x361   :  { %v1060_v34 = vpack.c.bf16 %v1050_v33, %v1048_v10  ;;  %v1198_v0 = vpack.c.bf16 %v1188_v51, %v1186_v57  ;;  %v9575_v10 = vld [vmem:[#allocation10] ss:$0 sm:$0xff] }
 0x363   :  { %1307 = vmatmul.bf16.gmra.mxu0 %v1198_v0  ;;  %1404 = vmatmul.bf16.gmra.mxu1 %v1060_v34 }
 0x368   :  { %v1484_v1 = vpop.f32.mrf.mxu2 }
 0x370   :  { %v1273_v36 = vpop.f32.mrf.mxu0  ;;  %v1370_v53 = vpop.f32.mrf.mxu1 }
 0x371   :  { %v9525_v38 = vadd.f32 %v1370_v53, %v1273_v36  ;;  %v1486_v47 = vpop.f32.mrf.mxu2 }
 0x372   :  { %v1524_v39 = vpack.c.bf16 %v1486_v47, %v1484_v1 }
 0x373   :  { %1758 = vmatmul.bf16.vlgmr.msrb.gmra.mxu0 %v9414_v62 }
 0x374   :  { %1605 = vmatmul.bf16.vlgmr.msra.gmra.mxu3 %v1524_v39 }
 0x378   :  { %v9528_v40 = vpop.f32.mrf.mxu0  ;;  %v9530_v41 = vpop.f32.mrf.mxu1 }
 0x379   :  { %v1489_v50 = vpop.f32.mrf.mxu2 }
 0x380   :  { %v1278_v42 = vpop.f32.mrf.mxu0  ;;  %v1375_v46 = vpop.f32.mrf.mxu1 }
 0x381   :  { %v9532_v35 = vadd.f32 %v1375_v46, %v1278_v42  ;;  %v1491_v43 = vpop.f32.mrf.mxu2 }
 0x382   :  { %v1525_v44 = vpack.c.bf16 %v1491_v43, %v1489_v50 }
 0x383   :  { %1763 = vmatmul.bf16.gmra.mxu0 %v9417_v5 }
 0x384   :  { %1610 = vmatmul.bf16.gmra.mxu3 %v1525_v44 }
 0x388   :  { %v9535_v45 = vpop.f32.mrf.mxu0  ;;  %v9537_v49 = vpop.f32.mrf.mxu1 }
 0x389   :  { %v1494_v62 = vpop.f32.mrf.mxu2 }
 0x390   :  { %v1283_v52 = vpop.f32.mrf.mxu0  ;;  %v1380_v56 = vpop.f32.mrf.mxu1 }
 0x391   :  { %v9539_v61 = vadd.f32 %v1380_v56, %v1283_v52  ;;  %v1496_v11 = vpop.f32.mrf.mxu2  ;;  %v1378_v56 = vadd.f32 %v9537_v49, %v9535_v45 }
 0x392   :  { %v1526_v13 = vpack.c.bf16 %v1496_v11, %v1494_v62 }
 0x393   :  { %1768 = vmatmul.bf16.gmra.mxu0 %v9420_v12 }
 0x394   :  { %1615 = vmatmul.bf16.gmra.mxu3 %v1526_v13 }
 0x398   :  { %v9542_v15 = vpop.f32.mrf.mxu0  ;;  %v9544_v16 = vpop.f32.mrf.mxu1 }
 0x399   :  { %v1499_v5 = vpop.f32.mrf.mxu2 }
 0x3a0   :  { %v1288_v6 = vpop.f32.mrf.mxu0  ;;  %v1385_v7 = vpop.f32.mrf.mxu1 }
 0x3a1   :  { %v9546_v17 = vadd.f32 %v1385_v7, %v1288_v6  ;;  %v1501_v63 = vpop.f32.mrf.mxu2 }
 0x3a2   :  { %v1527_v3 = vpack.c.bf16 %v1501_v63, %v1499_v5 }
 0x3a3   :  { %1773 = vmatmul.bf16.gmra.mxu0 %v9423_v19 }
 0x3a4   :  { %1620 = vmatmul.bf16.gmra.mxu3 %v1527_v3 }
 0x3a8   :  { %v9549_v14 = vpop.f32.mrf.mxu0  ;;  %v9551_v58 = vpop.f32.mrf.mxu1 }
 0x3a9   :  { %v1504_v12 = vpop.f32.mrf.mxu2 }
 0x3b0   :  { %v1293_v59 = vpop.f32.mrf.mxu0  ;;  %v1390_v8 = vpop.f32.mrf.mxu1 }
 0x3b1   :  { %v9553_v4 = vadd.f32 %v1390_v8, %v1293_v59  ;;  %v1506_v21 = vpop.f32.mrf.mxu2 }
 0x3b2   :  { %v1528_v22 = vpack.c.bf16 %v1506_v21, %v1504_v12 }
 0x3b3   :  { %1778 = vmatmul.bf16.gmra.mxu0 %v9426_v26 }
 0x3b4   :  { %1625 = vmatmul.bf16.gmra.mxu3 %v1528_v22 }
 0x3b8   :  { %v9556_v28 = vpop.f32.mrf.mxu0 }
 0x3b9   :  { %v1509_v29 = vpop.f32.mrf.mxu2 }
 0x3c0   :  { %v9558_v23 = vpop.f32.mrf.mxu0 }
 0x3c1   :  { %v1511_v19 = vpop.f32.mrf.mxu2 }
 0x3c2   :  { %v1529_v24 = vpack.c.bf16 %v1511_v19, %v1509_v29  ;;  %v1383_v29 = vadd.f32 %v9544_v16, %v9542_v15 }
 0x3c3   :  { %1783 = vmatmul.bf16.gmra.mxu0 %v9429_v37 }
 0x3c4   :  { %1630 = vmatmul.bf16.gmra.mxu3 %v1529_v24 }
 0x3c8   :  { %v9561_v60 = vpop.f32.mrf.mxu0 }
 0x3c9   :  { %v1514_v25 = vpop.f32.mrf.mxu2 }
 0x3d0   :  { %v9563_v27 = vpop.f32.mrf.mxu0 }
 0x3d1   :  { %v1516_v18 = vpop.f32.mrf.mxu2 }
 0x3d2   :  { %v1530_v20 = vpack.c.bf16 %v1516_v18, %v1514_v25 }
 0x3d3   :  { %1788 = vmatmul.bf16.gmra.mxu0 %v9432_v48 }
 0x3d4   :  { %1635 = vmatmul.bf16.gmra.mxu3 %v1530_v20 }
 0x3d8   :  { %v9566_v26 = vpop.f32.mrf.mxu0 }
 0x3d9   :  { %v1519_v2 = vpop.f32.mrf.mxu2 }
 0x3e0   :  { %v9568_v30 = vpop.f32.mrf.mxu0 }
 0x3e1   :  { %v1521_v54 = vpop.f32.mrf.mxu2 }
 0x3e2   :  { %v1531_v31 = vpack.c.bf16 %v1521_v54, %v1519_v2 }
 0x3e3   :  { %1793 = vmatmul.bf16.gmra.mxu0 %v9435_v55  ;;  %v1373_v55 = vadd.f32 %v9530_v41, %v9528_v40 }
 0x3e4   :  { %1640 = vmatmul.bf16.gmra.mxu3 %v1531_v31 }
 0x3e8   :  { %v9571_v37 = vpop.f32.mrf.mxu0 }
 0x3f0   :  { %v1759_v32 = vpop.f32.mrf.mxu0 }
 0x3f1   :  { %v1760_v51 = vadd.f32 %v9573_v9, %v1759_v32 }
 0x3f7   :  { %v1606_v57 = vpop.f32.mrf.mxu3 }
 0x3f8   :  { %v1646_v48 = vadd.f32 %v1606_v57, %v9525_v38  ;;  %v1761_v33 = vpop.f32.mrf.mxu0 }
 0x3f9   :  { %v1762_v47 = vadd.f32 %v9573_v9, %v1761_v33 }
 0x3fa   :  { %v1666_v34 = vadd.f32 %v9575_v10, %v1646_v48 }
 0x3fc   :  { %v1799_v0 = vadd.f32 %v1760_v51, %v1666_v34  ;;  %v1388_v51 = vadd.f32 %v9551_v58, %v9549_v14  ;;  %v1392_v34 = vpop.f32.mrf.mxu1 }
 0x3fe   :  { %v1815_v42 = vmax.f32 %v1799_v0, 0.0 }
 0x3ff   :  { %v1608_v1 = vpop.f32.mrf.mxu3 }
 0x400   :  { %v1647_v36 = vadd.f32 %v1608_v1, %v1373_v55  ;;  %v1764_v53 = vpop.f32.mrf.mxu0 }
 0x401   :  { %v1765_v52 = vadd.f32 %v9573_v9, %v1764_v53 }
 0x402   :  { %v1667_v39 = vadd.f32 %v9575_v10, %v1647_v36 }
 0x404   :  { %v1800_v50 = vadd.f32 %v1762_v47, %v1667_v39 }
 0x406   :  { %v1816_v46 = vmax.f32 %v1800_v50, 0.0 }
 0x407   :  { %v1611_v38 = vpop.f32.mrf.mxu3 }
 0x408   :  { %v1648_v43 = vadd.f32 %v1611_v38, %v9532_v35  ;;  %v1766_v44 = vpop.f32.mrf.mxu0  ;;  %v9585_v62 = vpack.c.bf16 %v1816_v46, %v1815_v42 }
 0x409   :  { %v1767_v6 = vadd.f32 %v9573_v9, %v1766_v44 }
 0x40a   :  { %v1668_v40 = vadd.f32 %v9575_v10, %v1648_v43  ;;  %v1395_v43 = vpop.f32.mrf.mxu1 }
 0x40c   :  { %v1801_v41 = vadd.f32 %v1765_v52, %v1668_v40 }
 0x40e   :  { %v1817_v35 = vmax.f32 %v1801_v41, 0.0 }
 0x40f   :  { %v1613_v11 = vpop.f32.mrf.mxu3 }
 0x410   :  { %v1649_v13 = vadd.f32 %v1613_v11, %v1378_v56  ;;  %v1769_v5 = vpop.f32.mrf.mxu0 }
 0x411   :  { %v1770_v22 = vadd.f32 %v9573_v9, %v1769_v5 }
 0x412   :  { %v1669_v7 = vadd.f32 %v9575_v10, %v1649_v13  ;;  %v1397_v41 = vpop.f32.mrf.mxu1 }
 0x414   :  { %v1802_v63 = vadd.f32 %v1767_v6, %v1669_v7 }
 0x416   :  { %v1818_v3 = vmax.f32 %v1802_v63, 0.0 }
 0x417   :  { %v1616_v12 = vpop.f32.mrf.mxu3 }
 0x418   :  { %v1650_v59 = vadd.f32 %v1616_v12, %v9539_v61  ;;  %v1771_v8 = vpop.f32.mrf.mxu0  ;;  %v9594_v21 = vpack.c.bf16 %v1818_v3, %v1817_v35 }
 0x419   :  { %v1772_v18 = vadd.f32 %v9573_v9, %v1771_v8 }
 0x41a   :  { %v1670_v45 = vadd.f32 %v9575_v10, %v1650_v59  ;;  %v1400_v13 = vpop.f32.mrf.mxu1 }
 0x41c   :  { %v1803_v49 = vadd.f32 %v1770_v22, %v1670_v45 }
 0x41e   :  { %v1819_v61 = vmax.f32 %v1803_v49, 0.0 }
 0x41f   :  { %v1618_v19 = vpop.f32.mrf.mxu3 }
 0x420   :  { %v1651_v24 = vadd.f32 %v1618_v19, %v1383_v29  ;;  %v1774_v25 = vpop.f32.mrf.mxu0  ;;  %v1401_v29 = vadd.f32 %v1400_v13, %v9563_v27  ;;  %v1393_v27 = vadd.f32 %v1392_v34, %v9556_v28 }
 0x421   :  { %v1775_v33 = vadd.f32 %v9573_v9, %v1774_v25 }
 0x422   :  { %v1671_v20 = vadd.f32 %v9575_v10, %v1651_v24  ;;  %v1402_v7 = vpop.f32.mrf.mxu1  ;;  %v1398_v24 = vadd.f32 %v1397_v41, %v9561_v60 }
 0x423   :  { %v1403_v22 = vadd.f32 %v1402_v7, %v9566_v26  ;;  %v8753_v7 = vld [vmem:[#allocation2 + $0xc8] sm:$0xff] }
 0x424   :  { %v1804_v2 = vadd.f32 %v1772_v18, %v1671_v20 }
 0x426   :  { %v1820_v54 = vmax.f32 %v1804_v2, 0.0  ;;  %v1396_v2 = vadd.f32 %v1395_v43, %v9558_v23 }
 0x427   :  { %v1621_v31 = vpop.f32.mrf.mxu3 }
 0x428   :  { %v1652_v32 = vadd.f32 %v1621_v31, %v9546_v17  ;;  %v1776_v57 = vpop.f32.mrf.mxu0  ;;  %v9603_v48 = vpack.c.bf16 %v1820_v54, %v1819_v61 }
 0x429   :  { %v1777_v36 = vadd.f32 %v9573_v9, %v1776_v57 }
 0x42a   :  { %v1672_v15 = vadd.f32 %v9575_v10, %v1652_v32  ;;  %v1405_v3 = vpop.f32.mrf.mxu1 }
 0x42b   :  { %v1406_v8 = vadd.f32 %v1405_v3, %v9568_v30  ;;  %v8755_v3 = vld [vmem:[#allocation2 + $0xd8] sm:$0xff] }
 0x42c   :  { %v1805_v16 = vadd.f32 %v1775_v33, %v1672_v15 }
 0x42e   :  { %v1821_v47 = vmax.f32 %v1805_v16, 0.0 }
 0x42f   :  { %v1623_v0 = vpop.f32.mrf.mxu3 }
 0x430   :  { %v1653_v55 = vadd.f32 %v1623_v0, %v1388_v51  ;;  %v1779_v1 = vpop.f32.mrf.mxu0 }
 0x431   :  { %v1780_v14 = vadd.f32 %v9573_v9, %v1779_v1 }
 0x432   :  { %v1673_v53 = vadd.f32 %v9575_v10, %v1653_v55  ;;  %v1407_v49 = vpop.f32.mrf.mxu1 }
 0x433   :  { %v1408_v25 = vadd.f32 %v1407_v49, %v9571_v37  ;;  %v8748_v49 = vld [vmem:[#allocation6 + $0x120] sm:$0xff] }
 0x434   :  { %v1806_v17 = vadd.f32 %v1777_v36, %v1673_v53 }
 0x436   :  { %v1822_v39 = vmax.f32 %v1806_v17, 0.0 }
 0x437   :  { %v1626_v50 = vpop.f32.mrf.mxu3 }
 0x438   :  { %v1654_v42 = vadd.f32 %v1626_v50, %v9553_v4  ;;  %v1781_v46 = vpop.f32.mrf.mxu0  ;;  %v9612_v38 = vpack.c.bf16 %v1822_v39, %v1821_v47 }
 0x43a   :  { %v1674_v58 = vadd.f32 %v9575_v10, %v1654_v42 }
 0x43c   :  { %v9616_v44 = vadd.f32 %v1780_v14, %v1674_v58  ;;  %v1782_v14 = vadd.f32 %v9573_v9, %v1781_v46  ;;  %v8752_v46 = vld [vmem:[#allocation2 + $0xc0] sm:$0xff] }
 0x43f   :  { %v1628_v52 = vpop.f32.mrf.mxu3 }
 0x440   :  { %v1784_v40 = vpop.f32.mrf.mxu0  ;;  %v1655_v16 = vadd.f32 %v1628_v52, %v1393_v27  ;;  %v8759_v27 = vld [vmem:[#allocation2 + $0xf8] sm:$0xff] }
 0x441   :  { %v1785_v47 = vadd.f32 %v9573_v9, %v1784_v40  ;;  %v1823_v40 = vmax.f32 %v9616_v44, 0.0  ;;  %v8737_v44 = vld [vmem:[#allocation2 + $0x108] sm:$0xff] }
 0x442   :  { %v1675_v39 = vadd.f32 %v9575_v10, %v1655_v16 }
 0x444   :  { %v1808_v41 = vadd.f32 %v1782_v14, %v1675_v39  ;;  %v8771_v14 = vld [vmem:[#allocation2 + $0x158] sm:$0xff] }
 0x447   :  { %v1631_v56 = vpop.f32.mrf.mxu3 }
 0x448   :  { %v1786_v11 = vpop.f32.mrf.mxu0  ;;  %v1656_v57 = vadd.f32 %v1631_v56, %v1396_v2  ;;  %v8763_v2 = vld [vmem:[#allocation6 + $0xd8] sm:$0xff] }
 0x449   :  { %v1787_v36 = vadd.f32 %v9573_v9, %v1786_v11 }
 0x44a   :  { %v1676_v28 = vadd.f32 %v9575_v10, %v1656_v57  ;;  %v8768_v57 = vld [vmem:[#allocation2 + $0x140] sm:$0xff] }
 0x44c   :  { %v1809_v58 = vadd.f32 %v1785_v47, %v1676_v28 }
 0x44e   :  { %v1825_v13 = vmax.f32 %v1809_v58, 0.0 }
 0x44f   :  { %v1633_v5 = vpop.f32.mrf.mxu3 }
 0x450   :  { %v1789_v6 = vpop.f32.mrf.mxu0  ;;  %v1657_v31 = vadd.f32 %v1633_v5, %v1398_v24  ;;  %v8764_v24 = vld [vmem:[#allocation6 + $0xe0] sm:$0xff] }
 0x451   :  { %v1790_v0 = vadd.f32 %v9573_v9, %v1789_v6  ;;  %v1824_v6 = vmax.f32 %v1808_v41, 0.0 }
 0x452   :  { %v1677_v51 = vadd.f32 %v9575_v10, %v1657_v31  ;;  %v8744_v31 = vld [vmem:[#allocation6 + $0x100] sm:$0xff] }
 0x454   :  { %v1810_v50 = vadd.f32 %v1787_v36, %v1677_v51  ;;  %v8769_v51 = vld [vmem:[#allocation2 + $0x148] sm:$0xff] }
 0x456   :  { %v1826_v11 = vmax.f32 %v1810_v50, 0.0 }
 0x457   :  { %v1636_v4 = vpop.f32.mrf.mxu3 }
 0x458   :  { %v1791_v63 = vpop.f32.mrf.mxu0  ;;  %v1658_v18 = vadd.f32 %v1636_v4, %v1401_v29  ;;  %v1836_v5 = vpack.c.bf16 %v1826_v11, %v1825_v13  ;;  %v8738_v4 = vld [vmem:[#allocation2 + $0x110] sm:$0xff]  ;;  %v8765_v29 = vld [vmem:[#allocation6 + $0xe8] sm:$0xff] }
 0x459   :  { %v1792_v60 = vadd.f32 %v9573_v9, %v1791_v63  ;;  %v8754_v63 = vld [vmem:[#allocation2 + $0xd0] sm:$0xff] }
 0x45a   :  { %v1678_v37 = vadd.f32 %v9575_v10, %v1658_v18  ;;  %v8742_v18 = vld [vmem:[#allocation2 + $0x130] sm:$0xff] }
 0x45c   :  { %v1811_v34 = vadd.f32 %v1790_v0, %v1678_v37 }
 0x45e   :  { %v1827_v52 = vmax.f32 %v1811_v34, 0.0 }
 0x45f   :  { %v1638_v35 = vpop.f32.mrf.mxu3 }
 0x460   :  { %v1794_v12 = vpop.f32.mrf.mxu0  ;;  %v1659_v19 = vadd.f32 %v1638_v35, %v1403_v22  ;;  %v8739_v35 = vld [vmem:[#allocation2 + $0x118] sm:$0xff]  ;;  %v8749_v22 = vld [vmem:[#allocation6 + $0x128] sm:$0xff] }
 0x461   :  { %v1795_v26 = vadd.f32 %v9573_v9, %v1794_v12  ;;  %v8740_v12 = vld [vmem:[#allocation2 + $0x120] sm:$0xff] }
 0x462   :  { %v1679_v30 = vadd.f32 %v9575_v10, %v1659_v19  ;;  %v8747_v19 = vld [vmem:[#allocation6 + $0x118] sm:$0xff] }
 0x464   :  { %v1812_v55 = vadd.f32 %v1792_v60, %v1679_v30  ;;  %v8761_v30 = vld [vmem:[#allocation6 + $0xc8] sm:$0xff] }
 0x466   :  { %v1828_v43 = vmax.f32 %v1812_v55, 0.0 }
 0x467   :  { %v1641_v59 = vpop.f32.mrf.mxu3 }
 0x468   :  { %v1660_v45 = vadd.f32 %v1641_v59, %v1406_v8  ;;  %v1796_v61 = vpop.f32.mrf.mxu0  ;;  %v1837_v56 = vpack.c.bf16 %v1828_v43, %v1827_v52  ;;  %v8756_v59 = vld [vmem:[#allocation2 + $0xe0] sm:$0xff]  ;;  %v8767_v8 = vld [vmem:[#allocation6 + $0xf8] sm:$0xff] }
 0x469   :  { %v1797_v15 = vadd.f32 %v9573_v9, %v1796_v61  ;;  %v8736_v9 = vld [vmem:[#allocation2 + $0x100] sm:$0xff]  ;;  %2165 = vmatpush.bf16.msrb.mxu3 %v8767_v8  ;;  %v8745_v61 = vld [vmem:[#allocation6 + $0x108] sm:$0xff] }
 0x46a   :  { %v1680_v20 = vadd.f32 %v9575_v10, %v1660_v45  ;;  %v8766_v45 = vld [vmem:[#allocation6 + $0xf0] sm:$0xff] }
 0x46c   :  { %v1813_v33 = vadd.f32 %v1795_v26, %v1680_v20  ;;  %v8758_v20 = vld [vmem:[#allocation2 + $0xf0] sm:$0xff]  ;;  %v8760_v26 = vld [vmem:[#allocation6 + $0xc0] sm:$0xff] }
 0x46d   :  { %2166 = vmatpush.bf16.msrb.mxu3 %v8766_v45  ;;  %v8774_v45 = vld [vmem:[#allocation2 + $0x170] sm:$0xff] }
 0x46e   :  { %v1829_v53 = vmax.f32 %v1813_v33, 0.0 }
 0x46f   :  { %v1643_v54 = vpop.f32.mrf.mxu3 }
 0x470   :  { %v1661_v32 = vadd.f32 %v1643_v54, %v1408_v25  ;;  %v8746_v25 = vld [vmem:[#allocation6 + $0x110] sm:$0xff] }
 0x471   :  { %2167 = vmatpush.bf16.msrb.mxu3 %v8765_v29  ;;  %v8762_v54 = vld [vmem:[#allocation6 + $0xd0] sm:$0xff]  ;;  %v8777_v29 = vld [vmem:[#allocation6 + $0x148] sm:$0xff] }
 0x472   :  { %v1681_v23 = vadd.f32 %v9575_v10, %v1661_v32  ;;  %v1835_v10 = vpack.c.bf16 %v1824_v6, %v1823_v40  ;;  %v8743_v32 = vld [vmem:[#allocation2 + $0x138] sm:$0xff] }
 0x474   :  { %v1814_v1 = vadd.f32 %v1797_v15, %v1681_v23 }
 0x475   :  { %2168 = vmatpush.bf16.msrb.mxu3 %v8764_v24  ;;  %v8776_v24 = vld [vmem:[#allocation6 + $0x140] sm:$0xff] }
 0x476   :  { %v1830_v17 = vmax.f32 %v1814_v1, 0.0 }
 0x478   :  { %v1838_v42 = vpack.c.bf16 %v1830_v17, %v1829_v53  ;;  %v8770_v53 = vld [vmem:[#allocation2 + $0x150] sm:$0xff] }
 0x479   :  { %2169 = vmatpush.bf16.msrb.mxu3 %v8763_v2 }
 0x47a   :  { %1904 = vmatpush.bf16.msrb.mxu1 %v1838_v42  ;;  %2043 = vmatpush.bf16.msrb.mxu2 %v1838_v42 }
 0x47d   :  { %2170 = vmatpush.bf16.msrb.mxu3 %v8762_v54 }
 0x47e   :  { %1905 = vmatpush.bf16.msrb.mxu1 %v1837_v56  ;;  %2044 = vmatpush.bf16.msrb.mxu2 %v1837_v56 }
 0x481   :  { %2171 = vmatpush.bf16.msrb.mxu3 %v8761_v30 }
 0x482   :  { %1906 = vmatpush.bf16.msrb.mxu1 %v1836_v5  ;;  %2045 = vmatpush.bf16.msrb.mxu2 %v1836_v5 }
 0x485   :  { %2172 = vmatpush.bf16.msrb.mxu3 %v8760_v26 }
 0x486   :  { %1907 = vmatpush.bf16.msrb.mxu1 %v1835_v10  ;;  %2046 = vmatpush.bf16.msrb.mxu2 %v1835_v10 }
 0x48a   :  { %1908 = vmatpush.bf16.msrb.mxu1 %v9612_v38  ;;  %2047 = vmatpush.bf16.msrb.mxu2 %v9612_v38 }
 0x48e   :  { %1909 = vmatpush.bf16.msrb.mxu1 %v9603_v48  ;;  %2048 = vmatpush.bf16.msrb.mxu2 %v9603_v48 }
 0x492   :  { %1910 = vmatpush.bf16.msrb.mxu1 %v9594_v21  ;;  %2049 = vmatpush.bf16.msrb.mxu2 %v9594_v21 }
 0x496   :  { %1911 = vmatpush.bf16.msrb.mxu1 %v9585_v62  ;;  %2050 = vmatpush.bf16.msrb.mxu2 %v9585_v62 }
 0x499   :  { %1912 = vmatmul.bf16.vlgmr.msrb.gmra.mxu1 %v8736_v9  ;;  %2051 = vmatmul.bf16.vlgmr.msrb.gmra.mxu2 %v8752_v46  ;;  %v8783_v46 = vld [vmem:[#allocation6 + $0x178] sm:$0xff] }
 0x49a   :  { %2376 = vmatpush.bf16.msra.mxu1 %v1838_v42  ;;  %2498 = vmatpush.bf16.msra.mxu2 %v8783_v46 }
 0x49e   :  { %2377 = vmatpush.bf16.msra.mxu1 %v1837_v56 }
 0x4a2   :  { %2378 = vmatpush.bf16.msra.mxu1 %v1836_v5  ;;  %v8772_v5 = vld [vmem:[#allocation2 + $0x160] sm:$0xff] }
 0x4a6   :  { %2379 = vmatpush.bf16.msra.mxu1 %v1835_v10 }
 0x4a9   :  { %1917 = vmatmul.bf16.gmra.mxu1 %v8737_v44  ;;  %2056 = vmatmul.bf16.gmra.mxu2 %v8753_v7  ;;  %v8782_v7 = vld [vmem:[#allocation6 + $0x170] sm:$0xff] }
 0x4aa   :  { %2380 = vmatpush.bf16.msra.mxu1 %v9612_v38  ;;  %v8751_v38 = vld [vmem:[#allocation6 + $0x138] sm:$0xff]  ;;  %2499 = vmatpush.bf16.msra.mxu2 %v8782_v7 }
 0x4ab   :  { %2262 = vmatpush.bf16.msra.mxu0 %v8751_v38 }
 0x4ae   :  { %2381 = vmatpush.bf16.msra.mxu1 %v9603_v48  ;;  %v8750_v48 = vld [vmem:[#allocation6 + $0x130] sm:$0xff] }
 0x4af   :  { %2263 = vmatpush.bf16.msra.mxu0 %v8750_v48  ;;  %v8779_v48 = vld [vmem:[#allocation6 + $0x158] sm:$0xff] }
 0x4b2   :  { %2382 = vmatpush.bf16.msra.mxu1 %v9594_v21  ;;  %v8741_v21 = vld [vmem:[#allocation2 + $0x128] sm:$0xff] }
 0x4b3   :  { %2264 = vmatpush.bf16.msra.mxu0 %v8749_v22 }
 0x4b6   :  { %2383 = vmatpush.bf16.msra.mxu1 %v9585_v62  ;;  %v8757_v62 = vld [vmem:[#allocation2 + $0xe8] sm:$0xff] }
 0x4b7   :  { %2265 = vmatpush.bf16.msra.mxu0 %v8748_v49 }
 0x4b9   :  { %1922 = vmatmul.bf16.gmra.mxu1 %v8738_v4  ;;  %2061 = vmatmul.bf16.gmra.mxu2 %v8754_v63  ;;  %v8773_v63 = vld [vmem:[#allocation2 + $0x168] sm:$0xff] }
 0x4bb   :  { %2266 = vmatpush.bf16.msra.mxu0 %v8747_v19 }
 0x4bf   :  { %2267 = vmatpush.bf16.msra.mxu0 %v8746_v25 }
 0x4c3   :  { %2268 = vmatpush.bf16.msra.mxu0 %v8745_v61  ;;  %v8775_v61 = vld [vmem:[#allocation2 + $0x178] sm:$0xff] }
 0x4c7   :  { %2269 = vmatpush.bf16.msra.mxu0 %v8744_v31 }
 0x4c9   :  { %1927 = vmatmul.bf16.gmra.mxu1 %v8739_v35  ;;  %2066 = vmatmul.bf16.gmra.mxu2 %v8755_v3  ;;  %v8781_v3 = vld [vmem:[#allocation6 + $0x168] sm:$0xff] }
 0x4ca   :  { %2500 = vmatpush.bf16.msra.mxu2 %v8781_v3 }
 0x4d9   :  { %1932 = vmatmul.bf16.gmra.mxu1 %v8740_v12  ;;  %2071 = vmatmul.bf16.gmra.mxu2 %v8756_v59  ;;  %v8780_v59 = vld [vmem:[#allocation6 + $0x160] sm:$0xff] }
 0x4da   :  { %2501 = vmatpush.bf16.msra.mxu2 %v8780_v59 }
 0x4de   :  { %2502 = vmatpush.bf16.msra.mxu2 %v8779_v48 }
 0x4e9   :  { %1937 = vmatmul.bf16.gmra.mxu1 %v8741_v21  ;;  %2076 = vmatmul.bf16.gmra.mxu2 %v8757_v62  ;;  %v8778_v62 = vld [vmem:[#allocation6 + $0x150] sm:$0xff] }
 0x4ea   :  { %2503 = vmatpush.bf16.msra.mxu2 %v8778_v62 }
 0x4ee   :  { %2504 = vmatpush.bf16.msra.mxu2 %v8777_v29 }
 0x4f2   :  { %2505 = vmatpush.bf16.msra.mxu2 %v8776_v24 }
 0x4f9   :  { %1942 = vmatmul.bf16.gmra.mxu1 %v8742_v18  ;;  %2081 = vmatmul.bf16.gmra.mxu2 %v8758_v20 }
 0x509   :  { %1947 = vmatmul.bf16.gmra.mxu1 %v8743_v32  ;;  %2086 = vmatmul.bf16.gmra.mxu2 %v8759_v27 }
 0x516   :  { %v1913_v60 = vpop.f32.mrf.mxu1 }
 0x519   :  { %2384 = vmatmul.bf16.vlgmr.msra.gmra.mxu1 %v8768_v57 }
 0x51c   :  { %v2052_v37 = vpop.f32.mrf.mxu2 }
 0x51e   :  { %v1915_v33 = vpop.f32.mrf.mxu1 }
 0x51f   :  { %v9652_v15 = vpack.c.bf16 %v1915_v33, %v1913_v60 }
 0x521   :  { %2270 = vmatmul.bf16.vlgmr.msra.gmra.mxu0 %v9652_v15 }
 0x524   :  { %v2054_v23 = vpop.f32.mrf.mxu2 }
 0x525   :  { %v2092_v16 = vpack.c.bf16 %v2054_v23, %v2052_v37 }
 0x526   :  { %v1918_v0 = vpop.f32.mrf.mxu1 }
 0x527   :  { %2173 = vmatmul.bf16.vlgmr.msrb.gmra.mxu3 %v2092_v16 }
 0x529   :  { %2389 = vmatmul.bf16.gmra.mxu1 %v8769_v51 }
 0x52c   :  { %v2057_v55 = vpop.f32.mrf.mxu2 }
 0x52e   :  { %v1920_v1 = vpop.f32.mrf.mxu1 }
 0x52f   :  { %v9655_v36 = vpack.c.bf16 %v1920_v1, %v1918_v0 }
 0x531   :  { %2275 = vmatmul.bf16.gmra.mxu0 %v9655_v36 }
 0x534   :  { %v2059_v28 = vpop.f32.mrf.mxu2 }
 0x535   :  { %v2093_v34 = vpack.c.bf16 %v2059_v28, %v2057_v55 }
 0x536   :  { %v1923_v17 = vpop.f32.mrf.mxu1 }
 0x537   :  { %2178 = vmatmul.bf16.gmra.mxu3 %v2093_v34 }
 0x539   :  { %2394 = vmatmul.bf16.gmra.mxu1 %v8770_v53 }
 0x53c   :  { %v2062_v47 = vpop.f32.mrf.mxu2 }
 0x53e   :  { %v1925_v39 = vpop.f32.mrf.mxu1 }
 0x53f   :  { %v9658_v50 = vpack.c.bf16 %v1925_v39, %v1923_v17 }
 0x541   :  { %2280 = vmatmul.bf16.gmra.mxu0 %v9658_v50 }
 0x544   :  { %v2064_v42 = vpop.f32.mrf.mxu2 }
 0x545   :  { %v2094_v43 = vpack.c.bf16 %v2064_v42, %v2062_v47 }
 0x546   :  { %v1928_v58 = vpop.f32.mrf.mxu1 }
 0x547   :  { %2183 = vmatmul.bf16.gmra.mxu3 %v2094_v43 }
 0x549   :  { %2399 = vmatmul.bf16.gmra.mxu1 %v8771_v14 }
 0x54c   :  { %v2067_v52 = vpop.f32.mrf.mxu2 }
 0x54e   :  { %v1930_v41 = vpop.f32.mrf.mxu1 }
 0x54f   :  { %v9661_v56 = vpack.c.bf16 %v1930_v41, %v1928_v58 }
 0x551   :  { %2285 = vmatmul.bf16.gmra.mxu0 %v9661_v56 }
 0x554   :  { %v2069_v11 = vpop.f32.mrf.mxu2 }
 0x555   :  { %v2095_v13 = vpack.c.bf16 %v2069_v11, %v2067_v52 }
 0x556   :  { %v1933_v6 = vpop.f32.mrf.mxu1 }
 0x557   :  { %2188 = vmatmul.bf16.gmra.mxu3 %v2095_v13 }
 0x559   :  { %2404 = vmatmul.bf16.gmra.mxu1 %v8772_v5 }
 0x55c   :  { %v2072_v40 = vpop.f32.mrf.mxu2 }
 0x55e   :  { %v1935_v10 = vpop.f32.mrf.mxu1 }
 0x55f   :  { %v9664_v9 = vpack.c.bf16 %v1935_v10, %v1933_v6 }
 0x561   :  { %2290 = vmatmul.bf16.gmra.mxu0 %v9664_v9 }
 0x564   :  { %v2074_v44 = vpop.f32.mrf.mxu2 }
 0x565   :  { %v2096_v4 = vpack.c.bf16 %v2074_v44, %v2072_v40 }
 0x566   :  { %v1938_v35 = vpop.f32.mrf.mxu1 }
 0x567   :  { %2193 = vmatmul.bf16.gmra.mxu3 %v2096_v4 }
 0x569   :  { %2409 = vmatmul.bf16.gmra.mxu1 %v8773_v63 }
 0x56c   :  { %v2077_v12 = vpop.f32.mrf.mxu2 }
 0x56e   :  { %v1940_v38 = vpop.f32.mrf.mxu1 }
 0x56f   :  { %v9667_v8 = vpack.c.bf16 %v1940_v38, %v1938_v35 }
 0x571   :  { %2295 = vmatmul.bf16.gmra.mxu0 %v9667_v8 }
 0x574   :  { %v2079_v21 = vpop.f32.mrf.mxu2 }
 0x575   :  { %v2097_v22 = vpack.c.bf16 %v2079_v21, %v2077_v12 }
 0x576   :  { %v1943_v49 = vpop.f32.mrf.mxu1 }
 0x577   :  { %2198 = vmatmul.bf16.gmra.mxu3 %v2097_v22 }
 0x579   :  { %2414 = vmatmul.bf16.gmra.mxu1 %v8774_v45 }
 0x57c   :  { %v2082_v19 = vpop.f32.mrf.mxu2 }
 0x57e   :  { %v1945_v25 = vpop.f32.mrf.mxu1 }
 0x57f   :  { %v9670_v18 = vpack.c.bf16 %v1945_v25, %v1943_v49 }
 0x581   :  { %2300 = vmatmul.bf16.gmra.mxu0 %v9670_v18 }
 0x584   :  { %v2084_v20 = vpop.f32.mrf.mxu2 }
 0x585   :  { %v2098_v2 = vpack.c.bf16 %v2084_v20, %v2082_v19 }
 0x586   :  { %v1948_v54 = vpop.f32.mrf.mxu1 }
 0x587   :  { %2203 = vmatmul.bf16.gmra.mxu3 %v2098_v2 }
 0x589   :  { %2419 = vmatmul.bf16.gmra.mxu1 %v8775_v61 }
 0x58c   :  { %v2087_v31 = vpop.f32.mrf.mxu2 }
 0x58e   :  { %v1950_v30 = vpop.f32.mrf.mxu1 }
 0x58f   :  { %v9673_v26 = vpack.c.bf16 %v1950_v30, %v1948_v54 }
 0x591   :  { %2305 = vmatmul.bf16.gmra.mxu0 %v9673_v26 }
 0x594   :  { %v2089_v32 = vpop.f32.mrf.mxu2 }
 0x595   :  { %v2099_v27 = vpack.c.bf16 %v2089_v32, %v2087_v31 }
 0x596   :  { %v2385_v57 = vpop.f32.mrf.mxu1 }
 0x597   :  { %2208 = vmatmul.bf16.gmra.mxu3 %v2099_v27 }
 0x59e   :  { %v2271_v60 = vpop.f32.mrf.mxu0  ;;  %v2387_v37 = vpop.f32.mrf.mxu1 }
 0x59f   :  { %v2425_v33 = vpack.c.bf16 %v2387_v37, %v2385_v57 }
 0x5a1   :  { %2506 = vmatmul.bf16.vlgmr.msra.gmra.mxu2 %v2425_v33 }
 0x5a6   :  { %v9676_v23 = vpop.f32.mrf.mxu0  ;;  %v2390_v16 = vpop.f32.mrf.mxu1 }
 0x5aa   :  { %v2174_v51 = vpop.f32.mrf.mxu3 }
 0x5ab   :  { %v2272_v0 = vadd.f32 %v2271_v60, %v2174_v51 }
 0x5ae   :  { %v2276_v55 = vpop.f32.mrf.mxu0  ;;  %v2392_v1 = vpop.f32.mrf.mxu1 }
 0x5af   :  { %v2426_v28 = vpack.c.bf16 %v2392_v1, %v2390_v16 }
 0x5b1   :  { %2511 = vmatmul.bf16.gmra.mxu2 %v2426_v28 }
 0x5b2   :  { %v9678_v34 = vpop.f32.mrf.mxu3 }
 0x5b6   :  { %v2395_v53 = vpop.f32.mrf.mxu1  ;;  %v9680_v17 = vpop.f32.mrf.mxu0 }
 0x5ba   :  { %v2179_v47 = vpop.f32.mrf.mxu3 }
 0x5bb   :  { %v2277_v39 = vadd.f32 %v2276_v55, %v2179_v47 }
 0x5be   :  { %v2397_v42 = vpop.f32.mrf.mxu1  ;;  %v2281_v14 = vpop.f32.mrf.mxu0 }
 0x5bf   :  { %v2427_v43 = vpack.c.bf16 %v2397_v42, %v2395_v53 }
 0x5c1   :  { %2516 = vmatmul.bf16.gmra.mxu2 %v2427_v43 }
 0x5c2   :  { %v9682_v58 = vpop.f32.mrf.mxu3 }
 0x5c6   :  { %v2400_v52 = vpop.f32.mrf.mxu1  ;;  %v9684_v13 = vpop.f32.mrf.mxu0 }
 0x5ca   :  { %v2184_v41 = vpop.f32.mrf.mxu3 }
 0x5cb   :  { %v2282_v11 = vadd.f32 %v2281_v14, %v2184_v41 }
 0x5ce   :  { %v2402_v5 = vpop.f32.mrf.mxu1  ;;  %v2286_v10 = vpop.f32.mrf.mxu0 }
 0x5cf   :  { %v2428_v6 = vpack.c.bf16 %v2402_v5, %v2400_v52 }
 0x5d1   :  { %2521 = vmatmul.bf16.gmra.mxu2 %v2428_v6 }
 0x5d2   :  { %v9686_v40 = vpop.f32.mrf.mxu3 }
 0x5d6   :  { %v2405_v46 = vpop.f32.mrf.mxu1  ;;  %v9688_v35 = vpop.f32.mrf.mxu0 }
 0x5da   :  { %v2189_v44 = vpop.f32.mrf.mxu3 }
 0x5db   :  { %v2287_v7 = vadd.f32 %v2286_v10, %v2189_v44 }
 0x5de   :  { %v2407_v4 = vpop.f32.mrf.mxu1  ;;  %v2291_v59 = vpop.f32.mrf.mxu0 }
 0x5df   :  { %v2429_v63 = vpack.c.bf16 %v2407_v4, %v2405_v46 }
 0x5e1   :  { %2526 = vmatmul.bf16.gmra.mxu2 %v2429_v63 }
 0x5e2   :  { %v9690_v3 = vpop.f32.mrf.mxu3 }
 0x5e6   :  { %v2410_v12 = vpop.f32.mrf.mxu1  ;;  %v2293_v16 = vpop.f32.mrf.mxu0 }
 0x5ea   :  { %v2194_v38 = vpop.f32.mrf.mxu3 }
 0x5eb   :  { %v2292_v48 = vadd.f32 %v2291_v59, %v2194_v38 }
 0x5ee   :  { %v2412_v21 = vpop.f32.mrf.mxu1  ;;  %v2296_v1 = vpop.f32.mrf.mxu0 }
 0x5ef   :  { %v2430_v62 = vpack.c.bf16 %v2412_v21, %v2410_v12 }
 0x5f1   :  { %2531 = vmatmul.bf16.gmra.mxu2 %v2430_v62 }
 0x5f2   :  { %v2196_v37 = vpop.f32.mrf.mxu3 }
 0x5f6   :  { %v2415_v22 = vpop.f32.mrf.mxu1  ;;  %v2298_v47 = vpop.f32.mrf.mxu0 }
 0x5fa   :  { %v2199_v55 = vpop.f32.mrf.mxu3 }
 0x5fe   :  { %v2417_v45 = vpop.f32.mrf.mxu1  ;;  %v2301_v43 = vpop.f32.mrf.mxu0 }
 0x5ff   :  { %v2431_v49 = vpack.c.bf16 %v2417_v45, %v2415_v22 }
 0x601   :  { %2536 = vmatmul.bf16.gmra.mxu2 %v2431_v49 }
 0x602   :  { %v2201_v53 = vpop.f32.mrf.mxu3 }
 0x603   :  { %v2299_v22 = vadd.f32 %v2298_v47, %v2201_v53 }
 0x606   :  { %v2420_v29 = vpop.f32.mrf.mxu1 }
 0x60a   :  { %v2204_v42 = vpop.f32.mrf.mxu3 }
 0x60b   :  { %v2302_v59 = vadd.f32 %v2301_v43, %v2204_v42 }
 0x60e   :  { %v2422_v19 = vpop.f32.mrf.mxu1 }
 0x60f   :  { %v2432_v24 = vpack.c.bf16 %v2422_v19, %v2420_v29  ;;  %v2297_v19 = vadd.f32 %v2296_v1, %v2199_v55 }
 0x611   :  { %2541 = vmatmul.bf16.gmra.mxu2 %v2432_v24 }
 0x612   :  { %v2206_v52 = vpop.f32.mrf.mxu3 }
 0x61a   :  { %v2209_v6 = vpop.f32.mrf.mxu3 }
 0x624   :  { %v2507_v25 = vpop.f32.mrf.mxu2 }
 0x625   :  { %v9692_v20 = vadd.f32 %v2507_v25, %v2272_v0 }
 0x62c   :  { %v9694_v2 = vpop.f32.mrf.mxu2 }
 0x634   :  { %v2512_v61 = vpop.f32.mrf.mxu2 }
 0x635   :  { %v9696_v54 = vadd.f32 %v2512_v61, %v2277_v39 }
 0x63c   :  { %v9698_v31 = vpop.f32.mrf.mxu2 }
 0x644   :  { %v2517_v30 = vpop.f32.mrf.mxu2 }
 0x645   :  { %v9700_v32 = vadd.f32 %v2517_v30, %v2282_v11  ;;  %v2303_v11 = vpop.f32.mrf.mxu0  ;;  %v2294_v30 = vadd.f32 %v2293_v16, %v2196_v37 }
 0x646   :  { %v2304_v4 = vadd.f32 %v2303_v11, %v2206_v52 }
 0x64c   :  { %v9702_v27 = vpop.f32.mrf.mxu2 }
 0x64d   :  { %v2306_v10 = vpop.f32.mrf.mxu0 }
 0x64e   :  { %v2307_v44 = vadd.f32 %v2306_v10, %v2209_v6 }
 0x654   :  { %v2522_v57 = vpop.f32.mrf.mxu2 }
 0x655   :  { %v9704_v60 = vadd.f32 %v2522_v57, %v2287_v7  ;;  %v2211_v7 = vpop.f32.mrf.mxu3  ;;  %v2308_v12 = vpop.f32.mrf.mxu0 }
 0x656   :  { %v2309_v38 = vadd.f32 %v2308_v12, %v2211_v7 }
 0x65c   :  { %v2524_v33 = vpop.f32.mrf.mxu2 }
 0x664   :  { %v2527_v51 = vpop.f32.mrf.mxu2 }
 0x665   :  { %v2555_v0 = vadd.f32 %v2527_v51, %v2292_v48  ;;  %v9706_v48 = vld [vmem:[#allocation7 + $0x1] ss:$0 sm:$0xff] }
 0x66c   :  { %v2529_v28 = vpop.f32.mrf.mxu2 }
 0x66d   :  { %v2556_v52 = vadd.f32 %v2529_v28, %v2294_v30  ;;  %v2284_v28 = vadd.f32 %v9684_v13, %v9686_v40  ;;  %v8788_v30 = vld [vmem:[#allocation4 + $0xe0] sm:$0xff] }
 0x66f   :  { %v2577_v37 = vadd.f32 %v9706_v48, %v2556_v52  ;;  %v8789_v52 = vld [vmem:[#allocation4 + $0xe8] sm:$0xff] }
 0x671   :  { %v2593_v10 = vmax.f32 %v2577_v37, 0.0  ;;  %v8810_v37 = vld [vmem:[#allocation9 + $0x110] sm:$0xff] }
 0x674   :  { %v2532_v39 = vpop.f32.mrf.mxu2 }
 0x675   :  { %v2557_v57 = vadd.f32 %v2532_v39, %v2297_v19  ;;  %v8786_v19 = vld [vmem:[#allocation4 + $0xd0] sm:$0xff] }
 0x677   :  { %v2578_v55 = vadd.f32 %v9706_v48, %v2557_v57  ;;  %v8804_v57 = vld [vmem:[#allocation4 + $0x120] sm:$0xff] }
 0x679   :  { %v2594_v6 = vmax.f32 %v2578_v55, 0.0  ;;  %v8797_v55 = vld [vmem:[#allocation9 + $0xe8] sm:$0xff] }
 0x67c   :  { %v2534_v14 = vpop.f32.mrf.mxu2 }
 0x67d   :  { %v2558_v24 = vadd.f32 %v2534_v14, %v2299_v22 }
 0x67f   :  { %v2579_v11 = vadd.f32 %v9706_v48, %v2558_v24  ;;  %v8802_v24 = vld [vmem:[#allocation4 + $0x110] sm:$0xff] }
 0x681   :  { %v2595_v16 = vmax.f32 %v2579_v11, 0.0  ;;  %v8805_v11 = vld [vmem:[#allocation4 + $0x128] sm:$0xff] }
 0x684   :  { %v2537_v41 = vpop.f32.mrf.mxu2 }
 0x685   :  { %v2559_v45 = vadd.f32 %v2537_v41, %v2302_v59  ;;  %v2289_v41 = vadd.f32 %v9688_v35, %v9690_v3  ;;  %v2552_v35 = vadd.f32 %v9702_v27, %v2284_v28  ;;  %v2274_v27 = vadd.f32 %v9676_v23, %v9678_v34  ;;  %v8795_v28 = vld [vmem:[#allocation9 + $0xd8] sm:$0xff] }
 0x687   :  { %v2580_v51 = vadd.f32 %v9706_v48, %v2559_v45  ;;  %v2554_v14 = vadd.f32 %v2524_v33, %v2289_v41  ;;  %v2279_v33 = vadd.f32 %v9680_v17, %v9682_v58  ;;  %v2573_v40 = vadd.f32 %v9706_v48, %v2552_v35  ;;  %v8812_v41 = vld [vmem:[#allocation9 + $0x120] sm:$0xff] }
 0x688   :  { %v2548_v17 = vadd.f32 %v9694_v2, %v2274_v27  ;;  %v8808_v35 = vld [vmem:[#allocation9 + $0x100] sm:$0xff] }
 0x689   :  { %v2596_v1 = vmax.f32 %v2580_v51, 0.0  ;;  %v2575_v3 = vadd.f32 %v9706_v48, %v2554_v14  ;;  %v2550_v13 = vadd.f32 %v9698_v31, %v2279_v33  ;;  %v2570_v31 = vadd.f32 %v9706_v48, %v9696_v54  ;;  %v8784_v54 = vld [vmem:[#allocation4 + $0xc0] sm:$0xff]  ;;  %v8807_v33 = vld [vmem:[#allocation4 + $0x138] sm:$0xff] }
 0x68a   :  { %v2569_v23 = vadd.f32 %v9706_v48, %v2548_v17  ;;  %v8815_v51 = vld [vmem:[#allocation9 + $0x138] sm:$0xff]  ;;  %v8796_v14 = vld [vmem:[#allocation9 + $0xe0] sm:$0xff] }
 0x68b   :  { %v2571_v58 = vadd.f32 %v9706_v48, %v2550_v13  ;;  %2934 = vmatpush.bf16.msrb.mxu1 %v8815_v51 }
 0x68c   :  { %v2539_v5 = vpop.f32.mrf.mxu2  ;;  %v2585_v2 = vmax.f32 %v2569_v23, 0.0 }
 0x68d   :  { %v2560_v21 = vadd.f32 %v2539_v5, %v2304_v4  ;;  %v2576_v5 = vadd.f32 %v9706_v48, %v2555_v0  ;;  %v2591_v0 = vmax.f32 %v2575_v3, 0.0  ;;  %v2587_v34 = vmax.f32 %v2571_v58, 0.0  ;;  %v8793_v3 = vld [vmem:[#allocation9 + $0xc8] sm:$0xff] }
 0x68f   :  { %v2581_v25 = vadd.f32 %v9706_v48, %v2560_v21  ;;  %v2592_v7 = vmax.f32 %v2576_v5, 0.0  ;;  %v8809_v5 = vld [vmem:[#allocation9 + $0x108] sm:$0xff] }
 0x691   :  { %v2597_v53 = vmax.f32 %v2581_v25, 0.0  ;;  %v2604_v4 = vpack.c.bf16 %v2593_v10, %v2592_v7  ;;  %v8787_v25 = vld [vmem:[#allocation4 + $0xd8] sm:$0xff]  ;;  %v8792_v10 = vld [vmem:[#allocation9 + $0xc0] sm:$0xff] }
 0x693   :  { %v2606_v39 = vpack.c.bf16 %v2597_v53, %v2596_v1  ;;  %v8813_v53 = vld [vmem:[#allocation9 + $0x128] sm:$0xff]  ;;  %v8811_v1 = vld [vmem:[#allocation9 + $0x118] sm:$0xff] }
 0x694   :  { %v2542_v46 = vpop.f32.mrf.mxu2 }
 0x695   :  { %v2561_v63 = vadd.f32 %v2542_v46, %v2307_v44  ;;  %v2605_v46 = vpack.c.bf16 %v2595_v16, %v2594_v6  ;;  %v2574_v44 = vadd.f32 %v9706_v48, %v9704_v60  ;;  %v2589_v60 = vmax.f32 %v2573_v40, 0.0  ;;  %v8790_v16 = vld [vmem:[#allocation4 + $0xf0] sm:$0xff] }
 0x696   :  { %v8794_v6 = vld [vmem:[#allocation9 + $0xd0] sm:$0xff] }
 0x697   :  { %v2582_v49 = vadd.f32 %v9706_v48, %v2561_v63  ;;  %v2572_v63 = vadd.f32 %v9706_v48, %v9700_v32  ;;  %v2590_v12 = vmax.f32 %v2574_v44, 0.0  ;;  %v2568_v32 = vadd.f32 %v9706_v48, %v9692_v20  ;;  %v8785_v20 = vld [vmem:[#allocation4 + $0xc8] sm:$0xff]  ;;  %v8816_v44 = vld [vmem:[#allocation4 + $0x140] sm:$0xff] }
 0x699   :  { %v2598_v42 = vmax.f32 %v2582_v49, 0.0  ;;  %v2603_v59 = vpack.c.bf16 %v2591_v0, %v2590_v12  ;;  %v2584_v45 = vmax.f32 %v2568_v32, 0.0 }
 0x69b   :  { %v2600_v49 = vpack.c.bf16 %v2585_v2, %v2584_v45 }
 0x69c   :  { %v2544_v62 = vpop.f32.mrf.mxu2 }
 0x69d   :  { %v2562_v29 = vadd.f32 %v2544_v62, %v2309_v38  ;;  %v2588_v38 = vmax.f32 %v2572_v63, 0.0  ;;  %v2586_v62 = vmax.f32 %v2570_v31, 0.0  ;;  %v8817_v63 = vld [vmem:[#allocation4 + $0x148] sm:$0xff] }
 0x69f   :  { %v2583_v61 = vadd.f32 %v9706_v48, %v2562_v29  ;;  %v2602_v21 = vpack.c.bf16 %v2589_v60, %v2588_v38  ;;  %v2601_v22 = vpack.c.bf16 %v2587_v34, %v2586_v62  ;;  %v8800_v29 = vld [vmem:[#allocation4 + $0x100] sm:$0xff]  ;;  %v8801_v48 = vld [vmem:[#allocation4 + $0x108] sm:$0xff]  ;;  %v8818_v38 = vld [vmem:[#allocation4 + $0x150] sm:$0xff] }
 0x6a1   :  { %v2599_v43 = vmax.f32 %v2583_v61, 0.0  ;;  %v8803_v61 = vld [vmem:[#allocation4 + $0x118] sm:$0xff] }
 0x6a3   :  { %v2607_v47 = vpack.c.bf16 %v2599_v43, %v2598_v42  ;;  %v8799_v42 = vld [vmem:[#allocation9 + $0xf8] sm:$0xff]  ;;  %v8814_v43 = vld [vmem:[#allocation9 + $0x130] sm:$0xff] }
 0x6a4   :  { %3031 = vmatpush.bf16.msrb.mxu2 %v8799_v42  ;;  %2935 = vmatpush.bf16.msrb.mxu1 %v8814_v43  ;;  %v8838_v42 = vld [vmem:[%s10425_s7 + $0x70] sm:$0xff] }
 0x6a5   :  { %2673 = vmatpush.bf16.msra.mxu3 %v2607_v47  ;;  %2812 = vmatpush.bf16.msrb.mxu0 %v2607_v47 }
 0x6a8   :  { %2936 = vmatpush.bf16.msrb.mxu1 %v8813_v53  ;;  %v8831_v53 = vld [vmem:[#allocation9 + $0x178] sm:$0xff] }
 0x6a9   :  { %2674 = vmatpush.bf16.msra.mxu3 %v2606_v39  ;;  %2813 = vmatpush.bf16.msrb.mxu0 %v2606_v39 }
 0x6ac   :  { %2937 = vmatpush.bf16.msrb.mxu1 %v8812_v41  ;;  %v8830_v41 = vld [vmem:[#allocation9 + $0x170] sm:$0xff] }
 0x6ad   :  { %2675 = vmatpush.bf16.msra.mxu3 %v2605_v46  ;;  %2814 = vmatpush.bf16.msrb.mxu0 %v2605_v46 }
 0x6b0   :  { %2938 = vmatpush.bf16.msrb.mxu1 %v8811_v1  ;;  %v8836_v1 = vld [vmem:[%s10425_s7 + $0x60] sm:$0xff] }
 0x6b1   :  { %2676 = vmatpush.bf16.msra.mxu3 %v2604_v4  ;;  %2815 = vmatpush.bf16.msrb.mxu0 %v2604_v4 }
 0x6b4   :  { %2939 = vmatpush.bf16.msrb.mxu1 %v8810_v37  ;;  %v8829_v37 = vld [vmem:[#allocation9 + $0x168] sm:$0xff] }
 0x6b5   :  { %2677 = vmatpush.bf16.msra.mxu3 %v2603_v59  ;;  %2816 = vmatpush.bf16.msrb.mxu0 %v2603_v59 }
 0x6b8   :  { %2940 = vmatpush.bf16.msrb.mxu1 %v8809_v5 }
 0x6b9   :  { %2678 = vmatpush.bf16.msra.mxu3 %v2602_v21  ;;  %2817 = vmatpush.bf16.msrb.mxu0 %v2602_v21 }
 0x6bc   :  { %2941 = vmatpush.bf16.msrb.mxu1 %v8808_v35 }
 0x6bd   :  { %2679 = vmatpush.bf16.msra.mxu3 %v2601_v22  ;;  %2818 = vmatpush.bf16.msrb.mxu0 %v2601_v22 }
 0x6c1   :  { %2680 = vmatpush.bf16.msra.mxu3 %v2600_v49  ;;  %2819 = vmatpush.bf16.msrb.mxu0 %v2600_v49 }
 0x6c4   :  { %2681 = vmatmul.bf16.vlgmr.msra.gmra.mxu3 %v8784_v54  ;;  %2820 = vmatmul.bf16.vlgmr.msrb.gmra.mxu0 %v8800_v29 }
 0x6c5   :  { %3145 = vmatpush.bf16.msrb.mxu3 %v2607_v47  ;;  %v8798_v47 = vld [vmem:[#allocation9 + $0xf0] sm:$0xff]  ;;  %3267 = vmatpush.bf16.msra.mxu0 %v8831_v53 }
 0x6c6   :  { %3032 = vmatpush.bf16.msrb.mxu2 %v8798_v47  ;;  %v8837_v47 = vld [vmem:[%s10425_s7 + $0x68] sm:$0xff] }
 0x6c9   :  { %3146 = vmatpush.bf16.msrb.mxu3 %v2606_v39  ;;  %v8806_v39 = vld [vmem:[#allocation4 + $0x130] sm:$0xff]  ;;  %3268 = vmatpush.bf16.msra.mxu0 %v8830_v41 }
 0x6ca   :  { %3033 = vmatpush.bf16.msrb.mxu2 %v8797_v55 }
 0x6cd   :  { %3147 = vmatpush.bf16.msrb.mxu3 %v2605_v46  ;;  %v8791_v46 = vld [vmem:[#allocation4 + $0xf8] sm:$0xff]  ;;  %3269 = vmatpush.bf16.msra.mxu0 %v8829_v37 }
 0x6ce   :  { %3034 = vmatpush.bf16.msrb.mxu2 %v8796_v14 }
 0x6d1   :  { %3148 = vmatpush.bf16.msrb.mxu3 %v2604_v4 }
 0x6d2   :  { %3035 = vmatpush.bf16.msrb.mxu2 %v8795_v28  ;;  %v8828_v28 = vld [vmem:[#allocation9 + $0x160] sm:$0xff] }
 0x6d3   :  { %3270 = vmatpush.bf16.msra.mxu0 %v8828_v28 }
 0x6d4   :  { %2686 = vmatmul.bf16.gmra.mxu3 %v8785_v20  ;;  %2825 = vmatmul.bf16.gmra.mxu0 %v8801_v48 }
 0x6d5   :  { %3149 = vmatpush.bf16.msrb.mxu3 %v2603_v59 }
 0x6d6   :  { %3036 = vmatpush.bf16.msrb.mxu2 %v8794_v6  ;;  %v8834_v6 = vld [vmem:[%s10425_s7 + $0x50] sm:$0xff] }
 0x6d9   :  { %3150 = vmatpush.bf16.msrb.mxu3 %v2602_v21 }
 0x6da   :  { %3037 = vmatpush.bf16.msrb.mxu2 %v8793_v3  ;;  %v8822_v3 = vld [vmem:[#allocation4 + $0x170] sm:$0xff] }
 0x6dd   :  { %3151 = vmatpush.bf16.msrb.mxu3 %v2601_v22  ;;  %v8819_v22 = vld [vmem:[#allocation4 + $0x158] sm:$0xff] }
 0x6de   :  { %3038 = vmatpush.bf16.msrb.mxu2 %v8792_v10 }
 0x6e1   :  { %3152 = vmatpush.bf16.msrb.mxu3 %v2600_v49 }
 0x6e4   :  { %2691 = vmatmul.bf16.gmra.mxu3 %v8786_v19  ;;  %2830 = vmatmul.bf16.gmra.mxu0 %v8802_v24  ;;  %v8820_v19 = vld [vmem:[#allocation4 + $0x160] sm:$0xff] }
 0x6f4   :  { %2696 = vmatmul.bf16.gmra.mxu3 %v8787_v25  ;;  %2835 = vmatmul.bf16.gmra.mxu0 %v8803_v61 }
 0x704   :  { %2701 = vmatmul.bf16.gmra.mxu3 %v8788_v30  ;;  %2840 = vmatmul.bf16.gmra.mxu0 %v8804_v57  ;;  %v8839_v57 = vld [vmem:[%s10425_s7 + $0x78] sm:$0xff] }
 0x705   :  { %3423 = vmatpush.bf16.msra.mxu1 %v8839_v57 }
 0x709   :  { %3424 = vmatpush.bf16.msra.mxu1 %v8838_v42 }
 0x70d   :  { %3425 = vmatpush.bf16.msra.mxu1 %v8837_v47 }
 0x711   :  { %3426 = vmatpush.bf16.msra.mxu1 %v8836_v1 }
 0x714   :  { %2706 = vmatmul.bf16.gmra.mxu3 %v8789_v52  ;;  %2845 = vmatmul.bf16.gmra.mxu0 %v8805_v11  ;;  %v8821_v52 = vld [vmem:[#allocation4 + $0x168] sm:$0xff] }
 0x724   :  { %2711 = vmatmul.bf16.gmra.mxu3 %v8790_v16  ;;  %2850 = vmatmul.bf16.gmra.mxu0 %v8806_v39  ;;  %v8835_v39 = vld [vmem:[%s10425_s7 + $0x58] sm:$0xff] }
 0x725   :  { %3427 = vmatpush.bf16.msra.mxu1 %v8835_v39 }
 0x729   :  { %3428 = vmatpush.bf16.msra.mxu1 %v8834_v6 }
 0x734   :  { %2716 = vmatmul.bf16.gmra.mxu3 %v8791_v46  ;;  %2855 = vmatmul.bf16.gmra.mxu0 %v8807_v33  ;;  %v8827_v46 = vld [vmem:[#allocation9 + $0x158] sm:$0xff]  ;;  %v8833_v33 = vld [vmem:[%s10425_s7 + $0x48] sm:$0xff] }
 0x735   :  { %3271 = vmatpush.bf16.msra.mxu0 %v8827_v46  ;;  %3429 = vmatpush.bf16.msra.mxu1 %v8833_v33 }
 0x741   :  { %v2821_v7 = vpop.f32.mrf.mxu0 }
 0x744   :  { %3153 = vmatmul.bf16.vlgmr.msrb.gmra.mxu3 %v8816_v44  ;;  %v8826_v44 = vld [vmem:[#allocation9 + $0x150] sm:$0xff] }
 0x745   :  { %3272 = vmatpush.bf16.msra.mxu0 %v8826_v44 }
 0x747   :  { %v2682_v13 = vpop.f32.mrf.mxu3 }
 0x749   :  { %v2823_v40 = vpop.f32.mrf.mxu0 }
 0x74a   :  { %v2861_v0 = vpack.c.bf16 %v2823_v40, %v2821_v7 }
 0x74c   :  { %2942 = vmatmul.bf16.vlgmr.msrb.gmra.mxu1 %v2861_v0  ;;  %v8825_v0 = vld [vmem:[#allocation9 + $0x148] sm:$0xff] }
 0x74d   :  { %3273 = vmatpush.bf16.msra.mxu0 %v8825_v0 }
 0x74f   :  { %v2684_v4 = vpop.f32.mrf.mxu3 }
 0x750   :  { %v2722_v27 = vpack.c.bf16 %v2684_v4, %v2682_v13  ;;  %v8832_v13 = vld [vmem:[%s10425_s7 + $0x40] sm:$0xff] }
 0x751   :  { %v2826_v12 = vpop.f32.mrf.mxu0  ;;  %3430 = vmatpush.bf16.msra.mxu1 %v8832_v13 }
 0x752   :  { %3039 = vmatmul.bf16.vlgmr.msrb.gmra.mxu2 %v2722_v27  ;;  %v8824_v27 = vld [vmem:[#allocation9 + $0x140] sm:$0xff] }
 0x753   :  { %3274 = vmatpush.bf16.msra.mxu0 %v8824_v27 }
 0x754   :  { %3158 = vmatmul.bf16.gmra.mxu3 %v8817_v63 }
 0x757   :  { %v2687_v17 = vpop.f32.mrf.mxu3 }
 0x759   :  { %v2828_v58 = vpop.f32.mrf.mxu0 }
 0x75a   :  { %v2862_v60 = vpack.c.bf16 %v2828_v58, %v2826_v12 }
 0x75c   :  { %2947 = vmatmul.bf16.gmra.mxu1 %v2862_v60 }
 0x75f   :  { %v2689_v59 = vpop.f32.mrf.mxu3 }
 0x760   :  { %v2723_v31 = vpack.c.bf16 %v2689_v59, %v2687_v17  ;;  %v8823_v17 = vld [vmem:[#allocation4 + $0x178] sm:$0xff] }
 0x761   :  { %v2831_v23 = vpop.f32.mrf.mxu0 }
 0x762   :  { %3044 = vmatmul.bf16.gmra.mxu2 %v2723_v31 }
 0x764   :  { %3163 = vmatmul.bf16.gmra.mxu3 %v8818_v38 }
 0x767   :  { %v2692_v34 = vpop.f32.mrf.mxu3 }
 0x769   :  { %v2833_v21 = vpop.f32.mrf.mxu0 }
 0x76a   :  { %v2863_v32 = vpack.c.bf16 %v2833_v21, %v2831_v23 }
 0x76c   :  { %2952 = vmatmul.bf16.gmra.mxu1 %v2863_v32 }
 0x76f   :  { %v2694_v62 = vpop.f32.mrf.mxu3 }
 0x770   :  { %v2724_v2 = vpack.c.bf16 %v2694_v62, %v2692_v34 }
 0x771   :  { %v2836_v45 = vpop.f32.mrf.mxu0 }
 0x772   :  { %3049 = vmatmul.bf16.gmra.mxu2 %v2724_v2 }
 0x774   :  { %3168 = vmatmul.bf16.gmra.mxu3 %v8819_v22 }
 0x777   :  { %v2697_v49 = vpop.f32.mrf.mxu3 }
 0x779   :  { %v2838_v54 = vpop.f32.mrf.mxu0 }
 0x77a   :  { %v2864_v29 = vpack.c.bf16 %v2838_v54, %v2836_v45 }
 0x77c   :  { %2957 = vmatmul.bf16.gmra.mxu1 %v2864_v29 }
 0x77f   :  { %v2699_v20 = vpop.f32.mrf.mxu3 }
 0x780   :  { %v2725_v48 = vpack.c.bf16 %v2699_v20, %v2697_v49 }
 0x781   :  { %v2841_v24 = vpop.f32.mrf.mxu0 }
 0x782   :  { %3054 = vmatmul.bf16.gmra.mxu2 %v2725_v48 }
 0x784   :  { %3173 = vmatmul.bf16.gmra.mxu3 %v8820_v19 }
 0x787   :  { %v2702_v25 = vpop.f32.mrf.mxu3 }
 0x789   :  { %v2843_v61 = vpop.f32.mrf.mxu0 }
 0x78a   :  { %v2865_v30 = vpack.c.bf16 %v2843_v61, %v2841_v24 }
 0x78c   :  { %2962 = vmatmul.bf16.gmra.mxu1 %v2865_v30 }
 0x78f   :  { %v2704_v51 = vpop.f32.mrf.mxu3 }
 0x790   :  { %v2726_v43 = vpack.c.bf16 %v2704_v51, %v2702_v25 }
 0x791   :  { %v2846_v11 = vpop.f32.mrf.mxu0 }
 0x792   :  { %3059 = vmatmul.bf16.gmra.mxu2 %v2726_v43 }
 0x794   :  { %3178 = vmatmul.bf16.gmra.mxu3 %v8821_v52 }
 0x797   :  { %v2707_v55 = vpop.f32.mrf.mxu3 }
 0x799   :  { %v2848_v14 = vpop.f32.mrf.mxu0 }
 0x79a   :  { %v2866_v16 = vpack.c.bf16 %v2848_v14, %v2846_v11 }
 0x79c   :  { %2967 = vmatmul.bf16.gmra.mxu1 %v2866_v16 }
 0x79f   :  { %v2709_v5 = vpop.f32.mrf.mxu3 }
 0x7a0   :  { %v2727_v35 = vpack.c.bf16 %v2709_v5, %v2707_v55 }
 0x7a1   :  { %v2851_v10 = vpop.f32.mrf.mxu0 }
 0x7a2   :  { %3064 = vmatmul.bf16.gmra.mxu2 %v2727_v35 }
 0x7a4   :  { %3183 = vmatmul.bf16.gmra.mxu3 %v8822_v3 }
 0x7a7   :  { %v2712_v7 = vpop.f32.mrf.mxu3 }
 0x7a9   :  { %v2853_v40 = vpop.f32.mrf.mxu0 }
 0x7aa   :  { %v2867_v4 = vpack.c.bf16 %v2853_v40, %v2851_v10 }
 0x7ac   :  { %2972 = vmatmul.bf16.gmra.mxu1 %v2867_v4 }
 0x7af   :  { %v2714_v63 = vpop.f32.mrf.mxu3 }
 0x7b0   :  { %v2728_v12 = vpack.c.bf16 %v2714_v63, %v2712_v7 }
 0x7b1   :  { %v2856_v58 = vpop.f32.mrf.mxu0 }
 0x7b2   :  { %3069 = vmatmul.bf16.gmra.mxu2 %v2728_v12 }
 0x7b4   :  { %3188 = vmatmul.bf16.gmra.mxu3 %v8823_v17  ;;  %v9811_v17 = vld [vmem:[#allocation12 + $0x1] ss:$0 sm:$0xff] }
 0x7b7   :  { %v2717_v60 = vpop.f32.mrf.mxu3 }
 0x7b9   :  { %v2858_v59 = vpop.f32.mrf.mxu0 }
 0x7ba   :  { %v2868_v31 = vpack.c.bf16 %v2858_v59, %v2856_v58  ;;  %v9813_v58 = vld [vmem:[#allocation10 + $0x1] ss:$0 sm:$0xff] }
 0x7bc   :  { %2977 = vmatmul.bf16.gmra.mxu1 %v2868_v31 }
 0x7bf   :  { %v2719_v38 = vpop.f32.mrf.mxu3 }
 0x7c0   :  { %v2729_v23 = vpack.c.bf16 %v2719_v38, %v2717_v60 }
 0x7c2   :  { %3074 = vmatmul.bf16.gmra.mxu2 %v2729_v23 }
 0x7c7   :  { %v3154_v34 = vpop.f32.mrf.mxu3 }
 0x7c9   :  { %v2943_v21 = vpop.f32.mrf.mxu1 }
 0x7cc   :  { %3431 = vmatmul.bf16.vlgmr.msra.gmra.mxu1 %v9652_v15 }
 0x7cf   :  { %v3156_v32 = vpop.f32.mrf.mxu3 }
 0x7d0   :  { %v3194_v62 = vpack.c.bf16 %v3156_v32, %v3154_v34 }
 0x7d1   :  { %v9764_v2 = vpop.f32.mrf.mxu1 }
 0x7d2   :  { %3275 = vmatmul.bf16.vlgmr.msra.gmra.mxu0 %v3194_v62 }
 0x7d5   :  { %v3040_v22 = vpop.f32.mrf.mxu2 }
 0x7d6   :  { %v9766_v45 = vadd.f32 %v3040_v22, %v2943_v21 }
 0x7d7   :  { %v3159_v49 = vpop.f32.mrf.mxu3 }
 0x7d9   :  { %v2948_v54 = vpop.f32.mrf.mxu1 }
 0x7dc   :  { %3436 = vmatmul.bf16.gmra.mxu1 %v9655_v36 }
 0x7dd   :  { %v9769_v29 = vpop.f32.mrf.mxu2 }
 0x7df   :  { %v3161_v20 = vpop.f32.mrf.mxu3 }
 0x7e0   :  { %v3195_v48 = vpack.c.bf16 %v3161_v20, %v3159_v49 }
 0x7e1   :  { %v9771_v19 = vpop.f32.mrf.mxu1 }
 0x7e2   :  { %3280 = vmatmul.bf16.gmra.mxu0 %v3195_v48 }
 0x7e5   :  { %v3045_v15 = vpop.f32.mrf.mxu2 }
 0x7e6   :  { %v9773_v24 = vadd.f32 %v3045_v15, %v2948_v54 }
 0x7e7   :  { %v3164_v25 = vpop.f32.mrf.mxu3 }
 0x7e9   :  { %v2953_v61 = vpop.f32.mrf.mxu1 }
 0x7ec   :  { %3441 = vmatmul.bf16.gmra.mxu1 %v9658_v50 }
 0x7ed   :  { %v9776_v30 = vpop.f32.mrf.mxu2 }
 0x7ef   :  { %v3166_v57 = vpop.f32.mrf.mxu3 }
 0x7f0   :  { %v3196_v51 = vpack.c.bf16 %v3166_v57, %v3164_v25  ;;  %v3048_v57 = vadd.f32 %v9776_v30, %v9771_v19 }
 0x7f1   :  { %v9778_v42 = vpop.f32.mrf.mxu1 }
 0x7f2   :  { %3285 = vmatmul.bf16.gmra.mxu0 %v3196_v51 }
 0x7f5   :  { %v3050_v36 = vpop.f32.mrf.mxu2 }
 0x7f6   :  { %v9780_v43 = vadd.f32 %v3050_v36, %v2953_v61 }
 0x7f7   :  { %v3169_v52 = vpop.f32.mrf.mxu3 }
 0x7f9   :  { %v2958_v11 = vpop.f32.mrf.mxu1 }
 0x7fc   :  { %3446 = vmatmul.bf16.gmra.mxu1 %v9661_v56 }
 0x7fd   :  { %v9783_v53 = vpop.f32.mrf.mxu2 }
 0x7ff   :  { %v3171_v47 = vpop.f32.mrf.mxu3 }
 0x800   :  { %v3197_v41 = vpack.c.bf16 %v3171_v47, %v3169_v52 }
 0x801   :  { %v9785_v55 = vpop.f32.mrf.mxu1 }
 0x802   :  { %3290 = vmatmul.bf16.gmra.mxu0 %v3197_v41 }
 0x805   :  { %v3055_v50 = vpop.f32.mrf.mxu2 }
 0x806   :  { %v9787_v1 = vadd.f32 %v3055_v50, %v2958_v11 }
 0x807   :  { %v3174_v14 = vpop.f32.mrf.mxu3 }
 0x809   :  { %v2963_v37 = vpop.f32.mrf.mxu1 }
 0x80c   :  { %3451 = vmatmul.bf16.gmra.mxu1 %v9664_v9 }
 0x80d   :  { %v9790_v16 = vpop.f32.mrf.mxu2 }
 0x80f   :  { %v3176_v39 = vpop.f32.mrf.mxu3 }
 0x810   :  { %v3198_v28 = vpack.c.bf16 %v3176_v39, %v3174_v14 }
 0x811   :  { %v9792_v5 = vpop.f32.mrf.mxu1 }
 0x812   :  { %3295 = vmatmul.bf16.gmra.mxu0 %v3198_v28 }
 0x815   :  { %v3060_v56 = vpop.f32.mrf.mxu2 }
 0x816   :  { %v9794_v6 = vadd.f32 %v3060_v56, %v2963_v37 }
 0x817   :  { %v3179_v35 = vpop.f32.mrf.mxu3 }
 0x819   :  { %v9796_v3 = vpop.f32.mrf.mxu1 }
 0x81c   :  { %3456 = vmatmul.bf16.gmra.mxu1 %v9667_v8 }
 0x81f   :  { %v3181_v10 = vpop.f32.mrf.mxu3 }
 0x820   :  { %v3199_v46 = vpack.c.bf16 %v3181_v10, %v3179_v35  ;;  %v3053_v35 = vadd.f32 %v9783_v53, %v9778_v42 }
 0x821   :  { %v9799_v33 = vpop.f32.mrf.mxu1 }
 0x822   :  { %3300 = vmatmul.bf16.gmra.mxu0 %v3199_v46 }
 0x827   :  { %v3184_v9 = vpop.f32.mrf.mxu3 }
 0x829   :  { %v9801_v44 = vpop.f32.mrf.mxu1 }
 0x82c   :  { %3461 = vmatmul.bf16.gmra.mxu1 %v9670_v18 }
 0x82f   :  { %v3186_v7 = vpop.f32.mrf.mxu3 }
 0x830   :  { %v3200_v13 = vpack.c.bf16 %v3186_v7, %v3184_v9 }
 0x831   :  { %v9804_v40 = vpop.f32.mrf.mxu1 }
 0x832   :  { %3305 = vmatmul.bf16.gmra.mxu0 %v3200_v13 }
 0x837   :  { %v3189_v0 = vpop.f32.mrf.mxu3 }
 0x839   :  { %v9806_v4 = vpop.f32.mrf.mxu1 }
 0x83c   :  { %3466 = vmatmul.bf16.gmra.mxu1 %v9673_v26  ;;  %v3043_v26 = vadd.f32 %v9769_v29, %v9764_v2 }
 0x83f   :  { %v3191_v8 = vpop.f32.mrf.mxu3 }
 0x840   :  { %v3201_v27 = vpack.c.bf16 %v3191_v8, %v3189_v0 }
 0x841   :  { %v9809_v63 = vpop.f32.mrf.mxu1 }
 0x842   :  { %3310 = vmatmul.bf16.gmra.mxu0 %v3201_v27 }
 0x849   :  { %v3432_v12 = vpop.f32.mrf.mxu1 }
 0x84a   :  { %v3433_v31 = vadd.f32 %v9811_v17, %v3432_v12 }
 0x84f   :  { %v3276_v18 = vpop.f32.mrf.mxu0 }
 0x850   :  { %v3316_v60 = vadd.f32 %v3276_v18, %v9766_v45 }
 0x851   :  { %v3434_v59 = vpop.f32.mrf.mxu1 }
 0x852   :  { %v3337_v38 = vadd.f32 %v9813_v58, %v3316_v60  ;;  %v3435_v62 = vadd.f32 %v9811_v17, %v3434_v59 }
 0x854   :  { %v3472_v23 = vadd.f32 %v3433_v31, %v3337_v38  ;;  %v3058_v31 = vadd.f32 %v9790_v16, %v9785_v55  ;;  %v3062_v38 = vpop.f32.mrf.mxu2 }
 0x856   :  { %v3488_v54 = vmax.f32 %v3472_v23, 0.0 }
 0x857   :  { %v3278_v34 = vpop.f32.mrf.mxu0 }
 0x858   :  { %v3317_v21 = vadd.f32 %v3278_v34, %v3043_v26 }
 0x859   :  { %v3437_v32 = vpop.f32.mrf.mxu1 }
 0x85a   :  { %v3338_v22 = vadd.f32 %v9813_v58, %v3317_v21  ;;  %v3438_v61 = vadd.f32 %v9811_v17, %v3437_v32 }
 0x85c   :  { %v3473_v49 = vadd.f32 %v3435_v62, %v3338_v22 }
 0x85e   :  { %v3489_v20 = vmax.f32 %v3473_v49, 0.0 }
 0x85f   :  { %v3281_v45 = vpop.f32.mrf.mxu0 }
 0x860   :  { %v3318_v48 = vadd.f32 %v3281_v45, %v9773_v24  ;;  %v9823_v15 = vpack.c.bf16 %v3489_v20, %v3488_v54  ;;  %v3065_v45 = vpop.f32.mrf.mxu2 }
 0x861   :  { %v3439_v25 = vpop.f32.mrf.mxu1 }
 0x862   :  { %v3339_v2 = vadd.f32 %v9813_v58, %v3318_v48  ;;  %v3440_v11 = vadd.f32 %v9811_v17, %v3439_v25 }
 0x864   :  { %v3474_v29 = vadd.f32 %v3438_v61, %v3339_v2 }
 0x866   :  { %v3490_v24 = vmax.f32 %v3474_v29, 0.0 }
 0x867   :  { %v3283_v51 = vpop.f32.mrf.mxu0 }
 0x868   :  { %v3319_v36 = vadd.f32 %v3283_v51, %v3048_v57  ;;  %v3067_v29 = vpop.f32.mrf.mxu2 }
 0x869   :  { %v3442_v52 = vpop.f32.mrf.mxu1 }
 0x86a   :  { %v3340_v47 = vadd.f32 %v9813_v58, %v3319_v36  ;;  %v3443_v56 = vadd.f32 %v9811_v17, %v3442_v52 }
 0x86c   :  { %v3475_v41 = vadd.f32 %v3440_v11, %v3340_v47 }
 0x86e   :  { %v3491_v50 = vmax.f32 %v3475_v41, 0.0 }
 0x86f   :  { %v3286_v14 = vpop.f32.mrf.mxu0 }
 0x870   :  { %v3320_v37 = vadd.f32 %v3286_v14, %v9780_v43  ;;  %v9832_v39 = vpack.c.bf16 %v3491_v50, %v3490_v24  ;;  %v3070_v36 = vpop.f32.mrf.mxu2 }
 0x871   :  { %v3444_v28 = vpop.f32.mrf.mxu1 }
 0x872   :  { %v3341_v19 = vadd.f32 %v9813_v58, %v3320_v37  ;;  %v3445_v7 = vadd.f32 %v9811_v17, %v3444_v28 }
 0x874   :  { %v3476_v30 = vadd.f32 %v3443_v56, %v3341_v19 }
 0x876   :  { %v3492_v43 = vmax.f32 %v3476_v30, 0.0  ;;  %v3071_v30 = vadd.f32 %v3070_v36, %v9801_v44  ;;  %v3063_v44 = vadd.f32 %v3062_v38, %v9792_v5 }
 0x877   :  { %v3288_v10 = vpop.f32.mrf.mxu0 }
 0x878   :  { %v3321_v46 = vadd.f32 %v3288_v10, %v3053_v35  ;;  %v3072_v47 = vpop.f32.mrf.mxu2 }
 0x879   :  { %v3447_v9 = vpop.f32.mrf.mxu1  ;;  %v3073_v56 = vadd.f32 %v3072_v47, %v9804_v40  ;;  %v8857_v47 = vld [vmem:[#allocation2 + $0x188] sm:$0xff] }
 0x87a   :  { %v3342_v13 = vadd.f32 %v9813_v58, %v3321_v46  ;;  %v3448_v59 = vadd.f32 %v9811_v17, %v3447_v9  ;;  %v3068_v9 = vadd.f32 %v3067_v29, %v9799_v33 }
 0x87c   :  { %v3477_v0 = vadd.f32 %v3445_v7, %v3342_v13 }
 0x87e   :  { %v3493_v8 = vmax.f32 %v3477_v0, 0.0  ;;  %v3066_v0 = vadd.f32 %v3065_v45, %v9796_v3 }
 0x87f   :  { %v3291_v27 = vpop.f32.mrf.mxu0 }
 0x880   :  { %v3322_v12 = vadd.f32 %v3291_v27, %v9787_v1  ;;  %v9841_v18 = vpack.c.bf16 %v3493_v8, %v3492_v43  ;;  %v3075_v50 = vpop.f32.mrf.mxu2 }
 0x881   :  { %v3449_v60 = vpop.f32.mrf.mxu1  ;;  %v3076_v28 = vadd.f32 %v3075_v50, %v9806_v4  ;;  %v8859_v50 = vld [vmem:[#allocation2 + $0x198] sm:$0xff] }
 0x882   :  { %v3343_v42 = vadd.f32 %v9813_v58, %v3322_v12  ;;  %v3450_v21 = vadd.f32 %v9811_v17, %v3449_v60 }
 0x884   :  { %v3478_v53 = vadd.f32 %v3448_v59, %v3343_v42 }
 0x886   :  { %v3494_v62 = vmax.f32 %v3478_v53, 0.0 }
 0x887   :  { %v3293_v23 = vpop.f32.mrf.mxu0 }
 0x888   :  { %v3323_v26 = vadd.f32 %v3293_v23, %v3058_v31  ;;  %v3077_v35 = vpop.f32.mrf.mxu2 }
 0x889   :  { %v3452_v34 = vpop.f32.mrf.mxu1  ;;  %v3078_v7 = vadd.f32 %v3077_v35, %v9809_v63  ;;  %v8868_v35 = vld [vmem:[#allocation6 + $0x1a0] sm:$0xff] }
 0x88a   :  { %v3344_v32 = vadd.f32 %v9813_v58, %v3323_v26  ;;  %v3453_v55 = vadd.f32 %v9811_v17, %v3452_v34 }
 0x88c   :  { %v3479_v1 = vadd.f32 %v3450_v21, %v3344_v32 }
 0x88e   :  { %v3495_v22 = vmax.f32 %v3479_v1, 0.0 }
 0x88f   :  { %v3296_v49 = vpop.f32.mrf.mxu0 }
 0x890   :  { %v3324_v54 = vadd.f32 %v3296_v49, %v9794_v6  ;;  %v9850_v20 = vpack.c.bf16 %v3495_v22, %v3494_v62 }
 0x891   :  { %v3454_v48 = vpop.f32.mrf.mxu1 }
 0x892   :  { %v3345_v16 = vadd.f32 %v9813_v58, %v3324_v54 }
 0x894   :  { %v9854_v25 = vadd.f32 %v3453_v55, %v3345_v16  ;;  %v3455_v55 = vadd.f32 %v9811_v17, %v3454_v48  ;;  %v8856_v48 = vld [vmem:[#allocation2 + $0x180] sm:$0xff] }
 0x897   :  { %v3298_v61 = vpop.f32.mrf.mxu0 }
 0x898   :  { %v3325_v53 = vadd.f32 %v3298_v61, %v3063_v44  ;;  %v8863_v44 = vld [vmem:[#allocation2 + $0x1b8] sm:$0xff] }
 0x899   :  { %v3457_v2 = vpop.f32.mrf.mxu1 }
 0x89a   :  { %v3346_v62 = vadd.f32 %v9813_v58, %v3325_v53  ;;  %v3458_v22 = vadd.f32 %v9811_v17, %v3457_v2 }
 0x89c   :  { %v3481_v29 = vadd.f32 %v3455_v55, %v3346_v62  ;;  %v8875_v55 = vld [vmem:[#allocation2 + $0x218] sm:$0xff] }
 0x89f   :  { %v3301_v57 = vpop.f32.mrf.mxu0 }
 0x8a0   :  { %v3326_v60 = vadd.f32 %v3301_v57, %v3066_v0  ;;  %v8866_v0 = vld [vmem:[#allocation6 + $0x190] sm:$0xff] }
 0x8a1   :  { %v3459_v51 = vpop.f32.mrf.mxu1 }
 0x8a2   :  { %v3347_v21 = vadd.f32 %v9813_v58, %v3326_v60  ;;  %v3460_v5 = vadd.f32 %v9811_v17, %v3459_v51  ;;  %v8872_v60 = vld [vmem:[#allocation2 + $0x200] sm:$0xff] }
 0x8a4   :  { %v3482_v16 = vadd.f32 %v3458_v22, %v3347_v21 }
 0x8a6   :  { %v3498_v51 = vmax.f32 %v3482_v16, 0.0 }
 0x8a7   :  { %v3303_v52 = vpop.f32.mrf.mxu0 }
 0x8a8   :  { %v3327_v27 = vadd.f32 %v3303_v52, %v3068_v9  ;;  %v8851_v9 = vld [vmem:[#allocation6 + $0x1d8] sm:$0xff] }
 0x8a9   :  { %v3462_v11 = vpop.f32.mrf.mxu1 }
 0x8aa   :  { %v3348_v31 = vadd.f32 %v9813_v58, %v3327_v27  ;;  %v3463_v23 = vadd.f32 %v9811_v17, %v3462_v11  ;;  %v3497_v11 = vmax.f32 %v3481_v29, 0.0  ;;  %v8849_v27 = vld [vmem:[#allocation6 + $0x1c8] sm:$0xff] }
 0x8ac   :  { %v3483_v49 = vadd.f32 %v3460_v5, %v3348_v31  ;;  %v8873_v31 = vld [vmem:[#allocation2 + $0x208] sm:$0xff] }
 0x8ae   :  { %v3499_v36 = vmax.f32 %v3483_v49, 0.0 }
 0x8af   :  { %v3306_v6 = vpop.f32.mrf.mxu0 }
 0x8b0   :  { %v3328_v46 = vadd.f32 %v3306_v6, %v3071_v30  ;;  %v3509_v52 = vpack.c.bf16 %v3499_v36, %v3498_v51  ;;  %v8842_v6 = vld [vmem:[#allocation2 + $0x1d0] sm:$0xff]  ;;  %v8853_v30 = vld [vmem:[#allocation6 + $0x1e8] sm:$0xff] }
 0x8b1   :  { %v3464_v41 = vpop.f32.mrf.mxu1 }
 0x8b2   :  { %v3349_v59 = vadd.f32 %v9813_v58, %v3328_v46  ;;  %v3465_v33 = vadd.f32 %v9811_v17, %v3464_v41  ;;  %v8858_v41 = vld [vmem:[#allocation2 + $0x190] sm:$0xff]  ;;  %v8867_v46 = vld [vmem:[#allocation6 + $0x198] sm:$0xff] }
 0x8b4   :  { %v3484_v38 = vadd.f32 %v3463_v23, %v3349_v59 }
 0x8b6   :  { %v3500_v61 = vmax.f32 %v3484_v38, 0.0 }
 0x8b7   :  { %v3308_v24 = vpop.f32.mrf.mxu0 }
 0x8b8   :  { %v3329_v10 = vadd.f32 %v3308_v24, %v3073_v56  ;;  %v8843_v24 = vld [vmem:[#allocation2 + $0x1d8] sm:$0xff]  ;;  %v8854_v56 = vld [vmem:[#allocation6 + $0x1f0] sm:$0xff] }
 0x8b9   :  { %v3467_v14 = vpop.f32.mrf.mxu1 }
 0x8ba   :  { %v3350_v4 = vadd.f32 %v9813_v58, %v3329_v10  ;;  %v3468_v40 = vadd.f32 %v9811_v17, %v3467_v14  ;;  %v8844_v14 = vld [vmem:[#allocation2 + $0x1e0] sm:$0xff] }
 0x8bb   :  { %v8852_v10 = vld [vmem:[#allocation6 + $0x1e0] sm:$0xff] }
 0x8bc   :  { %v3485_v26 = vadd.f32 %v3465_v33, %v3350_v4  ;;  %v8864_v4 = vld [vmem:[#allocation6 + $0x180] sm:$0xff] }
 0x8be   :  { %v3501_v45 = vmax.f32 %v3485_v26, 0.0 }
 0x8bf   :  { %v3311_v37 = vpop.f32.mrf.mxu0 }
 0x8c0   :  { %v3330_v19 = vadd.f32 %v3311_v37, %v3076_v28  ;;  %v3510_v57 = vpack.c.bf16 %v3501_v45, %v3500_v61  ;;  %v8860_v37 = vld [vmem:[#allocation2 + $0x1a0] sm:$0xff]  ;;  %v8855_v28 = vld [vmem:[#allocation6 + $0x1f8] sm:$0xff] }
 0x8c1   :  { %v3469_v43 = vpop.f32.mrf.mxu1  ;;  %3935 = vmatpush.bf16.msrb.mxu1 %v8855_v28 }
 0x8c2   :  { %v3351_v13 = vadd.f32 %v9813_v58, %v3330_v19  ;;  %v3470_v42 = vadd.f32 %v9811_v17, %v3469_v43  ;;  %v8840_v17 = vld [vmem:[#allocation2 + $0x1c0] sm:$0xff]  ;;  %v8869_v19 = vld [vmem:[#allocation6 + $0x1a8] sm:$0xff]  ;;  %v8850_v43 = vld [vmem:[#allocation6 + $0x1d0] sm:$0xff] }
 0x8c4   :  { %v3486_v63 = vadd.f32 %v3468_v40, %v3351_v13  ;;  %v8862_v13 = vld [vmem:[#allocation2 + $0x1b0] sm:$0xff]  ;;  %v8848_v40 = vld [vmem:[#allocation6 + $0x1c0] sm:$0xff] }
 0x8c5   :  { %3936 = vmatpush.bf16.msrb.mxu1 %v8854_v56  ;;  %v8883_v56 = vld [vmem:[#allocation6 + $0x218] sm:$0xff] }
 0x8c6   :  { %v3502_v32 = vmax.f32 %v3486_v63, 0.0 }
 0x8c7   :  { %v3313_v8 = vpop.f32.mrf.mxu0 }
 0x8c8   :  { %v3331_v12 = vadd.f32 %v3313_v8, %v3078_v7  ;;  %v8846_v7 = vld [vmem:[#allocation2 + $0x1f0] sm:$0xff]  ;;  %v8865_v8 = vld [vmem:[#allocation6 + $0x188] sm:$0xff] }
 0x8c9   :  { %3937 = vmatpush.bf16.msrb.mxu1 %v8853_v30 }
 0x8ca   :  { %v3352_v3 = vadd.f32 %v9813_v58, %v3331_v12  ;;  %v3496_v58 = vmax.f32 %v9854_v25, 0.0  ;;  %v8841_v25 = vld [vmem:[#allocation2 + $0x1c8] sm:$0xff]  ;;  %v8847_v12 = vld [vmem:[#allocation2 + $0x1f8] sm:$0xff] }
 0x8cc   :  { %v3487_v34 = vadd.f32 %v3470_v42, %v3352_v3  ;;  %v3508_v2 = vpack.c.bf16 %v3497_v11, %v3496_v58 }
 0x8cd   :  { %3938 = vmatpush.bf16.msrb.mxu1 %v8852_v10  ;;  %v8881_v10 = vld [vmem:[#allocation6 + $0x208] sm:$0xff] }
 0x8ce   :  { %v3503_v1 = vmax.f32 %v3487_v34, 0.0 }
 0x8d0   :  { %v3511_v54 = vpack.c.bf16 %v3503_v1, %v3502_v32  ;;  %v8874_v32 = vld [vmem:[#allocation2 + $0x210] sm:$0xff] }
 0x8d1   :  { %3939 = vmatpush.bf16.msrb.mxu1 %v8851_v9 }
 0x8d2   :  { %3577 = vmatpush.bf16.msra.mxu2 %v3511_v54  ;;  %3716 = vmatpush.bf16.msra.mxu3 %v3511_v54 }
 0x8d5   :  { %3940 = vmatpush.bf16.msrb.mxu1 %v8850_v43  ;;  %v8879_v43 = vld [vmem:[#allocation2 + $0x238] sm:$0xff] }
 0x8d6   :  { %3578 = vmatpush.bf16.msra.mxu2 %v3510_v57  ;;  %3717 = vmatpush.bf16.msra.mxu3 %v3510_v57 }
 0x8d9   :  { %3941 = vmatpush.bf16.msrb.mxu1 %v8849_v27 }
 0x8da   :  { %3579 = vmatpush.bf16.msra.mxu2 %v3509_v52  ;;  %3718 = vmatpush.bf16.msra.mxu3 %v3509_v52 }
 0x8dd   :  { %3942 = vmatpush.bf16.msrb.mxu1 %v8848_v40 }
 0x8de   :  { %3580 = vmatpush.bf16.msra.mxu2 %v3508_v2  ;;  %3719 = vmatpush.bf16.msra.mxu3 %v3508_v2 }
 0x8e2   :  { %3581 = vmatpush.bf16.msra.mxu2 %v9850_v20  ;;  %3720 = vmatpush.bf16.msra.mxu3 %v9850_v20 }
 0x8e6   :  { %3582 = vmatpush.bf16.msra.mxu2 %v9841_v18  ;;  %3721 = vmatpush.bf16.msra.mxu3 %v9841_v18 }
 0x8ea   :  { %3583 = vmatpush.bf16.msra.mxu2 %v9832_v39  ;;  %3722 = vmatpush.bf16.msra.mxu3 %v9832_v39 }
 0x8ee   :  { %3584 = vmatpush.bf16.msra.mxu2 %v9823_v15  ;;  %3723 = vmatpush.bf16.msra.mxu3 %v9823_v15 }
 0x8f1   :  { %3585 = vmatmul.bf16.vlgmr.msra.gmra.mxu2 %v8840_v17  ;;  %3724 = vmatmul.bf16.vlgmr.msra.gmra.mxu3 %v8856_v48 }
 0x8f2   :  { %4049 = vmatpush.bf16.msrb.mxu2 %v3511_v54 }
 0x8f6   :  { %4050 = vmatpush.bf16.msrb.mxu2 %v3510_v57 }
 0x8fa   :  { %4051 = vmatpush.bf16.msrb.mxu2 %v3509_v52  ;;  %v8876_v52 = vld [vmem:[#allocation2 + $0x220] sm:$0xff] }
 0x8fe   :  { %4052 = vmatpush.bf16.msrb.mxu2 %v3508_v2 }
 0x901   :  { %3590 = vmatmul.bf16.gmra.mxu2 %v8841_v25  ;;  %3729 = vmatmul.bf16.gmra.mxu3 %v8857_v47  ;;  %v8877_v47 = vld [vmem:[#allocation2 + $0x228] sm:$0xff] }
 0x902   :  { %4053 = vmatpush.bf16.msrb.mxu2 %v9850_v20  ;;  %v8871_v20 = vld [vmem:[#allocation6 + $0x1b8] sm:$0xff] }
 0x903   :  { %3838 = vmatpush.bf16.msrb.mxu0 %v8871_v20 }
 0x906   :  { %4054 = vmatpush.bf16.msrb.mxu2 %v9841_v18  ;;  %v8845_v18 = vld [vmem:[#allocation2 + $0x1e8] sm:$0xff] }
 0x90a   :  { %4055 = vmatpush.bf16.msrb.mxu2 %v9832_v39  ;;  %v8861_v39 = vld [vmem:[#allocation2 + $0x1a8] sm:$0xff] }
 0x90e   :  { %4056 = vmatpush.bf16.msrb.mxu2 %v9823_v15  ;;  %v8870_v15 = vld [vmem:[#allocation6 + $0x1b0] sm:$0xff] }
 0x90f   :  { %3839 = vmatpush.bf16.msrb.mxu0 %v8870_v15  ;;  %v8878_v15 = vld [vmem:[#allocation2 + $0x230] sm:$0xff] }
 0x911   :  { %3595 = vmatmul.bf16.gmra.mxu2 %v8842_v6  ;;  %3734 = vmatmul.bf16.gmra.mxu3 %v8858_v41  ;;  %v8887_v6 = vld [vmem:[#allocation6 + $0x238] sm:$0xff]  ;;  %v8886_v41 = vld [vmem:[#allocation6 + $0x230] sm:$0xff] }
 0x912   :  { %4171 = vmatpush.bf16.msrb.mxu3 %v8887_v6 }
 0x913   :  { %3840 = vmatpush.bf16.msrb.mxu0 %v8869_v19  ;;  %v8882_v19 = vld [vmem:[#allocation6 + $0x210] sm:$0xff] }
 0x916   :  { %4172 = vmatpush.bf16.msrb.mxu3 %v8886_v41 }
 0x917   :  { %3841 = vmatpush.bf16.msrb.mxu0 %v8868_v35 }
 0x91b   :  { %3842 = vmatpush.bf16.msrb.mxu0 %v8867_v46  ;;  %v8880_v46 = vld [vmem:[#allocation6 + $0x200] sm:$0xff] }
 0x91f   :  { %3843 = vmatpush.bf16.msrb.mxu0 %v8866_v0 }
 0x921   :  { %3600 = vmatmul.bf16.gmra.mxu2 %v8843_v24  ;;  %3739 = vmatmul.bf16.gmra.mxu3 %v8859_v50 }
 0x923   :  { %3844 = vmatpush.bf16.msrb.mxu0 %v8865_v8 }
 0x927   :  { %3845 = vmatpush.bf16.msrb.mxu0 %v8864_v4 }
 0x931   :  { %3605 = vmatmul.bf16.gmra.mxu2 %v8844_v14  ;;  %3744 = vmatmul.bf16.gmra.mxu3 %v8860_v37  ;;  %v8885_v14 = vld [vmem:[#allocation6 + $0x228] sm:$0xff]  ;;  %v8884_v37 = vld [vmem:[#allocation6 + $0x220] sm:$0xff] }
 0x932   :  { %4173 = vmatpush.bf16.msrb.mxu3 %v8885_v14 }
 0x936   :  { %4174 = vmatpush.bf16.msrb.mxu3 %v8884_v37 }
 0x93a   :  { %4175 = vmatpush.bf16.msrb.mxu3 %v8883_v56 }
 0x93e   :  { %4176 = vmatpush.bf16.msrb.mxu3 %v8882_v19 }
 0x941   :  { %3610 = vmatmul.bf16.gmra.mxu2 %v8845_v18  ;;  %3749 = vmatmul.bf16.gmra.mxu3 %v8861_v39 }
 0x942   :  { %4177 = vmatpush.bf16.msrb.mxu3 %v8881_v10 }
 0x946   :  { %4178 = vmatpush.bf16.msrb.mxu3 %v8880_v46 }
 0x951   :  { %3615 = vmatmul.bf16.gmra.mxu2 %v8846_v7  ;;  %3754 = vmatmul.bf16.gmra.mxu3 %v8862_v13 }
 0x961   :  { %3620 = vmatmul.bf16.gmra.mxu2 %v8847_v12  ;;  %3759 = vmatmul.bf16.gmra.mxu3 %v8863_v44 }
 0x971   :  { %4057 = vmatmul.bf16.vlgmr.msrb.gmra.mxu2 %v8872_v60 }
 0x974   :  { %v3586_v59 = vpop.f32.mrf.mxu2  ;;  %v3725_v33 = vpop.f32.mrf.mxu3 }
 0x97c   :  { %v3588_v63 = vpop.f32.mrf.mxu2  ;;  %v3727_v42 = vpop.f32.mrf.mxu3 }
 0x97d   :  { %v9890_v3 = vpack.c.bf16 %v3588_v63, %v3586_v59  ;;  %v3765_v53 = vpack.c.bf16 %v3727_v42, %v3725_v33 }
 0x97f   :  { %3846 = vmatmul.bf16.vlgmr.msrb.gmra.mxu0 %v3765_v53  ;;  %3943 = vmatmul.bf16.vlgmr.msrb.gmra.mxu1 %v9890_v3 }
 0x981   :  { %4062 = vmatmul.bf16.gmra.mxu2 %v8873_v31 }
 0x984   :  { %v3591_v23 = vpop.f32.mrf.mxu2  ;;  %v3730_v26 = vpop.f32.mrf.mxu3 }
 0x98c   :  { %v3593_v34 = vpop.f32.mrf.mxu2  ;;  %v3732_v21 = vpop.f32.mrf.mxu3 }
 0x98d   :  { %v9893_v5 = vpack.c.bf16 %v3593_v34, %v3591_v23  ;;  %v3766_v38 = vpack.c.bf16 %v3732_v21, %v3730_v26 }
 0x98f   :  { %3851 = vmatmul.bf16.gmra.mxu0 %v3766_v38  ;;  %3948 = vmatmul.bf16.gmra.mxu1 %v9893_v5 }
 0x991   :  { %4067 = vmatmul.bf16.gmra.mxu2 %v8874_v32 }
 0x994   :  { %v3596_v1 = vpop.f32.mrf.mxu2  ;;  %v3735_v62 = vpop.f32.mrf.mxu3 }
 0x99c   :  { %v3598_v22 = vpop.f32.mrf.mxu2  ;;  %v3737_v49 = vpop.f32.mrf.mxu3 }
 0x99d   :  { %v9896_v54 = vpack.c.bf16 %v3598_v22, %v3596_v1  ;;  %v3767_v45 = vpack.c.bf16 %v3737_v49, %v3735_v62 }
 0x99f   :  { %3856 = vmatmul.bf16.gmra.mxu0 %v3767_v45  ;;  %3953 = vmatmul.bf16.gmra.mxu1 %v9896_v54 }
 0x9a1   :  { %4072 = vmatmul.bf16.gmra.mxu2 %v8875_v55 }
 0x9a4   :  { %v3601_v16 = vpop.f32.mrf.mxu2  ;;  %v3740_v61 = vpop.f32.mrf.mxu3 }
 0x9ac   :  { %v3603_v29 = vpop.f32.mrf.mxu2  ;;  %v3742_v57 = vpop.f32.mrf.mxu3 }
 0x9ad   :  { %v9899_v36 = vpack.c.bf16 %v3603_v29, %v3601_v16  ;;  %v3768_v51 = vpack.c.bf16 %v3742_v57, %v3740_v61 }
 0x9af   :  { %3861 = vmatmul.bf16.gmra.mxu0 %v3768_v51  ;;  %3958 = vmatmul.bf16.gmra.mxu1 %v9899_v36 }
 0x9b1   :  { %4077 = vmatmul.bf16.gmra.mxu2 %v8876_v52 }
 0x9b4   :  { %v3606_v11 = vpop.f32.mrf.mxu2  ;;  %v3745_v58 = vpop.f32.mrf.mxu3 }
 0x9bc   :  { %v3608_v2 = vpop.f32.mrf.mxu2  ;;  %v3747_v17 = vpop.f32.mrf.mxu3 }
 0x9bd   :  { %v9902_v48 = vpack.c.bf16 %v3608_v2, %v3606_v11  ;;  %v3769_v25 = vpack.c.bf16 %v3747_v17, %v3745_v58 }
 0x9bf   :  { %3866 = vmatmul.bf16.gmra.mxu0 %v3769_v25  ;;  %3963 = vmatmul.bf16.gmra.mxu1 %v9902_v48 }
 0x9c1   :  { %4082 = vmatmul.bf16.gmra.mxu2 %v8877_v47 }
 0x9c4   :  { %v3611_v24 = vpop.f32.mrf.mxu2  ;;  %v3750_v50 = vpop.f32.mrf.mxu3 }
 0x9cc   :  { %v3613_v20 = vpop.f32.mrf.mxu2  ;;  %v3752_v28 = vpop.f32.mrf.mxu3 }
 0x9cd   :  { %v9905_v18 = vpack.c.bf16 %v3613_v20, %v3611_v24  ;;  %v3770_v39 = vpack.c.bf16 %v3752_v28, %v3750_v50 }
 0x9cf   :  { %3871 = vmatmul.bf16.gmra.mxu0 %v3770_v39  ;;  %3968 = vmatmul.bf16.gmra.mxu1 %v9905_v18 }
 0x9d1   :  { %4087 = vmatmul.bf16.gmra.mxu2 %v8878_v15 }
 0x9d4   :  { %v3616_v30 = vpop.f32.mrf.mxu2  ;;  %v3755_v35 = vpop.f32.mrf.mxu3 }
 0x9dc   :  { %v3618_v9 = vpop.f32.mrf.mxu2  ;;  %v3757_v7 = vpop.f32.mrf.mxu3 }
 0x9dd   :  { %v9908_v13 = vpack.c.bf16 %v3618_v9, %v3616_v30  ;;  %v3771_v0 = vpack.c.bf16 %v3757_v7, %v3755_v35 }
 0x9df   :  { %3876 = vmatmul.bf16.gmra.mxu0 %v3771_v0  ;;  %3973 = vmatmul.bf16.gmra.mxu1 %v9908_v13 }
 0x9e1   :  { %4092 = vmatmul.bf16.gmra.mxu2 %v8879_v43 }
 0x9e4   :  { %v3621_v8 = vpop.f32.mrf.mxu2  ;;  %v3760_v27 = vpop.f32.mrf.mxu3 }
 0x9ec   :  { %v3623_v4 = vpop.f32.mrf.mxu2  ;;  %v3762_v40 = vpop.f32.mrf.mxu3 }
 0x9ed   :  { %v9911_v12 = vpack.c.bf16 %v3623_v4, %v3621_v8  ;;  %v3772_v44 = vpack.c.bf16 %v3762_v40, %v3760_v27 }
 0x9ef   :  { %3881 = vmatmul.bf16.gmra.mxu0 %v3772_v44  ;;  %3978 = vmatmul.bf16.gmra.mxu1 %v9911_v12 }
 0x9f4   :  { %v4058_v60 = vpop.f32.mrf.mxu2 }
 0x9fc   :  { %v3847_v59 = vpop.f32.mrf.mxu0  ;;  %v3944_v33 = vpop.f32.mrf.mxu1 }
 0x9fd   :  { %v3945_v63 = vadd.f32 %v3944_v33, %v3847_v59  ;;  %v4060_v42 = vpop.f32.mrf.mxu2 }
 0x9fe   :  { %v4098_v53 = vpack.c.bf16 %v4060_v42, %v4058_v60 }
 0xa00   :  { %4179 = vmatmul.bf16.vlgmr.msrb.gmra.mxu3 %v4098_v53 }
 0xa04   :  { %v9914_v31 = vpop.f32.mrf.mxu0  ;;  %v9916_v23 = vpop.f32.mrf.mxu1 }
 0xa05   :  { %v4063_v26 = vpop.f32.mrf.mxu2 }
 0xa0c   :  { %v3852_v34 = vpop.f32.mrf.mxu0  ;;  %v3949_v21 = vpop.f32.mrf.mxu1 }
 0xa0d   :  { %v3950_v38 = vadd.f32 %v3949_v21, %v3852_v34  ;;  %v4065_v32 = vpop.f32.mrf.mxu2 }
 0xa0e   :  { %v4099_v1 = vpack.c.bf16 %v4065_v32, %v4063_v26 }
 0xa10   :  { %4184 = vmatmul.bf16.gmra.mxu3 %v4099_v1 }
 0xa14   :  { %v9918_v62 = vpop.f32.mrf.mxu0  ;;  %v9920_v22 = vpop.f32.mrf.mxu1 }
 0xa15   :  { %v4068_v49 = vpop.f32.mrf.mxu2 }
 0xa1c   :  { %v3857_v45 = vpop.f32.mrf.mxu0  ;;  %v3954_v55 = vpop.f32.mrf.mxu1 }
 0xa1d   :  { %v3955_v16 = vadd.f32 %v3954_v55, %v3857_v45  ;;  %v4070_v61 = vpop.f32.mrf.mxu2 }
 0xa1e   :  { %v4100_v29 = vpack.c.bf16 %v4070_v61, %v4068_v49 }
 0xa20   :  { %4189 = vmatmul.bf16.gmra.mxu3 %v4100_v29 }
 0xa24   :  { %v9922_v57 = vpop.f32.mrf.mxu0  ;;  %v9924_v51 = vpop.f32.mrf.mxu1 }
 0xa25   :  { %v4073_v52 = vpop.f32.mrf.mxu2 }
 0xa2c   :  { %v3862_v11 = vpop.f32.mrf.mxu0  ;;  %v3959_v58 = vpop.f32.mrf.mxu1 }
 0xa2d   :  { %v3960_v2 = vadd.f32 %v3959_v58, %v3862_v11  ;;  %v4075_v17 = vpop.f32.mrf.mxu2 }
 0xa2e   :  { %v4101_v25 = vpack.c.bf16 %v4075_v17, %v4073_v52 }
 0xa30   :  { %4194 = vmatmul.bf16.gmra.mxu3 %v4101_v25 }
 0xa34   :  { %v9926_v47 = vpop.f32.mrf.mxu0  ;;  %v9928_v6 = vpop.f32.mrf.mxu1 }
 0xa35   :  { %v4078_v41 = vpop.f32.mrf.mxu2 }
 0xa3c   :  { %v3867_v24 = vpop.f32.mrf.mxu0  ;;  %v3964_v50 = vpop.f32.mrf.mxu1 }
 0xa3d   :  { %v3965_v14 = vadd.f32 %v3964_v50, %v3867_v24  ;;  %v4080_v37 = vpop.f32.mrf.mxu2 }
 0xa3e   :  { %v4102_v20 = vpack.c.bf16 %v4080_v37, %v4078_v41 }
 0xa40   :  { %4199 = vmatmul.bf16.gmra.mxu3 %v4102_v20 }
 0xa44   :  { %v3869_v33 = vpop.f32.mrf.mxu0  ;;  %v3966_v42 = vpop.f32.mrf.mxu1 }
 0xa45   :  { %v4083_v28 = vpop.f32.mrf.mxu2 }
 0xa4c   :  { %v3872_v26 = vpop.f32.mrf.mxu0  ;;  %v3969_v21 = vpop.f32.mrf.mxu1 }
 0xa4d   :  { %v4085_v39 = vpop.f32.mrf.mxu2 }
 0xa4e   :  { %v4103_v15 = vpack.c.bf16 %v4085_v39, %v4083_v28  ;;  %v9944_v28 = vld [vmem:[#allocation7 + $0x2] ss:$0 sm:$0xff] }
 0xa50   :  { %4204 = vmatmul.bf16.gmra.mxu3 %v4103_v15 }
 0xa54   :  { %v3971_v1 = vpop.f32.mrf.mxu1 }
 0xa55   :  { %v4088_v56 = vpop.f32.mrf.mxu2 }
 0xa5c   :  { %v3974_v55 = vpop.f32.mrf.mxu1 }
 0xa5d   :  { %v4090_v19 = vpop.f32.mrf.mxu2 }
 0xa5e   :  { %v4104_v30 = vpack.c.bf16 %v4090_v19, %v4088_v56 }
 0xa60   :  { %4209 = vmatmul.bf16.gmra.mxu3 %v4104_v30 }
 0xa64   :  { %v3976_v29 = vpop.f32.mrf.mxu1 }
 0xa65   :  { %v4093_v35 = vpop.f32.mrf.mxu2 }
 0xa6d   :  { %v4095_v10 = vpop.f32.mrf.mxu2 }
 0xa6e   :  { %v4105_v46 = vpack.c.bf16 %v4095_v10, %v4093_v35  ;;  %v3970_v10 = vadd.f32 %v3969_v21, %v3872_v26 }
 0xa70   :  { %4214 = vmatmul.bf16.gmra.mxu3 %v4105_v46 }
 0xa83   :  { %v4180_v9 = vpop.f32.mrf.mxu3 }
 0xa84   :  { %v9930_v7 = vadd.f32 %v4180_v9, %v3945_v63 }
 0xa8b   :  { %v9932_v0 = vpop.f32.mrf.mxu3 }
 0xa93   :  { %v4185_v43 = vpop.f32.mrf.mxu3 }
 0xa94   :  { %v9934_v8 = vadd.f32 %v4185_v43, %v3950_v38  ;;  %v3874_v38 = vpop.f32.mrf.mxu0 }
 0xa95   :  { %v3972_v56 = vadd.f32 %v3971_v1, %v3874_v38 }
 0xa9b   :  { %v9936_v27 = vpop.f32.mrf.mxu3 }
 0xa9c   :  { %v3877_v45 = vpop.f32.mrf.mxu0 }
 0xa9d   :  { %v3975_v37 = vadd.f32 %v3974_v55, %v3877_v45 }
 0xaa3   :  { %v4190_v4 = vpop.f32.mrf.mxu3 }
 0xaa4   :  { %v9938_v40 = vadd.f32 %v4190_v4, %v3955_v16  ;;  %v3879_v61 = vpop.f32.mrf.mxu0  ;;  %v3967_v4 = vadd.f32 %v3966_v42, %v3869_v33 }
 0xaa5   :  { %v3977_v50 = vadd.f32 %v3976_v29, %v3879_v61 }
 0xaab   :  { %v9940_v44 = vpop.f32.mrf.mxu3 }
 0xaac   :  { %v3882_v58 = vpop.f32.mrf.mxu0 }
 0xab3   :  { %v4195_v60 = vpop.f32.mrf.mxu3 }
 0xab4   :  { %v9942_v59 = vadd.f32 %v4195_v60, %v3960_v2  ;;  %v3979_v2 = vpop.f32.mrf.mxu1  ;;  %v3884_v41 = vpop.f32.mrf.mxu0 }
 0xab5   :  { %v3980_v25 = vadd.f32 %v3979_v2, %v3882_v58 }
 0xabb   :  { %v4197_v53 = vpop.f32.mrf.mxu3 }
 0xabc   :  { %v3981_v24 = vpop.f32.mrf.mxu1 }
 0xabd   :  { %v3982_v20 = vadd.f32 %v3981_v24, %v3884_v41 }
 0xac3   :  { %v4200_v63 = vpop.f32.mrf.mxu3 }
 0xac4   :  { %v4228_v34 = vadd.f32 %v4200_v63, %v3965_v14 }
 0xacb   :  { %v4202_v32 = vpop.f32.mrf.mxu3 }
 0xacc   :  { %v4229_v61 = vadd.f32 %v4202_v32, %v3967_v4  ;;  %v3957_v32 = vadd.f32 %v9924_v51, %v9922_v57  ;;  %v8892_v4 = vld [vmem:[#allocation4 + $0x1a0] sm:$0xff] }
 0xace   :  { %v4250_v33 = vadd.f32 %v9944_v28, %v4229_v61  ;;  %v8902_v61 = vld [vmem:[#allocation9 + $0x1b0] sm:$0xff] }
 0xad0   :  { %v4266_v2 = vmax.f32 %v4250_v33, 0.0  ;;  %v8899_v33 = vld [vmem:[#allocation9 + $0x198] sm:$0xff] }
 0xad3   :  { %v4205_v49 = vpop.f32.mrf.mxu3 }
 0xad4   :  { %v4230_v60 = vadd.f32 %v4205_v49, %v3970_v10  ;;  %v8890_v10 = vld [vmem:[#allocation4 + $0x190] sm:$0xff] }
 0xad6   :  { %v4251_v26 = vadd.f32 %v9944_v28, %v4230_v60  ;;  %v8908_v60 = vld [vmem:[#allocation4 + $0x1e0] sm:$0xff] }
 0xad8   :  { %v4267_v58 = vmax.f32 %v4251_v26, 0.0  ;;  %v8916_v26 = vld [vmem:[#allocation9 + $0x1e0] sm:$0xff] }
 0xadb   :  { %v4207_v16 = vpop.f32.mrf.mxu3 }
 0xadc   :  { %v4231_v46 = vadd.f32 %v4207_v16, %v3972_v56 }
 0xade   :  { %v4252_v29 = vadd.f32 %v9944_v28, %v4231_v46  ;;  %v8906_v46 = vld [vmem:[#allocation4 + $0x1d0] sm:$0xff] }
 0xae0   :  { %v4268_v42 = vmax.f32 %v4252_v29, 0.0  ;;  %v8893_v29 = vld [vmem:[#allocation4 + $0x1a8] sm:$0xff] }
 0xae3   :  { %v4210_v52 = vpop.f32.mrf.mxu3 }
 0xae4   :  { %v4232_v19 = vadd.f32 %v4210_v52, %v3975_v37  ;;  %v3962_v52 = vadd.f32 %v9928_v6, %v9926_v47  ;;  %v4225_v47 = vadd.f32 %v9940_v44, %v3957_v32  ;;  %v3947_v44 = vadd.f32 %v9916_v23, %v9914_v31  ;;  %v8894_v32 = vld [vmem:[#allocation4 + $0x1b0] sm:$0xff] }
 0xae6   :  { %v4253_v63 = vadd.f32 %v9944_v28, %v4232_v19  ;;  %v4227_v16 = vadd.f32 %v4197_v53, %v3962_v52  ;;  %v3952_v53 = vadd.f32 %v9920_v22, %v9918_v62  ;;  %v4246_v51 = vadd.f32 %v9944_v28, %v4225_v47  ;;  %v8901_v52 = vld [vmem:[#allocation9 + $0x1a8] sm:$0xff] }
 0xae7   :  { %v4221_v62 = vadd.f32 %v9932_v0, %v3947_v44  ;;  %v8897_v47 = vld [vmem:[#allocation9 + $0x188] sm:$0xff] }
 0xae8   :  { %v4269_v21 = vmax.f32 %v4253_v63, 0.0  ;;  %v4248_v6 = vadd.f32 %v9944_v28, %v4227_v16  ;;  %v4223_v57 = vadd.f32 %v9936_v27, %v3952_v53  ;;  %v4243_v27 = vadd.f32 %v9944_v28, %v9934_v8  ;;  %v8888_v8 = vld [vmem:[#allocation4 + $0x180] sm:$0xff]  ;;  %v8911_v53 = vld [vmem:[#allocation4 + $0x1f8] sm:$0xff] }
 0xae9   :  { %v4242_v31 = vadd.f32 %v9944_v28, %v4221_v62  ;;  %v8919_v63 = vld [vmem:[#allocation9 + $0x1f8] sm:$0xff] }
 0xaea   :  { %v4244_v22 = vadd.f32 %v9944_v28, %v4223_v57  ;;  %4607 = vmatpush.bf16.msra.mxu2 %v8919_v63  ;;  %v8915_v16 = vld [vmem:[#allocation9 + $0x1d8] sm:$0xff] }
 0xaeb   :  { %v4212_v11 = vpop.f32.mrf.mxu3  ;;  %v4258_v0 = vmax.f32 %v4242_v31, 0.0 }
 0xaec   :  { %v4233_v39 = vadd.f32 %v4212_v11, %v3977_v50  ;;  %v4249_v11 = vadd.f32 %v9944_v28, %v4228_v34  ;;  %v4264_v34 = vmax.f32 %v4248_v6, 0.0  ;;  %v4245_v50 = vadd.f32 %v9944_v28, %v9938_v40  ;;  %v8912_v6 = vld [vmem:[#allocation9 + $0x1c0] sm:$0xff] }
 0xaed   :  { %v4260_v23 = vmax.f32 %v4244_v22, 0.0  ;;  %v4241_v40 = vadd.f32 %v9944_v28, %v9930_v7  ;;  %v8889_v7 = vld [vmem:[#allocation4 + $0x188] sm:$0xff] }
 0xaee   :  { %v4254_v9 = vadd.f32 %v9944_v28, %v4233_v39  ;;  %v4265_v41 = vmax.f32 %v4249_v11, 0.0  ;;  %v8910_v11 = vld [vmem:[#allocation4 + $0x1f0] sm:$0xff] }
 0xaef   :  { %v4257_v19 = vmax.f32 %v4241_v40, 0.0 }
 0xaf0   :  { %v4270_v38 = vmax.f32 %v4254_v9, 0.0  ;;  %v4277_v24 = vpack.c.bf16 %v4266_v2, %v4265_v41  ;;  %v8891_v9 = vld [vmem:[#allocation4 + $0x198] sm:$0xff]  ;;  %v8896_v2 = vld [vmem:[#allocation9 + $0x180] sm:$0xff] }
 0xaf2   :  { %v4279_v49 = vpack.c.bf16 %v4270_v38, %v4269_v21  ;;  %v8909_v38 = vld [vmem:[#allocation4 + $0x1e8] sm:$0xff] }
 0xaf3   :  { %v4215_v17 = vpop.f32.mrf.mxu3  ;;  %v8900_v21 = vld [vmem:[#allocation9 + $0x1a0] sm:$0xff] }
 0xaf4   :  { %v4234_v14 = vadd.f32 %v4215_v17, %v3980_v25  ;;  %v4278_v17 = vpack.c.bf16 %v4268_v42, %v4267_v58  ;;  %v4247_v25 = vadd.f32 %v9944_v28, %v9942_v59  ;;  %v4262_v59 = vmax.f32 %v4246_v51, 0.0  ;;  %v8914_v42 = vld [vmem:[#allocation9 + $0x1d0] sm:$0xff]  ;;  %v8913_v58 = vld [vmem:[#allocation9 + $0x1c8] sm:$0xff] }
 0xaf6   :  { %v4255_v30 = vadd.f32 %v9944_v28, %v4234_v14  ;;  %v4263_v14 = vmax.f32 %v4247_v25, 0.0  ;;  %v8920_v25 = vld [vmem:[#allocation4 + $0x200] sm:$0xff] }
 0xaf8   :  { %v4271_v45 = vmax.f32 %v4255_v30, 0.0  ;;  %v4276_v37 = vpack.c.bf16 %v4264_v34, %v4263_v14  ;;  %v4273_v30 = vpack.c.bf16 %v4258_v0, %v4257_v19 }
 0xafb   :  { %v4217_v15 = vpop.f32.mrf.mxu3 }
 0xafc   :  { %v4235_v35 = vadd.f32 %v4217_v15, %v3982_v20  ;;  %v4261_v20 = vmax.f32 %v4245_v50, 0.0  ;;  %v4259_v15 = vmax.f32 %v4243_v27, 0.0  ;;  %v8921_v50 = vld [vmem:[#allocation4 + $0x208] sm:$0xff] }
 0xafe   :  { %v4256_v43 = vadd.f32 %v9944_v28, %v4235_v35  ;;  %v4275_v39 = vpack.c.bf16 %v4262_v59, %v4261_v20  ;;  %v4274_v56 = vpack.c.bf16 %v4260_v23, %v4259_v15  ;;  %v8904_v35 = vld [vmem:[#allocation4 + $0x1c0] sm:$0xff]  ;;  %v8905_v28 = vld [vmem:[#allocation4 + $0x1c8] sm:$0xff]  ;;  %v8922_v20 = vld [vmem:[#allocation4 + $0x210] sm:$0xff] }
 0xb00   :  { %v4272_v55 = vmax.f32 %v4256_v43, 0.0  ;;  %v8907_v43 = vld [vmem:[#allocation4 + $0x1d8] sm:$0xff] }
 0xb02   :  { %v4280_v1 = vpack.c.bf16 %v4272_v55, %v4271_v45  ;;  %v8903_v45 = vld [vmem:[#allocation9 + $0x1b8] sm:$0xff]  ;;  %v8918_v55 = vld [vmem:[#allocation9 + $0x1f0] sm:$0xff] }
 0xb03   :  { %4704 = vmatpush.bf16.msra.mxu3 %v8903_v45  ;;  %4608 = vmatpush.bf16.msra.mxu2 %v8918_v55  ;;  %v8935_v45 = vld [vmem:[#allocation9 + $0x238] sm:$0xff] }
 0xb04   :  { %4346 = vmatpush.bf16.msra.mxu0 %v4280_v1  ;;  %4485 = vmatpush.bf16.msra.mxu1 %v4280_v1  ;;  %v8943_v55 = vld [vmem:[%s10425_s7 + $0xb8] sm:$0xff] }
 0xb07   :  { %4705 = vmatpush.bf16.msra.mxu3 %v8902_v61  ;;  %v8934_v61 = vld [vmem:[#allocation9 + $0x230] sm:$0xff] }
 0xb08   :  { %4347 = vmatpush.bf16.msra.mxu0 %v4279_v49  ;;  %4486 = vmatpush.bf16.msra.mxu1 %v4279_v49 }
 0xb0b   :  { %4706 = vmatpush.bf16.msra.mxu3 %v8901_v52 }
 0xb0c   :  { %4348 = vmatpush.bf16.msra.mxu0 %v4278_v17  ;;  %4487 = vmatpush.bf16.msra.mxu1 %v4278_v17 }
 0xb0f   :  { %4707 = vmatpush.bf16.msra.mxu3 %v8900_v21  ;;  %v8941_v21 = vld [vmem:[%s10425_s7 + $0xa8] sm:$0xff] }
 0xb10   :  { %4349 = vmatpush.bf16.msra.mxu0 %v4277_v24  ;;  %4488 = vmatpush.bf16.msra.mxu1 %v4277_v24 }
 0xb13   :  { %4708 = vmatpush.bf16.msra.mxu3 %v8899_v33  ;;  %v8940_v33 = vld [vmem:[%s10425_s7 + $0xa0] sm:$0xff] }
 0xb14   :  { %4350 = vmatpush.bf16.msra.mxu0 %v4276_v37  ;;  %4489 = vmatpush.bf16.msra.mxu1 %v4276_v37 }
 0xb18   :  { %4351 = vmatpush.bf16.msra.mxu0 %v4275_v39  ;;  %4490 = vmatpush.bf16.msra.mxu1 %v4275_v39 }
 0xb1c   :  { %4352 = vmatpush.bf16.msra.mxu0 %v4274_v56  ;;  %4491 = vmatpush.bf16.msra.mxu1 %v4274_v56 }
 0xb20   :  { %4353 = vmatpush.bf16.msra.mxu0 %v4273_v30  ;;  %4492 = vmatpush.bf16.msra.mxu1 %v4273_v30 }
 0xb23   :  { %4354 = vmatmul.bf16.vlgmr.msra.gmra.mxu0 %v8888_v8  ;;  %4493 = vmatmul.bf16.vlgmr.msra.gmra.mxu1 %v8904_v35 }
 0xb24   :  { %4818 = vmatpush.bf16.msrb.mxu0 %v4280_v1  ;;  %v8917_v1 = vld [vmem:[#allocation9 + $0x1e8] sm:$0xff]  ;;  %4940 = vmatpush.bf16.msrb.mxu1 %v8935_v45 }
 0xb25   :  { %4609 = vmatpush.bf16.msra.mxu2 %v8917_v1 }
 0xb28   :  { %4819 = vmatpush.bf16.msrb.mxu0 %v4279_v49  ;;  %v8898_v49 = vld [vmem:[#allocation9 + $0x190] sm:$0xff]  ;;  %4941 = vmatpush.bf16.msrb.mxu1 %v8934_v61 }
 0xb29   :  { %4610 = vmatpush.bf16.msra.mxu2 %v8916_v26  ;;  %4709 = vmatpush.bf16.msra.mxu3 %v8898_v49  ;;  %v8933_v26 = vld [vmem:[#allocation9 + $0x228] sm:$0xff] }
 0xb2c   :  { %4820 = vmatpush.bf16.msrb.mxu0 %v4278_v17  ;;  %v8895_v17 = vld [vmem:[#allocation4 + $0x1b8] sm:$0xff]  ;;  %4942 = vmatpush.bf16.msrb.mxu1 %v8933_v26 }
 0xb2d   :  { %4611 = vmatpush.bf16.msra.mxu2 %v8915_v16  ;;  %4710 = vmatpush.bf16.msra.mxu3 %v8897_v47  ;;  %v8932_v16 = vld [vmem:[#allocation9 + $0x220] sm:$0xff]  ;;  %v8939_v47 = vld [vmem:[%s10425_s7 + $0x98] sm:$0xff] }
 0xb30   :  { %4821 = vmatpush.bf16.msrb.mxu0 %v4277_v24  ;;  %4943 = vmatpush.bf16.msrb.mxu1 %v8932_v16 }
 0xb31   :  { %4612 = vmatpush.bf16.msra.mxu2 %v8914_v42  ;;  %4711 = vmatpush.bf16.msra.mxu3 %v8896_v2  ;;  %v8938_v2 = vld [vmem:[%s10425_s7 + $0x90] sm:$0xff] }
 0xb33   :  { %4359 = vmatmul.bf16.gmra.mxu0 %v8889_v7  ;;  %4498 = vmatmul.bf16.gmra.mxu1 %v8905_v28 }
 0xb34   :  { %4822 = vmatpush.bf16.msrb.mxu0 %v4276_v37 }
 0xb35   :  { %4613 = vmatpush.bf16.msra.mxu2 %v8913_v58  ;;  %v8931_v58 = vld [vmem:[#allocation9 + $0x218] sm:$0xff] }
 0xb36   :  { %4944 = vmatpush.bf16.msrb.mxu1 %v8931_v58 }
 0xb38   :  { %4823 = vmatpush.bf16.msrb.mxu0 %v4275_v39 }
 0xb39   :  { %4614 = vmatpush.bf16.msra.mxu2 %v8912_v6  ;;  %v8930_v6 = vld [vmem:[#allocation9 + $0x210] sm:$0xff] }
 0xb3a   :  { %4945 = vmatpush.bf16.msrb.mxu1 %v8930_v6 }
 0xb3c   :  { %4824 = vmatpush.bf16.msrb.mxu0 %v4274_v56  ;;  %v8923_v56 = vld [vmem:[#allocation4 + $0x218] sm:$0xff] }
 0xb3d   :  { %5096 = vmatpush.bf16.msrb.mxu2 %v8943_v55 }
 0xb40   :  { %4825 = vmatpush.bf16.msrb.mxu0 %v4273_v30 }
 0xb43   :  { %4364 = vmatmul.bf16.gmra.mxu0 %v8890_v10  ;;  %4503 = vmatmul.bf16.gmra.mxu1 %v8906_v46  ;;  %v8924_v10 = vld [vmem:[#allocation4 + $0x220] sm:$0xff] }
 0xb53   :  { %4369 = vmatmul.bf16.gmra.mxu0 %v8891_v9  ;;  %4508 = vmatmul.bf16.gmra.mxu1 %v8907_v43 }
 0xb63   :  { %4374 = vmatmul.bf16.gmra.mxu0 %v8892_v4  ;;  %4513 = vmatmul.bf16.gmra.mxu1 %v8908_v60 }
 0xb73   :  { %4379 = vmatmul.bf16.gmra.mxu0 %v8893_v29  ;;  %4518 = vmatmul.bf16.gmra.mxu1 %v8909_v38  ;;  %v8942_v29 = vld [vmem:[%s10425_s7 + $0xb0] sm:$0xff]  ;;  %v8925_v38 = vld [vmem:[#allocation4 + $0x228] sm:$0xff] }
 0xb74   :  { %5097 = vmatpush.bf16.msrb.mxu2 %v8942_v29 }
 0xb78   :  { %5098 = vmatpush.bf16.msrb.mxu2 %v8941_v21 }
 0xb7c   :  { %5099 = vmatpush.bf16.msrb.mxu2 %v8940_v33 }
 0xb80   :  { %5100 = vmatpush.bf16.msrb.mxu2 %v8939_v47 }
 0xb83   :  { %4384 = vmatmul.bf16.gmra.mxu0 %v8894_v32  ;;  %4523 = vmatmul.bf16.gmra.mxu1 %v8910_v11 }
 0xb84   :  { %5101 = vmatpush.bf16.msrb.mxu2 %v8938_v2 }
 0xb93   :  { %4389 = vmatmul.bf16.gmra.mxu0 %v8895_v17  ;;  %4528 = vmatmul.bf16.gmra.mxu1 %v8911_v53  ;;  %v8926_v17 = vld [vmem:[#allocation4 + $0x230] sm:$0xff] }
 0xba0   :  { %v4355_v41 = vpop.f32.mrf.mxu0  ;;  %v4494_v57 = vpop.f32.mrf.mxu1 }
 0xba3   :  { %4826 = vmatmul.bf16.vlgmr.msrb.gmra.mxu0 %v8920_v25 }
 0xba8   :  { %v4357_v51 = vpop.f32.mrf.mxu0  ;;  %v4496_v34 = vpop.f32.mrf.mxu1 }
 0xba9   :  { %v4395_v24 = vpack.c.bf16 %v4357_v51, %v4355_v41  ;;  %v4534_v44 = vpack.c.bf16 %v4496_v34, %v4494_v57  ;;  %v8929_v41 = vld [vmem:[#allocation9 + $0x208] sm:$0xff]  ;;  %v8928_v51 = vld [vmem:[#allocation9 + $0x200] sm:$0xff] }
 0xbaa   :  { %v8937_v57 = vld [vmem:[%s10425_s7 + $0x88] sm:$0xff]  ;;  %4946 = vmatpush.bf16.msrb.mxu1 %v8929_v41  ;;  %v8936_v34 = vld [vmem:[%s10425_s7 + $0x80] sm:$0xff] }
 0xbab   :  { %4615 = vmatmul.bf16.vlgmr.msra.gmra.mxu2 %v4534_v44  ;;  %4712 = vmatmul.bf16.vlgmr.msra.gmra.mxu3 %v4395_v24 }
 0xbac   :  { %5102 = vmatpush.bf16.msrb.mxu2 %v8937_v57 }
 0xbae   :  { %4947 = vmatpush.bf16.msrb.mxu1 %v8928_v51 }
 0xbb0   :  { %v4360_v14 = vpop.f32.mrf.mxu0  ;;  %v4499_v62 = vpop.f32.mrf.mxu1  ;;  %5103 = vmatpush.bf16.msrb.mxu2 %v8936_v34 }
 0xbb3   :  { %4831 = vmatmul.bf16.gmra.mxu0 %v8921_v50 }
 0xbb8   :  { %v4362_v22 = vpop.f32.mrf.mxu0  ;;  %v4501_v59 = vpop.f32.mrf.mxu1 }
 0xbb9   :  { %v4396_v37 = vpack.c.bf16 %v4362_v22, %v4360_v14  ;;  %v4535_v27 = vpack.c.bf16 %v4501_v59, %v4499_v62  ;;  %v8927_v62 = vld [vmem:[#allocation4 + $0x238] sm:$0xff] }
 0xbbb   :  { %4620 = vmatmul.bf16.gmra.mxu2 %v4535_v27  ;;  %4717 = vmatmul.bf16.gmra.mxu3 %v4396_v37 }
 0xbc0   :  { %v4365_v31 = vpop.f32.mrf.mxu0  ;;  %v4504_v23 = vpop.f32.mrf.mxu1 }
 0xbc3   :  { %4836 = vmatmul.bf16.gmra.mxu0 %v8922_v20 }
 0xbc8   :  { %v4367_v39 = vpop.f32.mrf.mxu0  ;;  %v4506_v40 = vpop.f32.mrf.mxu1 }
 0xbc9   :  { %v4397_v15 = vpack.c.bf16 %v4367_v39, %v4365_v31  ;;  %v4536_v0 = vpack.c.bf16 %v4506_v40, %v4504_v23 }
 0xbcb   :  { %4625 = vmatmul.bf16.gmra.mxu2 %v4536_v0  ;;  %4722 = vmatmul.bf16.gmra.mxu3 %v4397_v15 }
 0xbd0   :  { %v4370_v19 = vpop.f32.mrf.mxu0  ;;  %v4509_v30 = vpop.f32.mrf.mxu1 }
 0xbd3   :  { %4841 = vmatmul.bf16.gmra.mxu0 %v8923_v56 }
 0xbd8   :  { %v4372_v8 = vpop.f32.mrf.mxu0  ;;  %v4511_v35 = vpop.f32.mrf.mxu1 }
 0xbd9   :  { %v4398_v7 = vpack.c.bf16 %v4372_v8, %v4370_v19  ;;  %v4537_v28 = vpack.c.bf16 %v4511_v35, %v4509_v30 }
 0xbdb   :  { %4630 = vmatmul.bf16.gmra.mxu2 %v4537_v28  ;;  %4727 = vmatmul.bf16.gmra.mxu3 %v4398_v7 }
 0xbe0   :  { %v4375_v46 = vpop.f32.mrf.mxu0  ;;  %v4514_v9 = vpop.f32.mrf.mxu1 }
 0xbe3   :  { %4846 = vmatmul.bf16.gmra.mxu0 %v8924_v10 }
 0xbe8   :  { %v4377_v43 = vpop.f32.mrf.mxu0  ;;  %v4516_v4 = vpop.f32.mrf.mxu1 }
 0xbe9   :  { %v4399_v60 = vpack.c.bf16 %v4377_v43, %v4375_v46  ;;  %v4538_v63 = vpack.c.bf16 %v4516_v4, %v4514_v9 }
 0xbeb   :  { %4635 = vmatmul.bf16.gmra.mxu2 %v4538_v63  ;;  %4732 = vmatmul.bf16.gmra.mxu3 %v4399_v60 }
 0xbf0   :  { %v4380_v1 = vpop.f32.mrf.mxu0  ;;  %v4519_v52 = vpop.f32.mrf.mxu1 }
 0xbf3   :  { %4851 = vmatmul.bf16.gmra.mxu0 %v8925_v38 }
 0xbf8   :  { %v4382_v42 = vpop.f32.mrf.mxu0  ;;  %v4521_v49 = vpop.f32.mrf.mxu1 }
 0xbf9   :  { %v4400_v32 = vpack.c.bf16 %v4382_v42, %v4380_v1  ;;  %v4539_v11 = vpack.c.bf16 %v4521_v49, %v4519_v52 }
 0xbfb   :  { %4640 = vmatmul.bf16.gmra.mxu2 %v4539_v11  ;;  %4737 = vmatmul.bf16.gmra.mxu3 %v4400_v32 }
 0xc00   :  { %v4385_v53 = vpop.f32.mrf.mxu0  ;;  %v4524_v25 = vpop.f32.mrf.mxu1 }
 0xc03   :  { %4856 = vmatmul.bf16.gmra.mxu0 %v8926_v17 }
 0xc08   :  { %v4387_v24 = vpop.f32.mrf.mxu0  ;;  %v4526_v44 = vpop.f32.mrf.mxu1 }
 0xc09   :  { %v4401_v50 = vpack.c.bf16 %v4387_v24, %v4385_v53  ;;  %v4540_v14 = vpack.c.bf16 %v4526_v44, %v4524_v25 }
 0xc0b   :  { %4645 = vmatmul.bf16.gmra.mxu2 %v4540_v14  ;;  %4742 = vmatmul.bf16.gmra.mxu3 %v4401_v50 }
 0xc10   :  { %v4390_v22 = vpop.f32.mrf.mxu0  ;;  %v4529_v59 = vpop.f32.mrf.mxu1 }
 0xc13   :  { %4861 = vmatmul.bf16.gmra.mxu0 %v8927_v62 }
 0xc18   :  { %v4392_v37 = vpop.f32.mrf.mxu0  ;;  %v4531_v27 = vpop.f32.mrf.mxu1 }
 0xc19   :  { %v4402_v20 = vpack.c.bf16 %v4392_v37, %v4390_v22  ;;  %v4541_v31 = vpack.c.bf16 %v4531_v27, %v4529_v59  ;;  %v10050_v22 = vld [vmem:[#allocation10 + $0x2] ss:$0 sm:$0xff] }
 0xc1b   :  { %4650 = vmatmul.bf16.gmra.mxu2 %v4541_v31  ;;  %4747 = vmatmul.bf16.gmra.mxu3 %v4402_v20 }
 0xc20   :  { %v4827_v23 = vpop.f32.mrf.mxu0 }
 0xc28   :  { %v4829_v39 = vpop.f32.mrf.mxu0 }
 0xc29   :  { %v4867_v40 = vpack.c.bf16 %v4829_v39, %v4827_v23 }
 0xc2b   :  { %4948 = vmatmul.bf16.vlgmr.msrb.gmra.mxu1 %v4867_v40  ;;  %5104 = vmatmul.bf16.vlgmr.msrb.gmra.mxu2 %v9890_v3 }
 0xc2e   :  { %v4616_v15 = vpop.f32.mrf.mxu2  ;;  %v4713_v0 = vpop.f32.mrf.mxu3 }
 0xc2f   :  { %v10002_v56 = vadd.f32 %v4713_v0, %v4616_v15 }
 0xc30   :  { %v4832_v19 = vpop.f32.mrf.mxu0 }
 0xc36   :  { %v10004_v30 = vpop.f32.mrf.mxu2  ;;  %v10006_v8 = vpop.f32.mrf.mxu3 }
 0xc38   :  { %v4834_v35 = vpop.f32.mrf.mxu0 }
 0xc39   :  { %v4868_v7 = vpack.c.bf16 %v4834_v35, %v4832_v19 }
 0xc3b   :  { %4953 = vmatmul.bf16.gmra.mxu1 %v4868_v7  ;;  %5109 = vmatmul.bf16.gmra.mxu2 %v9893_v5 }
 0xc3e   :  { %v4621_v28 = vpop.f32.mrf.mxu2  ;;  %v4718_v10 = vpop.f32.mrf.mxu3 }
 0xc3f   :  { %v10009_v46 = vadd.f32 %v4718_v10, %v4621_v28 }
 0xc40   :  { %v4837_v9 = vpop.f32.mrf.mxu0 }
 0xc46   :  { %v10011_v3 = vpop.f32.mrf.mxu2  ;;  %v10013_v43 = vpop.f32.mrf.mxu3 }
 0xc48   :  { %v4839_v4 = vpop.f32.mrf.mxu0 }
 0xc49   :  { %v4869_v60 = vpack.c.bf16 %v4839_v4, %v4837_v9  ;;  %v4721_v4 = vadd.f32 %v10013_v43, %v10011_v3 }
 0xc4b   :  { %4958 = vmatmul.bf16.gmra.mxu1 %v4869_v60  ;;  %5114 = vmatmul.bf16.gmra.mxu2 %v9896_v54 }
 0xc4e   :  { %v4626_v63 = vpop.f32.mrf.mxu2  ;;  %v4723_v45 = vpop.f32.mrf.mxu3 }
 0xc4f   :  { %v10016_v55 = vadd.f32 %v4723_v45, %v4626_v63 }
 0xc50   :  { %v4842_v61 = vpop.f32.mrf.mxu0 }
 0xc56   :  { %v10018_v5 = vpop.f32.mrf.mxu2  ;;  %v10020_v29 = vpop.f32.mrf.mxu3 }
 0xc58   :  { %v4844_v38 = vpop.f32.mrf.mxu0 }
 0xc59   :  { %v4870_v1 = vpack.c.bf16 %v4844_v38, %v4842_v61 }
 0xc5b   :  { %4963 = vmatmul.bf16.gmra.mxu1 %v4870_v1  ;;  %5119 = vmatmul.bf16.gmra.mxu2 %v9899_v36 }
 0xc5e   :  { %v4631_v52 = vpop.f32.mrf.mxu2  ;;  %v4728_v26 = vpop.f32.mrf.mxu3 }
 0xc5f   :  { %v10023_v21 = vadd.f32 %v4728_v26, %v4631_v52 }
 0xc60   :  { %v4847_v16 = vpop.f32.mrf.mxu0 }
 0xc66   :  { %v10025_v54 = vpop.f32.mrf.mxu2  ;;  %v10027_v33 = vpop.f32.mrf.mxu3 }
 0xc68   :  { %v4849_v42 = vpop.f32.mrf.mxu0 }
 0xc69   :  { %v4871_v49 = vpack.c.bf16 %v4849_v42, %v4847_v16 }
 0xc6b   :  { %4968 = vmatmul.bf16.gmra.mxu1 %v4871_v49  ;;  %5124 = vmatmul.bf16.gmra.mxu2 %v9902_v48 }
 0xc6e   :  { %v4636_v32 = vpop.f32.mrf.mxu2  ;;  %v4733_v11 = vpop.f32.mrf.mxu3 }
 0xc6f   :  { %v10030_v58 = vadd.f32 %v4733_v11, %v4636_v32  ;;  %v4726_v11 = vadd.f32 %v10020_v29, %v10018_v5 }
 0xc70   :  { %v4852_v47 = vpop.f32.mrf.mxu0 }
 0xc76   :  { %v10032_v36 = vpop.f32.mrf.mxu2 }
 0xc78   :  { %v4854_v6 = vpop.f32.mrf.mxu0 }
 0xc79   :  { %v4872_v2 = vpack.c.bf16 %v4854_v6, %v4852_v47 }
 0xc7b   :  { %4973 = vmatmul.bf16.gmra.mxu1 %v4872_v2  ;;  %5129 = vmatmul.bf16.gmra.mxu2 %v9905_v18 }
 0xc7e   :  { %v10035_v17 = vpop.f32.mrf.mxu2 }
 0xc80   :  { %v4857_v53 = vpop.f32.mrf.mxu0 }
 0xc86   :  { %v10037_v25 = vpop.f32.mrf.mxu2 }
 0xc88   :  { %v4859_v41 = vpop.f32.mrf.mxu0 }
 0xc89   :  { %v4873_v57 = vpack.c.bf16 %v4859_v41, %v4857_v53 }
 0xc8b   :  { %4978 = vmatmul.bf16.gmra.mxu1 %v4873_v57  ;;  %5134 = vmatmul.bf16.gmra.mxu2 %v9908_v13  ;;  %v10052_v13 = vld [vmem:[#allocation12 + $0x2] ss:$0 sm:$0xff] }
 0xc8e   :  { %v10040_v48 = vpop.f32.mrf.mxu2 }
 0xc90   :  { %v4862_v51 = vpop.f32.mrf.mxu0 }
 0xc96   :  { %v10042_v34 = vpop.f32.mrf.mxu2 }
 0xc98   :  { %v4864_v24 = vpop.f32.mrf.mxu0 }
 0xc99   :  { %v4874_v44 = vpack.c.bf16 %v4864_v24, %v4862_v51 }
 0xc9b   :  { %4983 = vmatmul.bf16.gmra.mxu1 %v4874_v44  ;;  %5139 = vmatmul.bf16.gmra.mxu2 %v9911_v12  ;;  %v4716_v12 = vadd.f32 %v10006_v8, %v10004_v30 }
 0xc9e   :  { %v10045_v18 = vpop.f32.mrf.mxu2 }
 0xca6   :  { %v10047_v50 = vpop.f32.mrf.mxu2 }
 0xca8   :  { %v4949_v14 = vpop.f32.mrf.mxu1 }
 0xca9   :  { %v4989_v62 = vadd.f32 %v4949_v14, %v10002_v56 }
 0xcab   :  { %v5010_v37 = vadd.f32 %v10050_v22, %v4989_v62 }
 0xcae   :  { %v5105_v59 = vpop.f32.mrf.mxu2 }
 0xcaf   :  { %v5106_v27 = vadd.f32 %v10052_v13, %v5105_v59 }
 0xcb0   :  { %v4951_v20 = vpop.f32.mrf.mxu1 }
 0xcb1   :  { %v5145_v31 = vadd.f32 %v5106_v27, %v5010_v37  ;;  %v4990_v23 = vadd.f32 %v4951_v20, %v4716_v12  ;;  %v4731_v37 = vadd.f32 %v10027_v33, %v10025_v54  ;;  %v4735_v20 = vpop.f32.mrf.mxu3 }
 0xcb3   :  { %v5011_v40 = vadd.f32 %v10050_v22, %v4990_v23  ;;  %v5161_v35 = vmax.f32 %v5145_v31, 0.0 }
 0xcb6   :  { %v5107_v39 = vpop.f32.mrf.mxu2 }
 0xcb7   :  { %v5108_v15 = vadd.f32 %v10052_v13, %v5107_v39 }
 0xcb8   :  { %v4954_v0 = vpop.f32.mrf.mxu1 }
 0xcb9   :  { %v5146_v56 = vadd.f32 %v5108_v15, %v5011_v40  ;;  %v4991_v19 = vadd.f32 %v4954_v0, %v10009_v46 }
 0xcbb   :  { %v5162_v7 = vmax.f32 %v5146_v56, 0.0  ;;  %v5012_v9 = vadd.f32 %v10050_v22, %v4991_v19  ;;  %v4738_v19 = vpop.f32.mrf.mxu3 }
 0xcbd   :  { %v10061_v28 = vpack.c.bf16 %v5162_v7, %v5161_v35 }
 0xcbe   :  { %v5110_v10 = vpop.f32.mrf.mxu2 }
 0xcbf   :  { %v5111_v30 = vadd.f32 %v10052_v13, %v5110_v10 }
 0xcc0   :  { %v4956_v8 = vpop.f32.mrf.mxu1 }
 0xcc1   :  { %v5147_v60 = vadd.f32 %v5111_v30, %v5012_v9  ;;  %v4992_v63 = vadd.f32 %v4956_v8, %v4721_v4 }
 0xcc3   :  { %v5013_v61 = vadd.f32 %v10050_v22, %v4992_v63  ;;  %v5163_v26 = vmax.f32 %v5147_v60, 0.0  ;;  %v4740_v30 = vpop.f32.mrf.mxu3 }
 0xcc6   :  { %v5112_v45 = vpop.f32.mrf.mxu2 }
 0xcc7   :  { %v5113_v46 = vadd.f32 %v10052_v13, %v5112_v45 }
 0xcc8   :  { %v4959_v38 = vpop.f32.mrf.mxu1 }
 0xcc9   :  { %v5148_v1 = vadd.f32 %v5113_v46, %v5013_v61  ;;  %v4993_v52 = vadd.f32 %v4959_v38, %v10016_v55 }
 0xccb   :  { %v5164_v16 = vmax.f32 %v5148_v1, 0.0  ;;  %v5014_v32 = vadd.f32 %v10050_v22, %v4993_v52  ;;  %v4743_v63 = vpop.f32.mrf.mxu3 }
 0xccd   :  { %v10070_v42 = vpack.c.bf16 %v5164_v16, %v5163_v26 }
 0xcce   :  { %v5115_v49 = vpop.f32.mrf.mxu2 }
 0xccf   :  { %v5116_v3 = vadd.f32 %v10052_v13, %v5115_v49 }
 0xcd0   :  { %v4961_v43 = vpop.f32.mrf.mxu1 }
 0xcd1   :  { %v5149_v47 = vadd.f32 %v5116_v3, %v5014_v32  ;;  %v4994_v6 = vadd.f32 %v4961_v43, %v4726_v11 }
 0xcd3   :  { %v5015_v53 = vadd.f32 %v10050_v22, %v4994_v6  ;;  %v5165_v24 = vmax.f32 %v5149_v47, 0.0  ;;  %v4745_v46 = vpop.f32.mrf.mxu3 }
 0xcd4   :  { %v4746_v11 = vadd.f32 %v4745_v46, %v10042_v34  ;;  %v8961_v46 = vld [vmem:[#allocation2 + $0x248] sm:$0xff] }
 0xcd6   :  { %v5117_v2 = vpop.f32.mrf.mxu2 }
 0xcd7   :  { %v5118_v55 = vadd.f32 %v10052_v13, %v5117_v2  ;;  %v4744_v2 = vadd.f32 %v4743_v63, %v10040_v48 }
 0xcd8   :  { %v4964_v41 = vpop.f32.mrf.mxu1 }
 0xcd9   :  { %v5150_v57 = vadd.f32 %v5118_v55, %v5015_v53  ;;  %v4995_v51 = vadd.f32 %v4964_v41, %v10023_v21 }
 0xcdb   :  { %v5166_v44 = vmax.f32 %v5150_v57, 0.0  ;;  %v5016_v59 = vadd.f32 %v10050_v22, %v4995_v51  ;;  %v4748_v52 = vpop.f32.mrf.mxu3  ;;  %v4741_v57 = vadd.f32 %v4740_v30, %v10037_v25  ;;  %v4736_v25 = vadd.f32 %v4735_v20, %v10032_v36 }
 0xcdc   :  { %v4749_v3 = vadd.f32 %v4748_v52, %v10045_v18  ;;  %v4739_v18 = vadd.f32 %v4738_v19, %v10035_v17  ;;  %v8947_v52 = vld [vmem:[#allocation2 + $0x298] sm:$0xff] }
 0xcdd   :  { %v10079_v14 = vpack.c.bf16 %v5166_v44, %v5165_v24 }
 0xcde   :  { %v5120_v62 = vpop.f32.mrf.mxu2 }
 0xcdf   :  { %v5121_v5 = vadd.f32 %v10052_v13, %v5120_v62 }
 0xce0   :  { %v4966_v29 = vpop.f32.mrf.mxu1 }
 0xce1   :  { %v5151_v27 = vadd.f32 %v5121_v5, %v5016_v59  ;;  %v4996_v12 = vadd.f32 %v4966_v29, %v4731_v37 }
 0xce3   :  { %v5017_v23 = vadd.f32 %v10050_v22, %v4996_v12  ;;  %v5167_v0 = vmax.f32 %v5151_v27, 0.0  ;;  %v4750_v49 = vpop.f32.mrf.mxu3 }
 0xce4   :  { %v4751_v47 = vadd.f32 %v4750_v49, %v10047_v50  ;;  %v8964_v49 = vld [vmem:[#allocation2 + $0x260] sm:$0xff] }
 0xce6   :  { %v5122_v31 = vpop.f32.mrf.mxu2 }
 0xce7   :  { %v5123_v21 = vadd.f32 %v10052_v13, %v5122_v31 }
 0xce8   :  { %v4969_v39 = vpop.f32.mrf.mxu1 }
 0xce9   :  { %v5152_v40 = vadd.f32 %v5123_v21, %v5017_v23  ;;  %v4997_v15 = vadd.f32 %v4969_v39, %v10030_v58 }
 0xceb   :  { %v5168_v56 = vmax.f32 %v5152_v40, 0.0  ;;  %v5018_v54 = vadd.f32 %v10050_v22, %v4997_v15 }
 0xced   :  { %v10088_v35 = vpack.c.bf16 %v5168_v56, %v5167_v0 }
 0xcee   :  { %v5125_v7 = vpop.f32.mrf.mxu2 }
 0xcef   :  { %v5126_v33 = vadd.f32 %v10052_v13, %v5125_v7 }
 0xcf0   :  { %v4971_v10 = vpop.f32.mrf.mxu1 }
 0xcf1   :  { %v10092_v9 = vadd.f32 %v5126_v33, %v5018_v54  ;;  %v4998_v23 = vadd.f32 %v4971_v10, %v4736_v25 }
 0xcf3   :  { %v5019_v54 = vadd.f32 %v10050_v22, %v4998_v23 }
 0xcf6   :  { %v5127_v8 = vpop.f32.mrf.mxu2 }
 0xcf7   :  { %v5128_v56 = vadd.f32 %v10052_v13, %v5127_v8 }
 0xcf8   :  { %v4974_v4 = vpop.f32.mrf.mxu1 }
 0xcf9   :  { %v4999_v37 = vadd.f32 %v4974_v4, %v4739_v18  ;;  %v5154_v10 = vadd.f32 %v5128_v56, %v5019_v54  ;;  %v8969_v18 = vld [vmem:[#allocation6 + $0x248] sm:$0xff]  ;;  %v8979_v54 = vld [vmem:[#allocation2 + $0x2d8] sm:$0xff] }
 0xcfb   :  { %v5020_v19 = vadd.f32 %v10050_v22, %v4999_v37 }
 0xcfe   :  { %v5130_v60 = vpop.f32.mrf.mxu2 }
 0xcff   :  { %v5131_v21 = vadd.f32 %v10052_v13, %v5130_v60 }
 0xd00   :  { %v4976_v45 = vpop.f32.mrf.mxu1 }
 0xd01   :  { %v5000_v62 = vadd.f32 %v4976_v45, %v4741_v57  ;;  %v5155_v33 = vadd.f32 %v5131_v21, %v5020_v19  ;;  %v5170_v45 = vmax.f32 %v5154_v10, 0.0  ;;  %v8971_v57 = vld [vmem:[#allocation6 + $0x258] sm:$0xff] }
 0xd03   :  { %v5021_v39 = vadd.f32 %v10050_v22, %v5000_v62  ;;  %v5171_v63 = vmax.f32 %v5155_v33, 0.0  ;;  %v8951_v62 = vld [vmem:[#allocation2 + $0x2b8] sm:$0xff] }
 0xd06   :  { %v5132_v58 = vpop.f32.mrf.mxu2 }
 0xd07   :  { %v5133_v27 = vadd.f32 %v10052_v13, %v5132_v58 }
 0xd08   :  { %v4979_v61 = vpop.f32.mrf.mxu1 }
 0xd09   :  { %v5001_v51 = vadd.f32 %v4979_v61, %v4744_v2  ;;  %v5156_v36 = vadd.f32 %v5133_v27, %v5021_v39  ;;  %v8960_v61 = vld [vmem:[#allocation2 + $0x240] sm:$0xff]  ;;  %v8950_v2 = vld [vmem:[#allocation2 + $0x2b0] sm:$0xff] }
 0xd0b   :  { %v5022_v12 = vadd.f32 %v10050_v22, %v5001_v51  ;;  %v5172_v4 = vmax.f32 %v5156_v36, 0.0  ;;  %v8953_v51 = vld [vmem:[#allocation6 + $0x288] sm:$0xff] }
 0xd0d   :  { %v5182_v58 = vpack.c.bf16 %v5172_v4, %v5171_v63 }
 0xd0e   :  { %v5135_v38 = vpop.f32.mrf.mxu2 }
 0xd0f   :  { %v5136_v34 = vadd.f32 %v10052_v13, %v5135_v38  ;;  %v8946_v38 = vld [vmem:[#allocation2 + $0x290] sm:$0xff] }
 0xd10   :  { %v4981_v1 = vpop.f32.mrf.mxu1 }
 0xd11   :  { %v5002_v53 = vadd.f32 %v4981_v1, %v4746_v11  ;;  %v5157_v40 = vadd.f32 %v5136_v34, %v5022_v12  ;;  %v8962_v1 = vld [vmem:[#allocation2 + $0x250] sm:$0xff]  ;;  %v8956_v11 = vld [vmem:[#allocation6 + $0x2a0] sm:$0xff]  ;;  %v8967_v34 = vld [vmem:[#allocation2 + $0x278] sm:$0xff] }
 0xd12   :  { %v8977_v12 = vld [vmem:[#allocation2 + $0x2c8] sm:$0xff] }
 0xd13   :  { %v5023_v59 = vadd.f32 %v10050_v22, %v5002_v53  ;;  %v5173_v30 = vmax.f32 %v5157_v40, 0.0  ;;  %v8966_v53 = vld [vmem:[#allocation2 + $0x270] sm:$0xff] }
 0xd16   :  { %v5137_v26 = vpop.f32.mrf.mxu2 }
 0xd17   :  { %v5138_v24 = vadd.f32 %v10052_v13, %v5137_v26  ;;  %v8963_v26 = vld [vmem:[#allocation2 + $0x258] sm:$0xff] }
 0xd18   :  { %v4984_v16 = vpop.f32.mrf.mxu1 }
 0xd19   :  { %v5003_v6 = vadd.f32 %v4984_v16, %v4749_v3  ;;  %v5158_v31 = vadd.f32 %v5138_v24, %v5023_v59  ;;  %v8948_v16 = vld [vmem:[#allocation2 + $0x2a0] sm:$0xff]  ;;  %v8957_v3 = vld [vmem:[#allocation6 + $0x2a8] sm:$0xff]  ;;  %v8970_v24 = vld [vmem:[#allocation6 + $0x250] sm:$0xff] }
 0xd1a   :  { %v8976_v59 = vld [vmem:[#allocation2 + $0x2c0] sm:$0xff] }
 0xd1b   :  { %v5024_v44 = vadd.f32 %v10050_v22, %v5003_v6  ;;  %v5174_v20 = vmax.f32 %v5158_v31, 0.0  ;;  %v8955_v6 = vld [vmem:[#allocation6 + $0x298] sm:$0xff] }
 0xd1d   :  { %v5183_v60 = vpack.c.bf16 %v5174_v20, %v5173_v30 }
 0xd1e   :  { %v5140_v32 = vpop.f32.mrf.mxu2 }
 0xd1f   :  { %v5141_v55 = vadd.f32 %v10052_v13, %v5140_v32  ;;  %v8949_v32 = vld [vmem:[#allocation2 + $0x2a8] sm:$0xff] }
 0xd20   :  { %v4986_v43 = vpop.f32.mrf.mxu1 }
 0xd21   :  { %v5004_v41 = vadd.f32 %v4986_v43, %v4751_v47  ;;  %v5159_v48 = vadd.f32 %v5141_v55, %v5024_v44  ;;  %v8974_v43 = vld [vmem:[#allocation6 + $0x270] sm:$0xff]  ;;  %v8973_v47 = vld [vmem:[#allocation6 + $0x268] sm:$0xff]  ;;  %v8972_v55 = vld [vmem:[#allocation6 + $0x260] sm:$0xff] }
 0xd22   :  { %v8952_v44 = vld [vmem:[#allocation6 + $0x280] sm:$0xff] }
 0xd23   :  { %v5025_v5 = vadd.f32 %v10050_v22, %v5004_v41  ;;  %v5175_v15 = vmax.f32 %v5159_v48, 0.0  ;;  %v8944_v22 = vld [vmem:[#allocation2 + $0x280] sm:$0xff]  ;;  %v8954_v41 = vld [vmem:[#allocation6 + $0x290] sm:$0xff] }
 0xd26   :  { %v5142_v50 = vpop.f32.mrf.mxu2 }
 0xd27   :  { %v5143_v29 = vadd.f32 %v10052_v13, %v5142_v50  ;;  %v5169_v13 = vmax.f32 %v10092_v9, 0.0  ;;  %v8945_v9 = vld [vmem:[#allocation2 + $0x288] sm:$0xff]  ;;  %v8968_v50 = vld [vmem:[#allocation6 + $0x240] sm:$0xff] }
 0xd29   :  { %v5160_v17 = vadd.f32 %v5143_v29, %v5025_v5  ;;  %v5181_v8 = vpack.c.bf16 %v5170_v45, %v5169_v13  ;;  %v8980_v45 = vld [vmem:[#allocation2 + $0x2e0] sm:$0xff] }
 0xd2b   :  { %v5176_v0 = vmax.f32 %v5160_v17, 0.0 }
 0xd2d   :  { %v5184_v7 = vpack.c.bf16 %v5176_v0, %v5175_v15  ;;  %v8978_v15 = vld [vmem:[#allocation2 + $0x2d0] sm:$0xff] }
 0xd2f   :  { %5250 = vmatpush.bf16.msrb.mxu3 %v5184_v7  ;;  %5389 = vmatpush.bf16.msra.mxu0 %v5184_v7 }
 0xd33   :  { %5251 = vmatpush.bf16.msrb.mxu3 %v5183_v60  ;;  %5390 = vmatpush.bf16.msra.mxu0 %v5183_v60 }
 0xd37   :  { %5252 = vmatpush.bf16.msrb.mxu3 %v5182_v58  ;;  %5391 = vmatpush.bf16.msra.mxu0 %v5182_v58 }
 0xd3b   :  { %5253 = vmatpush.bf16.msrb.mxu3 %v5181_v8  ;;  %5392 = vmatpush.bf16.msra.mxu0 %v5181_v8 }
 0xd3f   :  { %5254 = vmatpush.bf16.msrb.mxu3 %v10088_v35  ;;  %5393 = vmatpush.bf16.msra.mxu0 %v10088_v35 }
 0xd43   :  { %5255 = vmatpush.bf16.msrb.mxu3 %v10079_v14  ;;  %5394 = vmatpush.bf16.msra.mxu0 %v10079_v14 }
 0xd47   :  { %5256 = vmatpush.bf16.msrb.mxu3 %v10070_v42  ;;  %5395 = vmatpush.bf16.msra.mxu0 %v10070_v42 }
 0xd4b   :  { %5257 = vmatpush.bf16.msrb.mxu3 %v10061_v28  ;;  %5396 = vmatpush.bf16.msra.mxu0 %v10061_v28 }
 0xd4e   :  { %5258 = vmatmul.bf16.vlgmr.msrb.gmra.mxu3 %v8944_v22  ;;  %5397 = vmatmul.bf16.vlgmr.msra.gmra.mxu0 %v8960_v61 }
 0xd4f   :  { %5722 = vmatpush.bf16.msra.mxu3 %v5184_v7 }
 0xd53   :  { %5723 = vmatpush.bf16.msra.mxu3 %v5183_v60 }
 0xd57   :  { %5724 = vmatpush.bf16.msra.mxu3 %v5182_v58 }
 0xd5b   :  { %5725 = vmatpush.bf16.msra.mxu3 %v5181_v8 }
 0xd5e   :  { %5263 = vmatmul.bf16.gmra.mxu3 %v8945_v9  ;;  %5402 = vmatmul.bf16.gmra.mxu0 %v8961_v46  ;;  %v8981_v46 = vld [vmem:[#allocation2 + $0x2e8] sm:$0xff] }
 0xd5f   :  { %5726 = vmatpush.bf16.msra.mxu3 %v10088_v35  ;;  %v8959_v35 = vld [vmem:[#allocation6 + $0x2b8] sm:$0xff] }
 0xd60   :  { %5608 = vmatpush.bf16.msra.mxu2 %v8959_v35 }
 0xd63   :  { %5727 = vmatpush.bf16.msra.mxu3 %v10079_v14  ;;  %v8965_v14 = vld [vmem:[#allocation2 + $0x268] sm:$0xff] }
 0xd67   :  { %5728 = vmatpush.bf16.msra.mxu3 %v10070_v42  ;;  %v8958_v42 = vld [vmem:[#allocation6 + $0x2b0] sm:$0xff] }
 0xd68   :  { %5609 = vmatpush.bf16.msra.mxu2 %v8958_v42 }
 0xd6b   :  { %5729 = vmatpush.bf16.msra.mxu3 %v10061_v28  ;;  %v8975_v28 = vld [vmem:[#allocation6 + $0x278] sm:$0xff] }
 0xd6c   :  { %5511 = vmatpush.bf16.msra.mxu1 %v8975_v28  ;;  %5610 = vmatpush.bf16.msra.mxu2 %v8957_v3  ;;  %v8982_v28 = vld [vmem:[#allocation2 + $0x2f0] sm:$0xff] }
 0xd6e   :  { %5268 = vmatmul.bf16.gmra.mxu3 %v8946_v38  ;;  %5407 = vmatmul.bf16.gmra.mxu0 %v8962_v1  ;;  %v8991_v1 = vld [vmem:[#allocation6 + $0x2f8] sm:$0xff] }
 0xd6f   :  { %5844 = vmatpush.bf16.msrb.mxu0 %v8991_v1 }
 0xd70   :  { %5512 = vmatpush.bf16.msra.mxu1 %v8974_v43  ;;  %5611 = vmatpush.bf16.msra.mxu2 %v8956_v11  ;;  %v8987_v43 = vld [vmem:[#allocation6 + $0x2d8] sm:$0xff]  ;;  %v8986_v11 = vld [vmem:[#allocation6 + $0x2d0] sm:$0xff] }
 0xd74   :  { %5513 = vmatpush.bf16.msra.mxu1 %v8973_v47  ;;  %5612 = vmatpush.bf16.msra.mxu2 %v8955_v6  ;;  %v8985_v6 = vld [vmem:[#allocation6 + $0x2c8] sm:$0xff] }
 0xd78   :  { %5514 = vmatpush.bf16.msra.mxu1 %v8972_v55  ;;  %5613 = vmatpush.bf16.msra.mxu2 %v8954_v41  ;;  %v8984_v55 = vld [vmem:[#allocation6 + $0x2c0] sm:$0xff] }
 0xd7c   :  { %5515 = vmatpush.bf16.msra.mxu1 %v8971_v57  ;;  %5614 = vmatpush.bf16.msra.mxu2 %v8953_v51  ;;  %v8983_v51 = vld [vmem:[#allocation2 + $0x2f8] sm:$0xff] }
 0xd7e   :  { %5273 = vmatmul.bf16.gmra.mxu3 %v8947_v52  ;;  %5412 = vmatmul.bf16.gmra.mxu0 %v8963_v26  ;;  %v8990_v52 = vld [vmem:[#allocation6 + $0x2f0] sm:$0xff] }
 0xd7f   :  { %5845 = vmatpush.bf16.msrb.mxu0 %v8990_v52 }
 0xd80   :  { %5516 = vmatpush.bf16.msra.mxu1 %v8970_v24  ;;  %5615 = vmatpush.bf16.msra.mxu2 %v8952_v44 }
 0xd84   :  { %5517 = vmatpush.bf16.msra.mxu1 %v8969_v18 }
 0xd88   :  { %5518 = vmatpush.bf16.msra.mxu1 %v8968_v50 }
 0xd8e   :  { %5278 = vmatmul.bf16.gmra.mxu3 %v8948_v16  ;;  %5417 = vmatmul.bf16.gmra.mxu0 %v8964_v49  ;;  %v8989_v16 = vld [vmem:[#allocation6 + $0x2e8] sm:$0xff] }
 0xd8f   :  { %5846 = vmatpush.bf16.msrb.mxu0 %v8989_v16 }
 0xd9e   :  { %5283 = vmatmul.bf16.gmra.mxu3 %v8949_v32  ;;  %5422 = vmatmul.bf16.gmra.mxu0 %v8965_v14  ;;  %v8988_v32 = vld [vmem:[#allocation6 + $0x2e0] sm:$0xff] }
 0xd9f   :  { %5847 = vmatpush.bf16.msrb.mxu0 %v8988_v32 }
 0xda3   :  { %5848 = vmatpush.bf16.msrb.mxu0 %v8987_v43 }
 0xda7   :  { %5849 = vmatpush.bf16.msrb.mxu0 %v8986_v11 }
 0xdab   :  { %5850 = vmatpush.bf16.msrb.mxu0 %v8985_v6 }
 0xdae   :  { %5288 = vmatmul.bf16.gmra.mxu3 %v8950_v2  ;;  %5427 = vmatmul.bf16.gmra.mxu0 %v8966_v53 }
 0xdaf   :  { %5851 = vmatpush.bf16.msrb.mxu0 %v8984_v55 }
 0xdbe   :  { %5293 = vmatmul.bf16.gmra.mxu3 %v8951_v62  ;;  %5432 = vmatmul.bf16.gmra.mxu0 %v8967_v34 }
 0xdcb   :  { %v5398_v48 = vpop.f32.mrf.mxu0 }
 0xdce   :  { %5730 = vmatmul.bf16.vlgmr.msra.gmra.mxu3 %v8976_v59 }
 0xdd1   :  { %v5259_v5 = vpop.f32.mrf.mxu3 }
 0xdd3   :  { %v5400_v29 = vpop.f32.mrf.mxu0 }
 0xdd4   :  { %v5438_v25 = vpack.c.bf16 %v5400_v29, %v5398_v48 }
 0xdd6   :  { %5519 = vmatmul.bf16.vlgmr.msra.gmra.mxu1 %v5438_v25 }
 0xdd9   :  { %v5261_v37 = vpop.f32.mrf.mxu3 }
 0xdda   :  { %v10128_v27 = vpack.c.bf16 %v5261_v37, %v5259_v5 }
 0xddb   :  { %v5403_v31 = vpop.f32.mrf.mxu0 }
 0xddc   :  { %5616 = vmatmul.bf16.vlgmr.msra.gmra.mxu2 %v10128_v27 }
 0xdde   :  { %5735 = vmatmul.bf16.gmra.mxu3 %v8977_v12 }
 0xde1   :  { %v5264_v17 = vpop.f32.mrf.mxu3 }
 0xde3   :  { %v5405_v23 = vpop.f32.mrf.mxu0 }
 0xde4   :  { %v5439_v21 = vpack.c.bf16 %v5405_v23, %v5403_v31 }
 0xde6   :  { %5524 = vmatmul.bf16.gmra.mxu1 %v5439_v21 }
 0xde9   :  { %v5266_v39 = vpop.f32.mrf.mxu3 }
 0xdea   :  { %v10131_v40 = vpack.c.bf16 %v5266_v39, %v5264_v17 }
 0xdeb   :  { %v5408_v0 = vpop.f32.mrf.mxu0 }
 0xdec   :  { %5621 = vmatmul.bf16.gmra.mxu2 %v10131_v40 }
 0xdee   :  { %5740 = vmatmul.bf16.gmra.mxu3 %v8978_v15 }
 0xdf1   :  { %v5269_v56 = vpop.f32.mrf.mxu3 }
 0xdf3   :  { %v5410_v19 = vpop.f32.mrf.mxu0 }
 0xdf4   :  { %v5440_v36 = vpack.c.bf16 %v5410_v19, %v5408_v0 }
 0xdf6   :  { %5529 = vmatmul.bf16.gmra.mxu1 %v5440_v36 }
 0xdf9   :  { %v5271_v20 = vpop.f32.mrf.mxu3 }
 0xdfa   :  { %v10134_v7 = vpack.c.bf16 %v5271_v20, %v5269_v56 }
 0xdfb   :  { %v5413_v33 = vpop.f32.mrf.mxu0 }
 0xdfc   :  { %5626 = vmatmul.bf16.gmra.mxu2 %v10134_v7 }
 0xdfe   :  { %5745 = vmatmul.bf16.gmra.mxu3 %v8979_v54 }
 0xe01   :  { %v5274_v30 = vpop.f32.mrf.mxu3 }
 0xe03   :  { %v5415_v10 = vpop.f32.mrf.mxu0 }
 0xe04   :  { %v5441_v4 = vpack.c.bf16 %v5415_v10, %v5413_v33 }
 0xe06   :  { %5534 = vmatmul.bf16.gmra.mxu1 %v5441_v4 }
 0xe09   :  { %v5276_v60 = vpop.f32.mrf.mxu3 }
 0xe0a   :  { %v10137_v63 = vpack.c.bf16 %v5276_v60, %v5274_v30 }
 0xe0b   :  { %v5418_v58 = vpop.f32.mrf.mxu0 }
 0xe0c   :  { %5631 = vmatmul.bf16.gmra.mxu2 %v10137_v63 }
 0xe0e   :  { %5750 = vmatmul.bf16.gmra.mxu3 %v8980_v45 }
 0xe11   :  { %v5279_v13 = vpop.f32.mrf.mxu3 }
 0xe13   :  { %v5420_v8 = vpop.f32.mrf.mxu0 }
 0xe14   :  { %v5442_v22 = vpack.c.bf16 %v5420_v8, %v5418_v58 }
 0xe16   :  { %5539 = vmatmul.bf16.gmra.mxu1 %v5442_v22 }
 0xe19   :  { %v5281_v61 = vpop.f32.mrf.mxu3 }
 0xe1a   :  { %v10140_v9 = vpack.c.bf16 %v5281_v61, %v5279_v13 }
 0xe1b   :  { %v5423_v38 = vpop.f32.mrf.mxu0 }
 0xe1c   :  { %5636 = vmatmul.bf16.gmra.mxu2 %v10140_v9 }
 0xe1e   :  { %5755 = vmatmul.bf16.gmra.mxu3 %v8981_v46 }
 0xe21   :  { %v5284_v26 = vpop.f32.mrf.mxu3 }
 0xe23   :  { %v5425_v49 = vpop.f32.mrf.mxu0 }
 0xe24   :  { %v5443_v35 = vpack.c.bf16 %v5425_v49, %v5423_v38 }
 0xe26   :  { %5544 = vmatmul.bf16.gmra.mxu1 %v5443_v35 }
 0xe29   :  { %v5286_v14 = vpop.f32.mrf.mxu3 }
 0xe2a   :  { %v10143_v42 = vpack.c.bf16 %v5286_v14, %v5284_v26 }
 0xe2b   :  { %v5428_v3 = vpop.f32.mrf.mxu0 }
 0xe2c   :  { %5641 = vmatmul.bf16.gmra.mxu2 %v10143_v42 }
 0xe2e   :  { %5760 = vmatmul.bf16.gmra.mxu3 %v8982_v28 }
 0xe31   :  { %v5289_v47 = vpop.f32.mrf.mxu3 }
 0xe33   :  { %v5430_v2 = vpop.f32.mrf.mxu0 }
 0xe34   :  { %v5444_v53 = vpack.c.bf16 %v5430_v2, %v5428_v3 }
 0xe36   :  { %5549 = vmatmul.bf16.gmra.mxu1 %v5444_v53 }
 0xe39   :  { %v5291_v41 = vpop.f32.mrf.mxu3 }
 0xe3a   :  { %v10146_v57 = vpack.c.bf16 %v5291_v41, %v5289_v47 }
 0xe3b   :  { %v5433_v24 = vpop.f32.mrf.mxu0 }
 0xe3c   :  { %5646 = vmatmul.bf16.gmra.mxu2 %v10146_v57 }
 0xe3e   :  { %5765 = vmatmul.bf16.gmra.mxu3 %v8983_v51 }
 0xe41   :  { %v5294_v44 = vpop.f32.mrf.mxu3 }
 0xe43   :  { %v5435_v18 = vpop.f32.mrf.mxu0 }
 0xe44   :  { %v5445_v62 = vpack.c.bf16 %v5435_v18, %v5433_v24 }
 0xe46   :  { %5554 = vmatmul.bf16.gmra.mxu1 %v5445_v62 }
 0xe49   :  { %v5296_v34 = vpop.f32.mrf.mxu3 }
 0xe4a   :  { %v10149_v50 = vpack.c.bf16 %v5296_v34, %v5294_v44 }
 0xe4c   :  { %5651 = vmatmul.bf16.gmra.mxu2 %v10149_v50 }
 0xe51   :  { %v5731_v59 = vpop.f32.mrf.mxu3 }
 0xe53   :  { %v5520_v48 = vpop.f32.mrf.mxu1 }
 0xe59   :  { %v5733_v5 = vpop.f32.mrf.mxu3 }
 0xe5a   :  { %v5771_v29 = vpack.c.bf16 %v5733_v5, %v5731_v59 }
 0xe5b   :  { %v10152_v25 = vpop.f32.mrf.mxu1 }
 0xe5c   :  { %5852 = vmatmul.bf16.vlgmr.msrb.gmra.mxu0 %v5771_v29 }
 0xe5f   :  { %v5617_v37 = vpop.f32.mrf.mxu2 }
 0xe60   :  { %v5618_v12 = vadd.f32 %v5617_v37, %v5520_v48 }
 0xe61   :  { %v5736_v31 = vpop.f32.mrf.mxu3 }
 0xe63   :  { %v5525_v17 = vpop.f32.mrf.mxu1 }
 0xe67   :  { %v10154_v23 = vpop.f32.mrf.mxu2 }
 0xe69   :  { %v5738_v21 = vpop.f32.mrf.mxu3 }
 0xe6a   :  { %v5772_v39 = vpack.c.bf16 %v5738_v21, %v5736_v31 }
 0xe6b   :  { %v10156_v15 = vpop.f32.mrf.mxu1 }
 0xe6c   :  { %5857 = vmatmul.bf16.gmra.mxu0 %v5772_v39 }
 0xe6f   :  { %v5622_v0 = vpop.f32.mrf.mxu2 }
 0xe70   :  { %v5623_v56 = vadd.f32 %v5622_v0, %v5525_v17 }
 0xe71   :  { %v5741_v19 = vpop.f32.mrf.mxu3 }
 0xe73   :  { %v5530_v36 = vpop.f32.mrf.mxu1 }
 0xe77   :  { %v10158_v20 = vpop.f32.mrf.mxu2 }
 0xe79   :  { %v5743_v54 = vpop.f32.mrf.mxu3 }
 0xe7a   :  { %v5773_v33 = vpack.c.bf16 %v5743_v54, %v5741_v19 }
 0xe7b   :  { %v10160_v10 = vpop.f32.mrf.mxu1 }
 0xe7c   :  { %5862 = vmatmul.bf16.gmra.mxu0 %v5773_v33 }
 0xe7f   :  { %v5627_v30 = vpop.f32.mrf.mxu2 }
 0xe80   :  { %v5628_v4 = vadd.f32 %v5627_v30, %v5530_v36 }
 0xe81   :  { %v5746_v60 = vpop.f32.mrf.mxu3 }
 0xe83   :  { %v5535_v13 = vpop.f32.mrf.mxu1 }
 0xe87   :  { %v10162_v45 = vpop.f32.mrf.mxu2 }
 0xe89   :  { %v5748_v58 = vpop.f32.mrf.mxu3 }
 0xe8a   :  { %v5774_v8 = vpack.c.bf16 %v5748_v58, %v5746_v60 }
 0xe8b   :  { %v10164_v38 = vpop.f32.mrf.mxu1 }
 0xe8c   :  { %5867 = vmatmul.bf16.gmra.mxu0 %v5774_v8 }
 0xe8f   :  { %v5632_v22 = vpop.f32.mrf.mxu2 }
 0xe90   :  { %v5633_v61 = vadd.f32 %v5632_v22, %v5535_v13 }
 0xe91   :  { %v5751_v46 = vpop.f32.mrf.mxu3 }
 0xe93   :  { %v5540_v16 = vpop.f32.mrf.mxu1 }
 0xe97   :  { %v10166_v1 = vpop.f32.mrf.mxu2 }
 0xe99   :  { %v5753_v52 = vpop.f32.mrf.mxu3 }
 0xe9a   :  { %v5775_v26 = vpack.c.bf16 %v5753_v52, %v5751_v46 }
 0xe9b   :  { %v5542_v5 = vpop.f32.mrf.mxu1 }
 0xe9c   :  { %5872 = vmatmul.bf16.gmra.mxu0 %v5775_v26 }
 0xe9f   :  { %v5637_v49 = vpop.f32.mrf.mxu2 }
 0xea0   :  { %v10168_v35 = vadd.f32 %v5637_v49, %v5540_v16 }
 0xea1   :  { %v5756_v32 = vpop.f32.mrf.mxu3 }
 0xea3   :  { %v5545_v31 = vpop.f32.mrf.mxu1 }
 0xea7   :  { %v5639_v29 = vpop.f32.mrf.mxu2 }
 0xea9   :  { %v5758_v14 = vpop.f32.mrf.mxu3 }
 0xeaa   :  { %v5776_v28 = vpack.c.bf16 %v5758_v14, %v5756_v32  ;;  %v10184_v32 = vld [vmem:[#allocation7 + $0x3] ss:$0 sm:$0xff] }
 0xeab   :  { %v5547_v39 = vpop.f32.mrf.mxu1 }
 0xeac   :  { %5877 = vmatmul.bf16.gmra.mxu0 %v5776_v28 }
 0xeaf   :  { %v5642_v17 = vpop.f32.mrf.mxu2 }
 0xeb1   :  { %v5761_v3 = vpop.f32.mrf.mxu3 }
 0xeb3   :  { %v5550_v19 = vpop.f32.mrf.mxu1 }
 0xeb7   :  { %v5644_v0 = vpop.f32.mrf.mxu2 }
 0xeb9   :  { %v5763_v43 = vpop.f32.mrf.mxu3 }
 0xeba   :  { %v5777_v11 = vpack.c.bf16 %v5763_v43, %v5761_v3  ;;  %v5645_v3 = vadd.f32 %v5644_v0, %v5547_v39 }
 0xebb   :  { %v5552_v33 = vpop.f32.mrf.mxu1 }
 0xebc   :  { %5882 = vmatmul.bf16.gmra.mxu0 %v5777_v11 }
 0xebf   :  { %v5647_v36 = vpop.f32.mrf.mxu2 }
 0xec0   :  { %v5648_v16 = vadd.f32 %v5647_v36, %v5550_v19 }
 0xec1   :  { %v5766_v47 = vpop.f32.mrf.mxu3 }
 0xec3   :  { %v5555_v58 = vpop.f32.mrf.mxu1 }
 0xec7   :  { %v5649_v30 = vpop.f32.mrf.mxu2 }
 0xec8   :  { %v5650_v52 = vadd.f32 %v5649_v30, %v5552_v33 }
 0xec9   :  { %v5768_v6 = vpop.f32.mrf.mxu3 }
 0xeca   :  { %v5778_v2 = vpack.c.bf16 %v5768_v6, %v5766_v47  ;;  %v5643_v6 = vadd.f32 %v5642_v17, %v5545_v31 }
 0xecc   :  { %5887 = vmatmul.bf16.gmra.mxu0 %v5778_v2 }
 0xecf   :  { %v5652_v13 = vpop.f32.mrf.mxu2 }
 0xed0   :  { %v5653_v22 = vadd.f32 %v5652_v13, %v5555_v58 }
 0xed7   :  { %v5654_v46 = vpop.f32.mrf.mxu2 }
 0xed9   :  { %v5853_v53 = vpop.f32.mrf.mxu0 }
 0xeda   :  { %v10170_v55 = vadd.f32 %v5853_v53, %v5618_v12 }
 0xee1   :  { %v10172_v41 = vpop.f32.mrf.mxu0 }
 0xee9   :  { %v5858_v51 = vpop.f32.mrf.mxu0 }
 0xeea   :  { %v10174_v24 = vadd.f32 %v5858_v51, %v5623_v56 }
 0xef1   :  { %v10176_v44 = vpop.f32.mrf.mxu0 }
 0xef9   :  { %v5863_v18 = vpop.f32.mrf.mxu0 }
 0xefa   :  { %v10178_v62 = vadd.f32 %v5863_v18, %v5628_v4  ;;  %v5640_v18 = vadd.f32 %v5639_v29, %v5542_v5 }
 0xf01   :  { %v10180_v34 = vpop.f32.mrf.mxu0 }
 0xf09   :  { %v5868_v59 = vpop.f32.mrf.mxu0 }
 0xf0a   :  { %v10182_v48 = vadd.f32 %v5868_v59, %v5633_v61  ;;  %v5557_v61 = vpop.f32.mrf.mxu1 }
 0xf0b   :  { %v5655_v49 = vadd.f32 %v5654_v46, %v5557_v61 }
 0xf11   :  { %v5870_v37 = vpop.f32.mrf.mxu0 }
 0xf19   :  { %v5873_v12 = vpop.f32.mrf.mxu0 }
 0xf1a   :  { %v5901_v31 = vadd.f32 %v5873_v12, %v10168_v35 }
 0xf1c   :  { %v5922_v13 = vadd.f32 %v10184_v32, %v5901_v31  ;;  %v9004_v31 = vld [vmem:[#allocation9 + $0x260] sm:$0xff] }
 0xf1e   :  { %v5938_v61 = vmax.f32 %v5922_v13, 0.0  ;;  %v9001_v13 = vld [vmem:[#allocation9 + $0x248] sm:$0xff] }
 0xf21   :  { %v5875_v21 = vpop.f32.mrf.mxu0 }
 0xf22   :  { %v5902_v30 = vadd.f32 %v5875_v21, %v5640_v18  ;;  %v5630_v21 = vadd.f32 %v10162_v45, %v10160_v10  ;;  %v9011_v18 = vld [vmem:[#allocation4 + $0x298] sm:$0xff] }
 0xf24   :  { %v5923_v29 = vadd.f32 %v10184_v32, %v5902_v30  ;;  %v9006_v30 = vld [vmem:[#allocation9 + $0x270] sm:$0xff] }
 0xf26   :  { %v5939_v35 = vmax.f32 %v5923_v29, 0.0  ;;  %v9002_v29 = vld [vmem:[#allocation9 + $0x250] sm:$0xff] }
 0xf29   :  { %v5878_v56 = vpop.f32.mrf.mxu0 }
 0xf2a   :  { %v5903_v59 = vadd.f32 %v5878_v56, %v5643_v6  ;;  %v9008_v6 = vld [vmem:[#allocation4 + $0x280] sm:$0xff] }
 0xf2c   :  { %v5924_v17 = vadd.f32 %v10184_v32, %v5903_v59  ;;  %v8996_v59 = vld [vmem:[#allocation4 + $0x260] sm:$0xff] }
 0xf31   :  { %v5880_v54 = vpop.f32.mrf.mxu0 }
 0xf32   :  { %v5904_v2 = vadd.f32 %v5880_v54, %v5645_v3 }
 0xf39   :  { %v5883_v4 = vpop.f32.mrf.mxu0 }
 0xf3a   :  { %v5905_v43 = vadd.f32 %v5883_v4, %v5648_v16  ;;  %v5635_v4 = vadd.f32 %v10166_v1, %v10164_v38  ;;  %v5898_v38 = vadd.f32 %v10180_v34, %v5630_v21  ;;  %v5620_v34 = vadd.f32 %v10154_v23, %v10152_v25  ;;  %v9019_v21 = vld [vmem:[#allocation9 + $0x298] sm:$0xff] }
 0xf3c   :  { %v5926_v19 = vadd.f32 %v10184_v32, %v5905_v43  ;;  %v5900_v5 = vadd.f32 %v5870_v37, %v5635_v4  ;;  %v5625_v37 = vadd.f32 %v10158_v20, %v10156_v15  ;;  %v5919_v45 = vadd.f32 %v10184_v32, %v5898_v38  ;;  %v9022_v4 = vld [vmem:[#allocation9 + $0x2b0] sm:$0xff]  ;;  %v9000_v38 = vld [vmem:[#allocation9 + $0x240] sm:$0xff] }
 0xf3d   :  { %v5894_v15 = vadd.f32 %v10172_v41, %v5620_v34 }
 0xf3e   :  { %v5942_v54 = vmax.f32 %v5926_v19, 0.0  ;;  %v5921_v1 = vadd.f32 %v10184_v32, %v5900_v5  ;;  %v5896_v10 = vadd.f32 %v10176_v44, %v5625_v37  ;;  %v5916_v44 = vadd.f32 %v10184_v32, %v10174_v24  ;;  %v8992_v24 = vld [vmem:[#allocation4 + $0x240] sm:$0xff]  ;;  %v9015_v37 = vld [vmem:[#allocation4 + $0x2b8] sm:$0xff] }
 0xf3f   :  { %v5915_v25 = vadd.f32 %v10184_v32, %v5894_v15  ;;  %v9012_v19 = vld [vmem:[#allocation4 + $0x2a0] sm:$0xff] }
 0xf40   :  { %v5937_v46 = vmax.f32 %v5921_v1, 0.0  ;;  %v5917_v20 = vadd.f32 %v10184_v32, %v5896_v10  ;;  %v5932_v3 = vmax.f32 %v5916_v44, 0.0  ;;  %v9020_v5 = vld [vmem:[#allocation9 + $0x2a0] sm:$0xff]  ;;  %v9017_v1 = vld [vmem:[#allocation9 + $0x288] sm:$0xff] }
 0xf41   :  { %v5885_v60 = vpop.f32.mrf.mxu0  ;;  %v5931_v41 = vmax.f32 %v5915_v25, 0.0 }
 0xf42   :  { %v5906_v14 = vadd.f32 %v5885_v60, %v5650_v52  ;;  %v5925_v60 = vadd.f32 %v10184_v32, %v5904_v2  ;;  %v5950_v52 = vpack.c.bf16 %v5939_v35, %v5938_v61  ;;  %v5933_v23 = vmax.f32 %v5917_v20, 0.0  ;;  %v8994_v2 = vld [vmem:[#allocation4 + $0x250] sm:$0xff]  ;;  %v9016_v35 = vld [vmem:[#allocation9 + $0x280] sm:$0xff] }
 0xf44   :  { %v5927_v53 = vadd.f32 %v10184_v32, %v5906_v14  ;;  %v5941_v56 = vmax.f32 %v5925_v60, 0.0  ;;  %v5947_v43 = vpack.c.bf16 %v5933_v23, %v5932_v3  ;;  %v8997_v60 = vld [vmem:[#allocation4 + $0x268] sm:$0xff] }
 0xf46   :  { %v5943_v39 = vmax.f32 %v5927_v53, 0.0  ;;  %v9010_v53 = vld [vmem:[#allocation4 + $0x290] sm:$0xff] }
 0xf48   :  { %v5952_v58 = vpack.c.bf16 %v5943_v39, %v5942_v54  ;;  %v9013_v39 = vld [vmem:[#allocation4 + $0x2a8] sm:$0xff]  ;;  %v9003_v54 = vld [vmem:[#allocation9 + $0x258] sm:$0xff] }
 0xf49   :  { %v5888_v8 = vpop.f32.mrf.mxu0 }
 0xf4a   :  { %v5907_v26 = vadd.f32 %v5888_v8, %v5653_v22  ;;  %v5940_v8 = vmax.f32 %v5924_v17, 0.0  ;;  %v5920_v22 = vadd.f32 %v10184_v32, %v10182_v48  ;;  %v5935_v48 = vmax.f32 %v5919_v45, 0.0  ;;  %v9021_v17 = vld [vmem:[#allocation9 + $0x2a8] sm:$0xff] }
 0xf4c   :  { %v5928_v11 = vadd.f32 %v10184_v32, %v5907_v26  ;;  %v5951_v12 = vpack.c.bf16 %v5941_v56, %v5940_v8  ;;  %v5918_v26 = vadd.f32 %v10184_v32, %v10178_v62  ;;  %v5936_v16 = vmax.f32 %v5920_v22, 0.0  ;;  %v8998_v56 = vld [vmem:[#allocation4 + $0x270] sm:$0xff]  ;;  %v9024_v22 = vld [vmem:[#allocation4 + $0x2c0] sm:$0xff] }
 0xf4d   :  { %v5914_v62 = vadd.f32 %v10184_v32, %v10170_v55  ;;  %v8993_v55 = vld [vmem:[#allocation4 + $0x248] sm:$0xff]  ;;  %v9018_v8 = vld [vmem:[#allocation9 + $0x290] sm:$0xff] }
 0xf4e   :  { %v5944_v36 = vmax.f32 %v5928_v11, 0.0  ;;  %v5934_v14 = vmax.f32 %v5918_v26, 0.0  ;;  %v9025_v26 = vld [vmem:[#allocation4 + $0x2c8] sm:$0xff] }
 0xf4f   :  { %v5930_v11 = vmax.f32 %v5914_v62, 0.0 }
 0xf51   :  { %v5890_v28 = vpop.f32.mrf.mxu0 }
 0xf52   :  { %v5908_v47 = vadd.f32 %v5890_v28, %v5655_v49  ;;  %v5949_v49 = vpack.c.bf16 %v5937_v46, %v5936_v16  ;;  %v5948_v28 = vpack.c.bf16 %v5935_v48, %v5934_v14  ;;  %v9026_v14 = vld [vmem:[#allocation4 + $0x2d0] sm:$0xff] }
 0xf54   :  { %v5929_v51 = vadd.f32 %v10184_v32, %v5908_v47  ;;  %v5946_v47 = vpack.c.bf16 %v5931_v41, %v5930_v11  ;;  %v9009_v32 = vld [vmem:[#allocation4 + $0x288] sm:$0xff] }
 0xf56   :  { %v5945_v33 = vmax.f32 %v5929_v51, 0.0  ;;  %v8995_v51 = vld [vmem:[#allocation4 + $0x258] sm:$0xff] }
 0xf58   :  { %v5953_v0 = vpack.c.bf16 %v5945_v33, %v5944_v36  ;;  %v9007_v36 = vld [vmem:[#allocation9 + $0x278] sm:$0xff] }
 0xf59   :  { %v9023_v33 = vld [vmem:[#allocation9 + $0x2b8] sm:$0xff]  ;;  %6377 = vmatpush.bf16.msra.mxu0 %v9007_v36 }
 0xf5a   :  { %6019 = vmatpush.bf16.msrb.mxu1 %v5953_v0  ;;  %6158 = vmatpush.bf16.msrb.mxu2 %v5953_v0 }
 0xf5b   :  { %6280 = vmatpush.bf16.msrb.mxu3 %v9023_v33  ;;  %v9038_v33 = vld [vmem:[#allocation9 + $0x2f0] sm:$0xff] }
 0xf5d   :  { %6378 = vmatpush.bf16.msra.mxu0 %v9006_v30 }
 0xf5e   :  { %6020 = vmatpush.bf16.msrb.mxu1 %v5952_v58  ;;  %6159 = vmatpush.bf16.msrb.mxu2 %v5952_v58 }
 0xf5f   :  { %6281 = vmatpush.bf16.msrb.mxu3 %v9022_v4  ;;  %v9037_v4 = vld [vmem:[#allocation9 + $0x2e8] sm:$0xff] }
 0xf62   :  { %6021 = vmatpush.bf16.msrb.mxu1 %v5951_v12  ;;  %6160 = vmatpush.bf16.msrb.mxu2 %v5951_v12 }
 0xf63   :  { %6282 = vmatpush.bf16.msrb.mxu3 %v9021_v17 }
 0xf66   :  { %6022 = vmatpush.bf16.msrb.mxu1 %v5950_v52  ;;  %6161 = vmatpush.bf16.msrb.mxu2 %v5950_v52 }
 0xf67   :  { %6283 = vmatpush.bf16.msrb.mxu3 %v9020_v5 }
 0xf6a   :  { %6023 = vmatpush.bf16.msrb.mxu1 %v5949_v49  ;;  %6162 = vmatpush.bf16.msrb.mxu2 %v5949_v49 }
 0xf6b   :  { %6284 = vmatpush.bf16.msrb.mxu3 %v9019_v21  ;;  %v9044_v21 = vld [vmem:[%s10425_s7 + $0xe0] sm:$0xff] }
 0xf6e   :  { %6024 = vmatpush.bf16.msrb.mxu1 %v5948_v28  ;;  %6163 = vmatpush.bf16.msrb.mxu2 %v5948_v28 }
 0xf6f   :  { %6285 = vmatpush.bf16.msrb.mxu3 %v9018_v8  ;;  %v9034_v8 = vld [vmem:[#allocation9 + $0x2d0] sm:$0xff] }
 0xf72   :  { %6025 = vmatpush.bf16.msrb.mxu1 %v5947_v43  ;;  %6164 = vmatpush.bf16.msrb.mxu2 %v5947_v43 }
 0xf73   :  { %6286 = vmatpush.bf16.msrb.mxu3 %v9017_v1  ;;  %v9030_v1 = vld [vmem:[#allocation4 + $0x2f0] sm:$0xff] }
 0xf76   :  { %6026 = vmatpush.bf16.msrb.mxu1 %v5946_v47  ;;  %6165 = vmatpush.bf16.msrb.mxu2 %v5946_v47 }
 0xf77   :  { %6287 = vmatpush.bf16.msrb.mxu3 %v9016_v35 }
 0xf79   :  { %6027 = vmatmul.bf16.vlgmr.msrb.gmra.mxu1 %v8992_v24  ;;  %6166 = vmatmul.bf16.vlgmr.msrb.gmra.mxu2 %v9008_v6 }
 0xf7a   :  { %6491 = vmatpush.bf16.msra.mxu1 %v5953_v0  ;;  %v9005_v0 = vld [vmem:[#allocation9 + $0x268] sm:$0xff] }
 0xf7b   :  { %6379 = vmatpush.bf16.msra.mxu0 %v9005_v0  ;;  %v9047_v0 = vld [vmem:[%s10425_s7 + $0xf8] sm:$0xff] }
 0xf7c   :  { %6769 = vmatpush.bf16.msra.mxu3 %v9047_v0 }
 0xf7e   :  { %6492 = vmatpush.bf16.msra.mxu1 %v5952_v58  ;;  %v9014_v58 = vld [vmem:[#allocation4 + $0x2b0] sm:$0xff] }
 0xf7f   :  { %6380 = vmatpush.bf16.msra.mxu0 %v9004_v31  ;;  %v9046_v31 = vld [vmem:[%s10425_s7 + $0xf0] sm:$0xff] }
 0xf80   :  { %6770 = vmatpush.bf16.msra.mxu3 %v9046_v31 }
 0xf82   :  { %6493 = vmatpush.bf16.msra.mxu1 %v5951_v12  ;;  %v8999_v12 = vld [vmem:[#allocation4 + $0x278] sm:$0xff] }
 0xf83   :  { %6381 = vmatpush.bf16.msra.mxu0 %v9003_v54  ;;  %v9036_v54 = vld [vmem:[#allocation9 + $0x2e0] sm:$0xff] }
 0xf86   :  { %6494 = vmatpush.bf16.msra.mxu1 %v5950_v52 }
 0xf87   :  { %6382 = vmatpush.bf16.msra.mxu0 %v9002_v29  ;;  %v9045_v29 = vld [vmem:[%s10425_s7 + $0xe8] sm:$0xff] }
 0xf88   :  { %6771 = vmatpush.bf16.msra.mxu3 %v9045_v29 }
 0xf89   :  { %6032 = vmatmul.bf16.gmra.mxu1 %v8993_v55  ;;  %6171 = vmatmul.bf16.gmra.mxu2 %v9009_v32 }
 0xf8a   :  { %6495 = vmatpush.bf16.msra.mxu1 %v5949_v49 }
 0xf8b   :  { %6383 = vmatpush.bf16.msra.mxu0 %v9001_v13 }
 0xf8c   :  { %6772 = vmatpush.bf16.msra.mxu3 %v9044_v21 }
 0xf8e   :  { %6496 = vmatpush.bf16.msra.mxu1 %v5948_v28 }
 0xf8f   :  { %6384 = vmatpush.bf16.msra.mxu0 %v9000_v38 }
 0xf92   :  { %6497 = vmatpush.bf16.msra.mxu1 %v5947_v43  ;;  %v9027_v43 = vld [vmem:[#allocation4 + $0x2d8] sm:$0xff] }
 0xf96   :  { %6498 = vmatpush.bf16.msra.mxu1 %v5946_v47 }
 0xf99   :  { %6037 = vmatmul.bf16.gmra.mxu1 %v8994_v2  ;;  %6176 = vmatmul.bf16.gmra.mxu2 %v9010_v53  ;;  %v9028_v2 = vld [vmem:[#allocation4 + $0x2e0] sm:$0xff] }
 0xfa9   :  { %6042 = vmatmul.bf16.gmra.mxu1 %v8995_v51  ;;  %6181 = vmatmul.bf16.gmra.mxu2 %v9011_v18 }
 0xfb9   :  { %6047 = vmatmul.bf16.gmra.mxu1 %v8996_v59  ;;  %6186 = vmatmul.bf16.gmra.mxu2 %v9012_v19  ;;  %v9039_v19 = vld [vmem:[#allocation9 + $0x2f8] sm:$0xff] }
 0xfba   :  { %6613 = vmatpush.bf16.msra.mxu2 %v9039_v19 }
 0xfbe   :  { %6614 = vmatpush.bf16.msra.mxu2 %v9038_v33 }
 0xfc2   :  { %6615 = vmatpush.bf16.msra.mxu2 %v9037_v4 }
 0xfc6   :  { %6616 = vmatpush.bf16.msra.mxu2 %v9036_v54 }
 0xfc9   :  { %6052 = vmatmul.bf16.gmra.mxu1 %v8997_v60  ;;  %6191 = vmatmul.bf16.gmra.mxu2 %v9013_v39  ;;  %v9029_v60 = vld [vmem:[#allocation4 + $0x2e8] sm:$0xff] }
 0xfd9   :  { %6057 = vmatmul.bf16.gmra.mxu1 %v8998_v56  ;;  %6196 = vmatmul.bf16.gmra.mxu2 %v9014_v58  ;;  %v9035_v58 = vld [vmem:[#allocation9 + $0x2d8] sm:$0xff] }
 0xfda   :  { %6617 = vmatpush.bf16.msra.mxu2 %v9035_v58 }
 0xfde   :  { %6618 = vmatpush.bf16.msra.mxu2 %v9034_v8 }
 0xfe9   :  { %6062 = vmatmul.bf16.gmra.mxu1 %v8999_v12  ;;  %6201 = vmatmul.bf16.gmra.mxu2 %v9015_v37  ;;  %v9043_v12 = vld [vmem:[%s10425_s7 + $0xd8] sm:$0xff]  ;;  %v9033_v37 = vld [vmem:[#allocation9 + $0x2c8] sm:$0xff] }
 0xfea   :  { %6773 = vmatpush.bf16.msra.mxu3 %v9043_v12  ;;  %6619 = vmatpush.bf16.msra.mxu2 %v9033_v37 }
 0xff6   :  { %v6028_v61 = vpop.f32.mrf.mxu1 }
 0xff9   :  { %6499 = vmatmul.bf16.vlgmr.msra.gmra.mxu1 %v9024_v22  ;;  %v9042_v22 = vld [vmem:[%s10425_s7 + $0xd0] sm:$0xff] }
 0xffa   :  { %6774 = vmatpush.bf16.msra.mxu3 %v9042_v22 }
 0xffc   :  { %v6167_v10 = vpop.f32.mrf.mxu2 }
 0xffe   :  { %v6030_v45 = vpop.f32.mrf.mxu1 }
 0xfff   :  { %v6068_v46 = vpack.c.bf16 %v6030_v45, %v6028_v61 }
0x1001   :  { %6385 = vmatmul.bf16.vlgmr.msra.gmra.mxu0 %v6068_v46  ;;  %v9041_v46 = vld [vmem:[%s10425_s7 + $0xc8] sm:$0xff] }
0x1002   :  { %6775 = vmatpush.bf16.msra.mxu3 %v9041_v46 }
0x1004   :  { %v6169_v52 = vpop.f32.mrf.mxu2 }
0x1005   :  { %v6207_v34 = vpack.c.bf16 %v6169_v52, %v6167_v10  ;;  %v9032_v10 = vld [vmem:[#allocation9 + $0x2c0] sm:$0xff] }
0x1006   :  { %v6033_v16 = vpop.f32.mrf.mxu1  ;;  %6620 = vmatpush.bf16.msra.mxu2 %v9032_v10 }
0x1007   :  { %6288 = vmatmul.bf16.vlgmr.msrb.gmra.mxu3 %v6207_v34  ;;  %v9040_v34 = vld [vmem:[%s10425_s7 + $0xc0] sm:$0xff] }
0x1008   :  { %6776 = vmatpush.bf16.msra.mxu3 %v9040_v34 }
0x1009   :  { %6504 = vmatmul.bf16.gmra.mxu1 %v9025_v26 }
0x100c   :  { %v6172_v15 = vpop.f32.mrf.mxu2 }
0x100e   :  { %v6035_v20 = vpop.f32.mrf.mxu1 }
0x100f   :  { %v6069_v48 = vpack.c.bf16 %v6035_v20, %v6033_v16 }
0x1011   :  { %6390 = vmatmul.bf16.gmra.mxu0 %v6069_v48 }
0x1014   :  { %v6174_v49 = vpop.f32.mrf.mxu2 }
0x1015   :  { %v6208_v44 = vpack.c.bf16 %v6174_v49, %v6172_v15  ;;  %v9031_v15 = vld [vmem:[#allocation4 + $0x2f8] sm:$0xff] }
0x1016   :  { %v6038_v25 = vpop.f32.mrf.mxu1 }
0x1017   :  { %6293 = vmatmul.bf16.gmra.mxu3 %v6208_v44 }
0x1019   :  { %6509 = vmatmul.bf16.gmra.mxu1 %v9026_v14 }
0x101c   :  { %v6177_v23 = vpop.f32.mrf.mxu2 }
0x101e   :  { %v6040_v28 = vpop.f32.mrf.mxu1 }
0x101f   :  { %v6070_v62 = vpack.c.bf16 %v6040_v28, %v6038_v25 }
0x1021   :  { %6395 = vmatmul.bf16.gmra.mxu0 %v6070_v62 }
0x1024   :  { %v6179_v3 = vpop.f32.mrf.mxu2 }
0x1025   :  { %v6209_v41 = vpack.c.bf16 %v6179_v3, %v6177_v23 }
0x1026   :  { %v6043_v11 = vpop.f32.mrf.mxu1 }
0x1027   :  { %6298 = vmatmul.bf16.gmra.mxu3 %v6209_v41 }
0x1029   :  { %6514 = vmatmul.bf16.gmra.mxu1 %v9027_v43 }
0x102c   :  { %v6182_v47 = vpop.f32.mrf.mxu2 }
0x102e   :  { %v6045_v24 = vpop.f32.mrf.mxu1 }
0x102f   :  { %v6071_v6 = vpack.c.bf16 %v6045_v24, %v6043_v11 }
0x1031   :  { %6400 = vmatmul.bf16.gmra.mxu0 %v6071_v6 }
0x1034   :  { %v6184_v55 = vpop.f32.mrf.mxu2 }
0x1035   :  { %v6210_v32 = vpack.c.bf16 %v6184_v55, %v6182_v47 }
0x1036   :  { %v6048_v53 = vpop.f32.mrf.mxu1 }
0x1037   :  { %6303 = vmatmul.bf16.gmra.mxu3 %v6210_v32 }
0x1039   :  { %6519 = vmatmul.bf16.gmra.mxu1 %v9028_v2 }
0x103c   :  { %v6187_v51 = vpop.f32.mrf.mxu2 }
0x103e   :  { %v6050_v18 = vpop.f32.mrf.mxu1 }
0x103f   :  { %v6072_v59 = vpack.c.bf16 %v6050_v18, %v6048_v53 }
0x1041   :  { %6405 = vmatmul.bf16.gmra.mxu0 %v6072_v59 }
0x1044   :  { %v6189_v36 = vpop.f32.mrf.mxu2 }
0x1045   :  { %v6211_v30 = vpack.c.bf16 %v6189_v36, %v6187_v51 }
0x1046   :  { %v6053_v39 = vpop.f32.mrf.mxu1 }
0x1047   :  { %6308 = vmatmul.bf16.gmra.mxu3 %v6211_v30 }
0x1049   :  { %6524 = vmatmul.bf16.gmra.mxu1 %v9029_v60 }
0x104c   :  { %v6192_v17 = vpop.f32.mrf.mxu2 }
0x104e   :  { %v6055_v5 = vpop.f32.mrf.mxu1 }
0x104f   :  { %v6073_v56 = vpack.c.bf16 %v6055_v5, %v6053_v39 }
0x1051   :  { %6410 = vmatmul.bf16.gmra.mxu0 %v6073_v56 }
0x1054   :  { %v6194_v13 = vpop.f32.mrf.mxu2 }
0x1055   :  { %v6212_v38 = vpack.c.bf16 %v6194_v13, %v6192_v17 }
0x1056   :  { %v6058_v35 = vpop.f32.mrf.mxu1 }
0x1057   :  { %6313 = vmatmul.bf16.gmra.mxu3 %v6212_v38 }
0x1059   :  { %6529 = vmatmul.bf16.gmra.mxu1 %v9030_v1 }
0x105c   :  { %v6197_v61 = vpop.f32.mrf.mxu2 }
0x105e   :  { %v6060_v45 = vpop.f32.mrf.mxu1 }
0x105f   :  { %v6074_v52 = vpack.c.bf16 %v6060_v45, %v6058_v35 }
0x1061   :  { %6415 = vmatmul.bf16.gmra.mxu0 %v6074_v52 }
0x1064   :  { %v6199_v26 = vpop.f32.mrf.mxu2 }
0x1065   :  { %v6213_v16 = vpack.c.bf16 %v6199_v26, %v6197_v61 }
0x1066   :  { %v6063_v20 = vpop.f32.mrf.mxu1 }
0x1067   :  { %6318 = vmatmul.bf16.gmra.mxu3 %v6213_v16 }
0x1069   :  { %6534 = vmatmul.bf16.gmra.mxu1 %v9031_v15 }
0x106c   :  { %v6202_v48 = vpop.f32.mrf.mxu2 }
0x106e   :  { %v6065_v49 = vpop.f32.mrf.mxu1 }
0x106f   :  { %v6075_v44 = vpack.c.bf16 %v6065_v49, %v6063_v20 }
0x1071   :  { %6420 = vmatmul.bf16.gmra.mxu0 %v6075_v44 }
0x1074   :  { %v6204_v14 = vpop.f32.mrf.mxu2 }
0x1075   :  { %v6214_v25 = vpack.c.bf16 %v6204_v14, %v6202_v48  ;;  %v10283_v14 = vld [vmem:[#allocation10 + $0x3] ss:$0 sm:$0xff] }
0x1076   :  { %v6500_v23 = vpop.f32.mrf.mxu1 }
0x1077   :  { %6323 = vmatmul.bf16.gmra.mxu3 %v6214_v25  ;;  %v10285_v25 = vld [vmem:[#allocation12 + $0x3] ss:$0 sm:$0xff] }
0x107e   :  { %v6386_v28 = vpop.f32.mrf.mxu0  ;;  %v6502_v62 = vpop.f32.mrf.mxu1 }
0x107f   :  { %v6540_v3 = vpack.c.bf16 %v6502_v62, %v6500_v23 }
0x1081   :  { %6621 = vmatmul.bf16.vlgmr.msra.gmra.mxu2 %v6540_v3 }
0x1086   :  { %v6388_v41 = vpop.f32.mrf.mxu0  ;;  %v6505_v43 = vpop.f32.mrf.mxu1 }
0x1087   :  { %6777 = vmatmul.bf16.vlgmr.msra.gmra.mxu3 %v10128_v27 }
0x108a   :  { %v6289_v11 = vpop.f32.mrf.mxu3 }
0x108b   :  { %v10243_v47 = vadd.f32 %v6386_v28, %v6289_v11 }
0x108e   :  { %v6391_v24 = vpop.f32.mrf.mxu0  ;;  %v6507_v6 = vpop.f32.mrf.mxu1 }
0x108f   :  { %v6541_v55 = vpack.c.bf16 %v6507_v6, %v6505_v43 }
0x1091   :  { %6626 = vmatmul.bf16.gmra.mxu2 %v6541_v55 }
0x1092   :  { %v6291_v32 = vpop.f32.mrf.mxu3 }
0x1093   :  { %v10245_v2 = vadd.f32 %v6388_v41, %v6291_v32 }
0x1096   :  { %v6510_v53 = vpop.f32.mrf.mxu1  ;;  %v6393_v51 = vpop.f32.mrf.mxu0 }
0x1097   :  { %6782 = vmatmul.bf16.gmra.mxu3 %v10131_v40 }
0x109a   :  { %v6294_v18 = vpop.f32.mrf.mxu3 }
0x109b   :  { %v10248_v59 = vadd.f32 %v6391_v24, %v6294_v18 }
0x109e   :  { %v6512_v19 = vpop.f32.mrf.mxu1  ;;  %v6396_v27 = vpop.f32.mrf.mxu0 }
0x109f   :  { %v6542_v36 = vpack.c.bf16 %v6512_v19, %v6510_v53 }
0x10a1   :  { %6631 = vmatmul.bf16.gmra.mxu2 %v6542_v36 }
0x10a2   :  { %v6296_v33 = vpop.f32.mrf.mxu3 }
0x10a3   :  { %v10250_v30 = vadd.f32 %v6393_v51, %v6296_v33 }
0x10a6   :  { %v6515_v60 = vpop.f32.mrf.mxu1  ;;  %v6398_v4 = vpop.f32.mrf.mxu0 }
0x10a7   :  { %6787 = vmatmul.bf16.gmra.mxu3 %v10134_v7 }
0x10aa   :  { %v6299_v39 = vpop.f32.mrf.mxu3 }
0x10ab   :  { %v10253_v0 = vadd.f32 %v6396_v27, %v6299_v39 }
0x10ae   :  { %v6517_v31 = vpop.f32.mrf.mxu1  ;;  %v6401_v5 = vpop.f32.mrf.mxu0 }
0x10af   :  { %v6543_v40 = vpack.c.bf16 %v6517_v31, %v6515_v60 }
0x10b1   :  { %6636 = vmatmul.bf16.gmra.mxu2 %v6543_v40 }
0x10b2   :  { %v6301_v17 = vpop.f32.mrf.mxu3 }
0x10b3   :  { %v10255_v54 = vadd.f32 %v6398_v4, %v6301_v17 }
0x10b6   :  { %v6520_v29 = vpop.f32.mrf.mxu1  ;;  %v6403_v7 = vpop.f32.mrf.mxu0 }
0x10b7   :  { %6792 = vmatmul.bf16.gmra.mxu3 %v10137_v63 }
0x10ba   :  { %v6304_v56 = vpop.f32.mrf.mxu3 }
0x10bb   :  { %v10258_v58 = vadd.f32 %v6401_v5, %v6304_v56 }
0x10be   :  { %v6522_v21 = vpop.f32.mrf.mxu1  ;;  %v6406_v35 = vpop.f32.mrf.mxu0 }
0x10bf   :  { %v6544_v13 = vpack.c.bf16 %v6522_v21, %v6520_v29 }
0x10c1   :  { %6641 = vmatmul.bf16.gmra.mxu2 %v6544_v13 }
0x10c2   :  { %v6306_v8 = vpop.f32.mrf.mxu3 }
0x10c3   :  { %v10260_v38 = vadd.f32 %v6403_v7, %v6306_v8 }
0x10c6   :  { %v6525_v1 = vpop.f32.mrf.mxu1 }
0x10c7   :  { %6797 = vmatmul.bf16.gmra.mxu3 %v10140_v9 }
0x10ca   :  { %v6309_v12 = vpop.f32.mrf.mxu3 }
0x10cb   :  { %v10263_v37 = vadd.f32 %v6406_v35, %v6309_v12 }
0x10ce   :  { %v6527_v22 = vpop.f32.mrf.mxu1 }
0x10cf   :  { %v6545_v61 = vpack.c.bf16 %v6527_v22, %v6525_v1  ;;  %v6408_v22 = vpop.f32.mrf.mxu0 }
0x10d1   :  { %6646 = vmatmul.bf16.gmra.mxu2 %v6545_v61 }
0x10d2   :  { %v10265_v63 = vpop.f32.mrf.mxu3 }
0x10d6   :  { %v6530_v10 = vpop.f32.mrf.mxu1 }
0x10d7   :  { %6802 = vmatmul.bf16.gmra.mxu3 %v10143_v42 }
0x10da   :  { %v10268_v45 = vpop.f32.mrf.mxu3 }
0x10de   :  { %v6532_v46 = vpop.f32.mrf.mxu1 }
0x10df   :  { %v6546_v52 = vpack.c.bf16 %v6532_v46, %v6530_v10 }
0x10e1   :  { %6651 = vmatmul.bf16.gmra.mxu2 %v6546_v52 }
0x10e2   :  { %v10270_v34 = vpop.f32.mrf.mxu3 }
0x10e6   :  { %v6535_v9 = vpop.f32.mrf.mxu1 }
0x10e7   :  { %6807 = vmatmul.bf16.gmra.mxu3 %v10146_v57 }
0x10ea   :  { %v10273_v26 = vpop.f32.mrf.mxu3 }
0x10ee   :  { %v6537_v16 = vpop.f32.mrf.mxu1 }
0x10ef   :  { %v6547_v15 = vpack.c.bf16 %v6537_v16, %v6535_v9  ;;  %v6411_v16 = vpop.f32.mrf.mxu0 }
0x10f1   :  { %6656 = vmatmul.bf16.gmra.mxu2 %v6547_v15 }
0x10f2   :  { %v10275_v20 = vpop.f32.mrf.mxu3 }
0x10f7   :  { %6812 = vmatmul.bf16.gmra.mxu3 %v10149_v50 }
0x10fa   :  { %v10278_v42 = vpop.f32.mrf.mxu3 }
0x1102   :  { %v10280_v48 = vpop.f32.mrf.mxu3 }
0x1104   :  { %v6622_v49 = vpop.f32.mrf.mxu2 }
0x1105   :  { %v6662_v44 = vadd.f32 %v6622_v49, %v10243_v47 }
0x1107   :  { %v6683_v23 = vadd.f32 %v10283_v14, %v6662_v44 }
0x110a   :  { %v6778_v57 = vpop.f32.mrf.mxu3 }
0x110b   :  { %v6779_v28 = vadd.f32 %v10285_v25, %v6778_v57 }
0x110c   :  { %v6624_v62 = vpop.f32.mrf.mxu2 }
0x110d   :  { %v10289_v3 = vadd.f32 %v6779_v28, %v6683_v23  ;;  %v6663_v50 = vadd.f32 %v6624_v62, %v10245_v2  ;;  %v6413_v28 = vpop.f32.mrf.mxu0 }
0x110f   :  { %v6684_v43 = vadd.f32 %v10283_v14, %v6663_v50 }
0x1112   :  { %v6780_v41 = vpop.f32.mrf.mxu3 }
0x1113   :  { %v6781_v11 = vadd.f32 %v10285_v25, %v6780_v41 }
0x1114   :  { %v6627_v47 = vpop.f32.mrf.mxu2 }
0x1115   :  { %v10294_v24 = vadd.f32 %v6781_v11, %v6684_v43  ;;  %v6664_v6 = vadd.f32 %v6627_v47, %v10248_v59  ;;  %v6416_v43 = vpop.f32.mrf.mxu0 }
0x1117   :  { %v6685_v32 = vadd.f32 %v10283_v14, %v6664_v6 }
0x111a   :  { %v6783_v55 = vpop.f32.mrf.mxu3 }
0x111b   :  { %v6784_v53 = vadd.f32 %v10285_v25, %v6783_v55 }
0x111c   :  { %v6629_v51 = vpop.f32.mrf.mxu2 }
0x111d   :  { %v10299_v18 = vadd.f32 %v6784_v53, %v6685_v32  ;;  %v6665_v2 = vadd.f32 %v6629_v51, %v10250_v30  ;;  %v6418_v6 = vpop.f32.mrf.mxu0 }
0x111f   :  { %v6686_v36 = vadd.f32 %v10283_v14, %v6665_v2 }
0x1122   :  { %v6785_v19 = vpop.f32.mrf.mxu3 }
0x1123   :  { %v6786_v27 = vadd.f32 %v10285_v25, %v6785_v19 }
0x1124   :  { %v6632_v33 = vpop.f32.mrf.mxu2 }
0x1125   :  { %v10304_v60 = vadd.f32 %v6786_v27, %v6686_v36  ;;  %v6666_v59 = vadd.f32 %v6632_v33, %v10253_v0  ;;  %v6421_v32 = vpop.f32.mrf.mxu0 }
0x1126   :  { %v6422_v27 = vadd.f32 %v6421_v32, %v10278_v42 }
0x1127   :  { %v6687_v4 = vadd.f32 %v10283_v14, %v6666_v59  ;;  %v6419_v59 = vadd.f32 %v6418_v6, %v10275_v20  ;;  %v6412_v20 = vadd.f32 %v6411_v16, %v10268_v45  ;;  %v6886_v45 = vld [vmem:[%s10428_s10 + $0x78] sm:$0xff]  ;;  %v6885_v16 = vld [vmem:[%s10428_s10 + $0x70] sm:$0xff] }
0x1128   :  { %6891 = vmatpush.msrb.mxu1 %v6886_v45  ;;  %v6882_v6 = vld [vmem:[%s10428_s10 + $0x58] sm:$0xff] }
0x112a   :  { %v6788_v39 = vpop.f32.mrf.mxu3  ;;  %6892 = vmatpush.msrb.mxu1 %v6885_v16 }
0x112b   :  { %v6789_v31 = vadd.f32 %v10285_v25, %v6788_v39 }
0x112c   :  { %v6634_v40 = vpop.f32.mrf.mxu2 }
0x112d   :  { %v10309_v17 = vadd.f32 %v6789_v31, %v6687_v4  ;;  %v6667_v30 = vadd.f32 %v6634_v40, %v10255_v54  ;;  %v6423_v19 = vpop.f32.mrf.mxu0  ;;  %v6417_v31 = vadd.f32 %v6416_v43, %v10273_v26 }
0x112e   :  { %v6424_v33 = vadd.f32 %v6423_v19, %v10280_v48 }
0x112f   :  { %v6688_v29 = vadd.f32 %v10283_v14, %v6667_v30 }
0x1132   :  { %v6790_v5 = vpop.f32.mrf.mxu3 }
0x1133   :  { %v6791_v56 = vadd.f32 %v10285_v25, %v6790_v5  ;;  %v6414_v5 = vadd.f32 %v6413_v28, %v10270_v34  ;;  %v6409_v34 = vadd.f32 %v6408_v22, %v10265_v63 }
0x1134   :  { %v6637_v21 = vpop.f32.mrf.mxu2 }
0x1135   :  { %v10314_v13 = vadd.f32 %v6791_v56, %v6688_v29  ;;  %v6668_v0 = vadd.f32 %v6637_v21, %v10258_v58 }
0x1137   :  { %v6689_v8 = vadd.f32 %v10283_v14, %v6668_v0 }
0x113a   :  { %v6793_v7 = vpop.f32.mrf.mxu3 }
0x113b   :  { %v6794_v1 = vadd.f32 %v10285_v25, %v6793_v7 }
0x113c   :  { %v6639_v35 = vpop.f32.mrf.mxu2 }
0x113d   :  { %v10319_v12 = vadd.f32 %v6794_v1, %v6689_v8  ;;  %v6669_v54 = vadd.f32 %v6639_v35, %v10260_v38 }
0x113f   :  { %v6690_v10 = vadd.f32 %v10283_v14, %v6669_v54 }
0x1142   :  { %v6795_v61 = vpop.f32.mrf.mxu3 }
0x1143   :  { %v6796_v46 = vadd.f32 %v10285_v25, %v6795_v61 }
0x1144   :  { %v6642_v52 = vpop.f32.mrf.mxu2 }
0x1145   :  { %v10324_v9 = vadd.f32 %v6796_v46, %v6690_v10  ;;  %v6670_v58 = vadd.f32 %v6642_v52, %v10263_v37 }
0x1147   :  { %v6691_v49 = vadd.f32 %v10283_v14, %v6670_v58  ;;  %v6841_v19 = vmax.f32 %v10324_v9, 0.0  ;;  %v6875_v9 = vld [vmem:[%s10428_s10 + $0x20] sm:$0xff] }
0x114a   :  { %v6798_v15 = vpop.f32.mrf.mxu3 }
0x114b   :  { %v6799_v44 = vadd.f32 %v10285_v25, %v6798_v15 }
0x114c   :  { %v6644_v57 = vpop.f32.mrf.mxu2 }
0x114d   :  { %v10329_v23 = vadd.f32 %v6799_v44, %v6691_v49  ;;  %v6671_v58 = vadd.f32 %v6644_v57, %v6409_v34  ;;  %v6884_v44 = vld [vmem:[%s10428_s10 + $0x68] sm:$0xff] }
0x114e   :  { %6893 = vmatpush.msrb.mxu1 %v6884_v44 }
0x114f   :  { %v6692_v43 = vadd.f32 %v10283_v14, %v6671_v58 }
0x1152   :  { %v6800_v38 = vpop.f32.mrf.mxu3 }
0x1153   :  { %v6801_v28 = vadd.f32 %v10285_v25, %v6800_v38 }
0x1154   :  { %v6647_v62 = vpop.f32.mrf.mxu2 }
0x1155   :  { %v6672_v54 = vadd.f32 %v6647_v62, %v6412_v20 }
0x1157   :  { %v6693_v57 = vadd.f32 %v10283_v14, %v6672_v54 }
0x115a   :  { %v6803_v50 = vpop.f32.mrf.mxu3 }
0x115b   :  { %v6804_v15 = vadd.f32 %v10285_v25, %v6803_v50  ;;  %v6883_v50 = vld [vmem:[%s10428_s10 + $0x60] sm:$0xff] }
0x115c   :  { %v6649_v41 = vpop.f32.mrf.mxu2  ;;  %6894 = vmatpush.msrb.mxu1 %v6883_v50 }
0x115d   :  { %v6673_v7 = vadd.f32 %v6649_v41, %v6414_v5 }
0x115e   :  { %6895 = vmatpush.msrb.mxu1 %v6882_v6 }
0x115f   :  { %v6694_v63 = vadd.f32 %v10283_v14, %v6673_v7 }
0x1162   :  { %v6805_v11 = vpop.f32.mrf.mxu3 }
0x1163   :  { %v6806_v61 = vadd.f32 %v10285_v25, %v6805_v11  ;;  %v6828_v11 = vadd.f32 %v6804_v15, %v6693_v57 }
0x1164   :  { %v6652_v47 = vpop.f32.mrf.mxu2 }
0x1165   :  { %v6674_v29 = vadd.f32 %v6652_v47, %v6417_v31  ;;  %v6829_v62 = vadd.f32 %v6806_v61, %v6694_v63  ;;  %v6835_v31 = vmax.f32 %v10294_v24, 0.0  ;;  %v9071_v24 = vld [vmem:[%s10429_s11] ss:$0 sm:$0xff] }
0x1167   :  { %v6695_v10 = vadd.f32 %v10283_v14, %v6674_v29  ;;  %v6845_v38 = vmax.f32 %v6829_v62, 0.0 }
0x116a   :  { %v6808_v55 = vpop.f32.mrf.mxu3 }
0x116b   :  { %v6809_v26 = vadd.f32 %v10285_v25, %v6808_v55  ;;  %v6881_v55 = vld [vmem:[%s10428_s10 + $0x50] sm:$0xff] }
0x116c   :  { %v6654_v37 = vpop.f32.mrf.mxu2  ;;  %6896 = vmatpush.msrb.mxu1 %v6881_v55 }
0x116d   :  { %v6675_v40 = vadd.f32 %v6654_v37, %v6419_v59  ;;  %v6830_v22 = vadd.f32 %v6809_v26, %v6695_v10  ;;  %v6844_v37 = vmax.f32 %v6828_v11, 0.0  ;;  %v6838_v59 = vmax.f32 %v10309_v17, 0.0  ;;  %v6872_v17 = vld [vmem:[%s10428_s10 + $0x8] sm:$0xff] }
0x116f   :  { %v6696_v8 = vadd.f32 %v10283_v14, %v6675_v40  ;;  %v6846_v47 = vmax.f32 %v6830_v22, 0.0  ;;  %v6834_v40 = vmax.f32 %v10289_v3, 0.0 }
0x1172   :  { %v6810_v53 = vpop.f32.mrf.mxu3 }
0x1173   :  { %v6811_v21 = vadd.f32 %v10285_v25, %v6810_v53  ;;  %v6879_v53 = vld [vmem:[%s10428_s10 + $0x40] sm:$0xff] }
0x1174   :  { %v6657_v51 = vpop.f32.mrf.mxu2 }
0x1175   :  { %v6676_v39 = vadd.f32 %v6657_v51, %v6422_v27  ;;  %v6831_v46 = vadd.f32 %v6811_v21, %v6696_v8  ;;  %v6842_v51 = vmax.f32 %v10329_v23, 0.0  ;;  %v6840_v27 = vmax.f32 %v10319_v12, 0.0  ;;  %v6876_v23 = vld [vmem:[%s10428_s10 + $0x28] sm:$0xff]  ;;  %v6874_v12 = vld [vmem:[%s10428_s10 + $0x18] sm:$0xff] }
0x1177   :  { %v6697_v0 = vadd.f32 %v10283_v14, %v6676_v39  ;;  %v6847_v41 = vmax.f32 %v6831_v46, 0.0  ;;  %v6837_v39 = vmax.f32 %v10304_v60, 0.0  ;;  %v6871_v60 = vld [vmem:[%s10428_s10] sm:$0xff] }
0x117a   :  { %v6813_v2 = vpop.f32.mrf.mxu3 }
0x117b   :  { %v6814_v30 = vadd.f32 %v10285_v25, %v6813_v2  ;;  %v6878_v2 = vld [vmem:[%s10428_s10 + $0x38] sm:$0xff] }
0x117c   :  { %v6659_v36 = vpop.f32.mrf.mxu2 }
0x117d   :  { %v6677_v4 = vadd.f32 %v6659_v36, %v6424_v33  ;;  %v6832_v1 = vadd.f32 %v6814_v30, %v6697_v0  ;;  %v6877_v36 = vld [vmem:[%s10428_s10 + $0x30] sm:$0xff]  ;;  %v6839_v33 = vmax.f32 %v10314_v13, 0.0 }
0x117e   :  { %v6873_v13 = vld [vmem:[%s10428_s10 + $0x10] sm:$0xff] }
0x117f   :  { %v6698_v42 = vadd.f32 %v10283_v14, %v6677_v4  ;;  %v6848_v49 = vmax.f32 %v6832_v1, 0.0  ;;  %v6880_v14 = vld [vmem:[%s10428_s10 + $0x48] sm:$0xff]  ;;  %v6836_v4 = vmax.f32 %v10299_v18, 0.0  ;;  %v6850_v18 = vld [vmem:[%s10427_s9] sm:$0xff] }
0x1180   :  { %6897 = vmatpush.msrb.mxu1 %v6880_v14 }
0x1182   :  { %v6815_v56 = vpop.f32.mrf.mxu3  ;;  %6898 = vmatpush.msrb.mxu1 %v6879_v53 }
0x1183   :  { %v6816_v48 = vadd.f32 %v10285_v25, %v6815_v56  ;;  %v6827_v25 = vadd.f32 %v6801_v28, %v6692_v43 }
0x1184   :  { %6899 = vmatpush.msrb.mxu1 %v6878_v2 }
0x1185   :  { %v6833_v35 = vadd.f32 %v6816_v48, %v6698_v42  ;;  %v6843_v32 = vmax.f32 %v6827_v25, 0.0 }
0x1186   :  { %6900 = vmatpush.msrb.mxu1 %v6877_v36 }
0x1187   :  { %v6849_v52 = vmax.f32 %v6833_v35, 0.0 }
0x1188   :  { %6901 = vmatpush.msrb.mxu1 %v6876_v23 }
0x1189   :  { %6851 = vmatpush.msrb.mxu0 %v6849_v52 }
0x118a   :  { %6902 = vmatpush.msrb.mxu1 %v6875_v9 }
0x118b   :  { %6852 = vmatpush.msrb.mxu0 %v6848_v49 }
0x118c   :  { %6903 = vmatpush.msrb.mxu1 %v6874_v12 }
0x118d   :  { %6853 = vmatpush.msrb.mxu0 %v6847_v41 }
0x118e   :  { %6904 = vmatpush.msrb.mxu1 %v6873_v13 }
0x118f   :  { %6854 = vmatpush.msrb.mxu0 %v6846_v47 }
0x1190   :  { %6905 = vmatpush.msrb.mxu1 %v6872_v17 }
0x1191   :  { %6855 = vmatpush.msrb.mxu0 %v6845_v38 }
0x1192   :  { %6906 = vmatpush.msrb.mxu1 %v6871_v60 }
0x1193   :  { %6856 = vmatpush.msrb.mxu0 %v6844_v37 }
0x1195   :  { %6857 = vmatpush.msrb.mxu0 %v6843_v32 }
0x1197   :  { %6858 = vmatpush.msrb.mxu0 %v6842_v51 }
0x1199   :  { %6859 = vmatpush.msrb.mxu0 %v6841_v19 }
0x119b   :  { %6860 = vmatpush.msrb.mxu0 %v6840_v27 }
0x119d   :  { %6861 = vmatpush.msrb.mxu0 %v6839_v33 }
0x119f   :  { %6862 = vmatpush.msrb.mxu0 %v6838_v59 }
0x11a1   :  { %6863 = vmatpush.msrb.mxu0 %v6837_v39 }
0x11a3   :  { %6864 = vmatpush.msrb.mxu0 %v6836_v4 }
0x11a5   :  { %6865 = vmatpush.msrb.mxu0 %v6835_v31 }
0x11a7   :  { %6866 = vmatpush.msrb.mxu0 %v6834_v40 }
0x11a8   :  { %6867 = vmatmul.f32.vlgmr.msrb.gmra.mxu0 %v6850_v18 }
0x1225   :  { %v6868_v30 = vpop.f32.mrf.mxu0 }
0x1226   :  { %6907 = vmatmul.f32.vlgmr.msrb.gmra.mxu1 %v6868_v30 }
0x12a3   :  { %v6908_v5 = vpop.f32.mrf.mxu1 }
0x12a4   :  { %v6909_v29 = vadd.f32 %v9071_v24, %v6908_v5 }
0x12a6   :  { %6911 = vst [vmem:[%s10430_s12] sm:$0xff] %v6909_v29 }
0x12a7   :  { %6916 = vsyncpa [#allocation3], 1 }
0x12a8   :  { %6917 = vsyncpa [#allocation5], 1 }
0x12a9   :  { %6918 = vsyncpa [#allocation8], 1 }
0x12aa   :  { %6919 = vsyncpa [#allocation11], 1 }

</bundles_post_ra>
